<compile_context>
chip_gen: v7x
topology: tpu7x:2x2x1
jax: 0.10.0
libtpu: 0.0.40
codegen_flags: <defaults>
</compile_context>

<pallas_src>
import jax
import jax.numpy as jnp
from jax.experimental import pallas as pl
from jax.experimental.pallas import tpu as pltpu


# --------------------------------------------------------------------------
# Fused kernel: GCN -> context gate -> reweight -> multi-layer LSTM
# (one grid step == one chunk of Bc batch elements, folded into M = Bc*N rows)
# --------------------------------------------------------------------------
def _cg_lstm_kernel(adjb_ref, x_ref, wg_ref, bg_ref, wfc_ref, bfc_ref, pool_ref,
                    h0_ref, c0_ref, wih0_ref, wih_ref, whh_ref, b_ref,
                    out_ref, hN_ref, cN_ref,
                    seq_ref, gx_ref):
    K = adjb_ref.shape[0]
    _, M, T = x_ref.shape                       # M = Bc * N (batch folded into rows)
    L, _, H = h0_ref.shape
    G = 4 * H
    Bc = pool_ref.shape[0]
    N = M // Bc
    f32 = jnp.float32

    # ---------------- GCN: per-hop accumulating matmuls (no concat) --------
    x_mt = x_ref[0]                             # (M, T), rows batch-major
    acc = jnp.zeros((M, T), f32)
    for k in range(K):
        prop = jnp.dot(adjb_ref[k], x_mt, preferred_element_type=f32)      # (M, T)
        acc = acc + jnp.dot(prop, wg_ref[k], preferred_element_type=f32)   # (M, T)
    g = jnp.maximum(acc + bg_ref[...], 0.0)     # assumed GCN bias + ReLU
    x_hat = x_mt + g                            # (M, T)

    # ---------------- context gate: node-mean pool -> fc -> fc -------------
    z = jnp.dot(pool_ref[...], x_hat, preferred_element_type=f32)          # (Bc, T)
    wfc = wfc_ref[...]                          # hoisted loads
    bfc = bfc_ref[...]
    # NOTE: same fc applied twice (relu then sigmoid), as in the torch forward.
    h1 = jnp.maximum(jnp.dot(z, wfc, preferred_element_type=f32) + bfc, 0.0)
    s = jax.nn.sigmoid(jnp.dot(h1, wfc, preferred_element_type=f32) + bfc)  # (Bc, T)

    # ---------------- re-weighted inputs + layer-0 gates (bias folded) -----
    s_exp = jnp.broadcast_to(s.reshape(Bc, 1, T), (Bc, N, T)).reshape(M, T)
    xw = x_mt * s_exp                           # (M, T)
    w0 = wih0_ref[...]                          # (1, 4H)  (input_dim == 1 -> rank-1)
    b0 = b_ref[0]                               # (1, 4H)  combined layer-0 bias
    # short static setup loop, off the recurrent chain (layout-safe lane slices)
    for t in range(T):
        gx_ref[t] = xw[:, t:t + 1] * w0 + b0    # (M,1)*(1,4H) -> (M,4H)

    # ---------------- multi-layer LSTM (PyTorch gate order i,f,g,o) --------
    lane = jax.lax.broadcasted_iota(jnp.int32, (M, G), 1)
    tanh_mask = jnp.logical_and(lane >= 2 * H, lane < 3 * H)  # hoisted gate mask

    for l in range(L):
        if l > 0:
            # hoisted input projection: one (T*M, H) @ (H, 4H) matmul per layer,
            # bias folded into the epilogue (off the recurrent chain)
            inp = seq_ref[...].reshape(T * M, H)
            gx_ref[...] = (jnp.dot(inp, wih_ref[l], preferred_element_type=f32)
                           + b_ref[l]).reshape(T, M, G)
        whh_l = whh_ref[l]                      # (H, 4H), hoisted
        store_seq = l < L - 1                   # last layer's sequence not needed

        def step(t, carry):
            h_t, c_t = carry
            # per-step critical path: one (M,H)@(H,4H) matmul + one add
            gates = gx_ref[t] + jnp.dot(h_t, whh_l, preferred_element_type=f32)
            sig = jax.nn.sigmoid(gates)         # full-width, lane-dense EUP passes
            tnh = jnp.tanh(gates)
            sel = jnp.where(tanh_mask, tnh, sig)  # one select; slice after the EUP
            i_g = sel[:, 0 * H:1 * H]
            f_g = sel[:, 1 * H:2 * H]
            g_g = sel[:, 2 * H:3 * H]
            o_g = sel[:, 3 * H:4 * H]
            c_n = f_g * c_t + i_g * g_g
            h_n = o_g * jnp.tanh(c_n)
            if store_seq:
                seq_ref[t] = h_n
            return h_n, c_n

        h, c = jax.lax.fori_loop(0, T, step, (h0_ref[l], c0_ref[l]), unroll=True)
        hN_ref[l] = h
        cN_ref[l] = c

    out_ref[...] = h.reshape(Bc, N, H)          # last timestep, last layer


# --------------------------------------------------------------------------
# Wrapper
# --------------------------------------------------------------------------
def cg_lstm_forward(params, adj, obs_seq, hidden, *, num_chunks=1):
    """Fused CG_LSTM forward.

    num_chunks=1 folds the whole batch into one recurrence (best on single-TC
    v5e/v6e); num_chunks=2 keeps one grid step per TensorCore on v7x with the
    remaining batch elements folded per core.
    """
    K, N, _ = adj.shape
    B, T, _ = obs_seq.shape
    h0, c0 = hidden
    L, BN, H = h0.shape
    assert BN == B * N, "hidden rows must be batch-major (B*N, H)"
    assert B % num_chunks == 0
    C = num_chunks
    Bc = B // C
    M = Bc * N
    f32 = jnp.float32

    # one-time host-side layout prep (tiny tensors)
    eye_b = jnp.eye(Bc, dtype=f32)
    adj_blk = jnp.stack([jnp.kron(eye_b, adj[k]) for k in range(K)])    # (K, M, M)
    wg3 = params["wg"].reshape(K, T, T)                                 # per-hop GCN weight
    poolT = jnp.kron(eye_b, jnp.ones((1, N), f32)) / N                  # (Bc, M) node-mean pool
    # obs_seq (B, T, N) -> (C, Bc*N, T); rows batch-major, matching hidden rows
    x_cmt = jnp.transpose(obs_seq, (0, 2, 1)).reshape(C, M, T)

    def _shared(shape):
        nd = len(shape)
        return pl.BlockSpec(shape, lambda c: (0,) * nd)

    out, hN, cN = pl.pallas_call(
        _cg_lstm_kernel,
        out_shape=(jax.ShapeDtypeStruct((B, N, H), f32),
                   jax.ShapeDtypeStruct((L, B * N, H), f32),
                   jax.ShapeDtypeStruct((L, B * N, H), f32)),
        grid=(C,),
        in_specs=[
            _shared((K, M, M)),                               # block-diag supports
            pl.BlockSpec((1, M, T), lambda c: (c, 0, 0)),     # obs rows of this chunk
            _shared((K, T, T)),                               # GCN weights per hop
            _shared((1, T)),                                  # GCN bias
            _shared((T, T)),                                  # context-gate fc weight
            _shared((1, T)),                                  # context-gate fc bias
            _shared((Bc, M)),                                 # node-mean pooling matrix
            pl.BlockSpec((L, M, H), lambda c: (0, c, 0)),     # h0 rows of this chunk
            pl.BlockSpec((L, M, H), lambda c: (0, c, 0)),     # c0 rows of this chunk
            _shared((1, 4 * H)),                              # W_ih layer 0 (input_dim=1)
            _shared((L, H, 4 * H)),                           # W_ih layers >= 1 (row 0 unused)
            _shared((L, H, 4 * H)),                           # W_hh
            _shared((L, 1, 4 * H)),                           # combined LSTM biases
        ],
        out_specs=(
            pl.BlockSpec((Bc, N, H), lambda c: (c, 0, 0)),
            pl.BlockSpec((L, M, H), lambda c: (0, c, 0)),
            pl.BlockSpec((L, M, H), lambda c: (0, c, 0)),
        ),
        scratch_shapes=[pltpu.VMEM((T, M, H), f32),           # per-layer output sequence
                        pltpu.VMEM((T, M, 4 * H), f32)],      # precomputed input gates
        compiler_params=pltpu.CompilerParams(
            dimension_semantics=("parallel",)),               # per-core chunks on v7x
    )(adj_blk, x_cmt, wg3, params["bg"], params["wfc"], params["bfc"], poolT,
      h0, c0, params["wih0"], params["wih"], params["whh"], params["b"])
    return out, (hN, cN)


# --------------------------------------------------------------------------
# Deterministic parameter init (synthetic, matches module shapes)
# --------------------------------------------------------------------------
def init_params(key, seq_len, hidden_dim, num_layers, K, input_dim=1):
    k_wg, k_wfc, k_bfc, k_lstm = jax.random.split(key, 4)
    scale = 0.1
    T, H, L = seq_len, hidden_dim, num_layers
    # GCN: hop-major (K*T, T) weight, zero bias (assumed structure, see TODO above)
    wg = scale * jax.random.normal(k_wg, (K * T, T), jnp.float32)
    bg = jnp.zeros((1, T), jnp.float32)
    # context-gate fc (nn.Linear(T, T)), row form: y = z @ wfc + bfc
    wfc = scale * jax.random.normal(k_wfc, (T, T), jnp.float32)
    bfc = scale * jax.random.normal(k_bfc, (1, T), jnp.float32)

    wih0 = jnp.zeros((1, 4 * H), jnp.float32)
    wih = jnp.zeros((L, H, 4 * H), jnp.float32)               # row 0 unused
    whh = jnp.zeros((L, H, 4 * H), jnp.float32)
    b = jnp.zeros((L, 1, 4 * H), jnp.float32)
    for l in range(L):
        in_dim = input_dim if l == 0 else H
        w_ih_l = scale * jax.random.normal(
            jax.random.fold_in(k_lstm, 4 * l + 0), (4 * H, in_dim), jnp.float32)
        w_hh_l = scale * jax.random.normal(
            jax.random.fold_in(k_lstm, 4 * l + 1), (4 * H, H), jnp.float32)
        b_ih_l = scale * jax.random.normal(
            jax.random.fold_in(k_lstm, 4 * l + 2), (4 * H,), jnp.float32)
        b_hh_l = scale * jax.random.normal(
            jax.random.fold_in(k_lstm, 4 * l + 3), (4 * H,), jnp.float32)
        if l == 0:
            wih0 = w_ih_l.T                                    # (1, 4H)
        else:
            wih = wih.at[l].set(w_ih_l.T)                      # (H, 4H)
        whh = whh.at[l].set(w_hh_l.T)
        b = b.at[l, 0].set(b_ih_l + b_hh_l)
    return dict(wg=wg, bg=bg, wfc=wfc, bfc=bfc,
                wih0=wih0, wih=wih, whh=whh, b=b)


if __name__ == "__main__":
    B, T, N = 2, 8, 16          # batch, seq_len, n_nodes
    input_dim, H, L, K = 1, 32, 2, 3

    key = jax.random.PRNGKey(0)
    k_adj, k_obs, k_par = jax.random.split(key, 3)

    adj = jax.random.uniform(k_adj, (K, N, N), jnp.float32)
    adj = adj / jnp.sum(adj, axis=-1, keepdims=True)          # row-normalized supports
    obs_seq = jax.random.normal(k_obs, (B, T, N), jnp.float32)
    params = init_params(k_par, T, H, L, K, input_dim)

    # init_hidden(batch_size): zeros of (L, B*N, H)
    h0 = jnp.zeros((L, B * N, H), jnp.float32)
    c0 = jnp.zeros((L, B * N, H), jnp.float32)

    output, (hN, cN) = cg_lstm_forward(params, adj, obs_seq, (h0, c0))
    jax.block_until_ready((output, hN, cN))

    assert output.shape == (B, N, H)
    assert hN.shape == (L, B * N, H) and cN.shape == (L, B * N, H)
    print("KERNEL_OK")
</pallas_src>

<mosaic_0001>
module attributes {stable_mosaic.version = 11 : i64} {
  func.func @_cg_lstm_kernel(%arg0: i32, %arg1: memref<3x32x32xf32, #tpu.memory_space<vmem>>, %arg2: memref<1x32x8xf32, #tpu.memory_space<vmem>>, %arg3: memref<3x8x8xf32, #tpu.memory_space<vmem>>, %arg4: memref<1x8xf32, #tpu.memory_space<vmem>>, %arg5: memref<8x8xf32, #tpu.memory_space<vmem>>, %arg6: memref<1x8xf32, #tpu.memory_space<vmem>>, %arg7: memref<2x32xf32, #tpu.memory_space<vmem>>, %arg8: memref<2x32x32xf32, #tpu.memory_space<vmem>>, %arg9: memref<2x32x32xf32, #tpu.memory_space<vmem>>, %arg10: memref<1x128xf32, #tpu.memory_space<vmem>>, %arg11: memref<2x32x128xf32, #tpu.memory_space<vmem>>, %arg12: memref<2x32x128xf32, #tpu.memory_space<vmem>>, %arg13: memref<2x1x128xf32, #tpu.memory_space<vmem>>, %arg14: memref<2x16x32xf32, #tpu.memory_space<vmem>>, %arg15: memref<2x32x32xf32, #tpu.memory_space<vmem>>, %arg16: memref<2x32x32xf32, #tpu.memory_space<vmem>>, %arg17: memref<8x32x32xf32, #tpu.memory_space<vmem>>, %arg18: memref<8x32x128xf32, #tpu.memory_space<vmem>>) attributes {dimension_semantics = [#tpu.dimension_semantics<parallel>], iteration_bounds = array<i64: 1>, scalar_prefetch = 0 : i64, scratch_operands = 2 : i64, tpu.core_type = #tpu.core_type<tc>, window_params = [{pipeline_mode = #tpu.pipeline_mode<synchronous>, transform_indices = @transform_0, window_bounds = array<i64: 3, 32, 32>}, {transform_indices = @transform_1, window_bounds = array<i64: 1, 32, 8>}, {pipeline_mode = #tpu.pipeline_mode<synchronous>, transform_indices = @transform_2, window_bounds = array<i64: 3, 8, 8>}, {pipeline_mode = #tpu.pipeline_mode<synchronous>, transform_indices = @transform_3, window_bounds = array<i64: 1, 8>}, {pipeline_mode = #tpu.pipeline_mode<synchronous>, transform_indices = @transform_4, window_bounds = array<i64: 8, 8>}, {pipeline_mode = #tpu.pipeline_mode<synchronous>, transform_indices = @transform_5, window_bounds = array<i64: 1, 8>}, {pipeline_mode = #tpu.pipeline_mode<synchronous>, transform_indices = @transform_6, window_bounds = array<i64: 2, 32>}, {transform_indices = @transform_7, window_bounds = array<i64: 2, 32, 32>}, {transform_indices = @transform_8, window_bounds = array<i64: 2, 32, 32>}, {pipeline_mode = #tpu.pipeline_mode<synchronous>, transform_indices = @transform_9, window_bounds = array<i64: 1, 128>}, {pipeline_mode = #tpu.pipeline_mode<synchronous>, transform_indices = @transform_10, window_bounds = array<i64: 2, 32, 128>}, {pipeline_mode = #tpu.pipeline_mode<synchronous>, transform_indices = @transform_11, window_bounds = array<i64: 2, 32, 128>}, {pipeline_mode = #tpu.pipeline_mode<synchronous>, transform_indices = @transform_12, window_bounds = array<i64: 2, 1, 128>}, {transform_indices = @transform_13, window_bounds = array<i64: 2, 16, 32>}, {transform_indices = @transform_14, window_bounds = array<i64: 2, 32, 32>}, {transform_indices = @transform_15, window_bounds = array<i64: 2, 32, 32>}]} {
    %c0 = arith.constant 0 : index
    %c0_0 = arith.constant 0 : index
    %c0_1 = arith.constant 0 : index
    %0 = vector.load %arg2[%c0, %c0_0, %c0_1] : memref<1x32x8xf32, #tpu.memory_space<vmem>>, vector<1x32x8xf32>
    %1 = vector.shape_cast %0 : vector<1x32x8xf32> to vector<32x8xf32>
    %cst = arith.constant 0.000000e+00 : f32
    %2 = vector.broadcast %cst : f32 to vector<32x8xf32>
    %c0_2 = arith.constant 0 : index
    %c0_3 = arith.constant 0 : index
    %c0_4 = arith.constant 0 : index
    %3 = vector.load %arg1[%c0_2, %c0_3, %c0_4] : memref<3x32x32xf32, #tpu.memory_space<vmem>>, vector<1x32x32xf32>
    %4 = vector.shape_cast %3 : vector<1x32x32xf32> to vector<32x32xf32>
    %cst_5 = arith.constant dense<0.000000e+00> : vector<32x8xf32>
    %5 = tpu.matmul %4, %1, %cst_5 {dimension_numbers = #tpu.dot_dimension_numbers<[1], [0], [0], [1], [0, 0, 1, 1], [], []>} : vector<32x32xf32>, vector<32x8xf32>, vector<32x8xf32> -> vector<32x8xf32>
    %c0_6 = arith.constant 0 : index
    %c0_7 = arith.constant 0 : index
    %c0_8 = arith.constant 0 : index
    %6 = vector.load %arg3[%c0_6, %c0_7, %c0_8] : memref<3x8x8xf32, #tpu.memory_space<vmem>>, vector<1x8x8xf32>
    %7 = vector.shape_cast %6 : vector<1x8x8xf32> to vector<8x8xf32>
    %cst_9 = arith.constant dense<0.000000e+00> : vector<32x8xf32>
    %8 = tpu.matmul %5, %7, %cst_9 {dimension_numbers = #tpu.dot_dimension_numbers<[1], [0], [0], [1], [0, 0, 1, 1], [], []>} : vector<32x8xf32>, vector<8x8xf32>, vector<32x8xf32> -> vector<32x8xf32>
    %9 = arith.addf %2, %8 : vector<32x8xf32>
    %c1 = arith.constant 1 : index
    %c0_10 = arith.constant 0 : index
    %c0_11 = arith.constant 0 : index
    %10 = vector.load %arg1[%c1, %c0_10, %c0_11] : memref<3x32x32xf32, #tpu.memory_space<vmem>>, vector<1x32x32xf32>
    %11 = vector.shape_cast %10 : vector<1x32x32xf32> to vector<32x32xf32>
    %cst_12 = arith.constant dense<0.000000e+00> : vector<32x8xf32>
    %12 = tpu.matmul %11, %1, %cst_12 {dimension_numbers = #tpu.dot_dimension_numbers<[1], [0], [0], [1], [0, 0, 1, 1], [], []>} : vector<32x32xf32>, vector<32x8xf32>, vector<32x8xf32> -> vector<32x8xf32>
    %c1_13 = arith.constant 1 : index
    %c0_14 = arith.constant 0 : index
    %c0_15 = arith.constant 0 : index
    %13 = vector.load %arg3[%c1_13, %c0_14, %c0_15] : memref<3x8x8xf32, #tpu.memory_space<vmem>>, vector<1x8x8xf32>
    %14 = vector.shape_cast %13 : vector<1x8x8xf32> to vector<8x8xf32>
    %cst_16 = arith.constant dense<0.000000e+00> : vector<32x8xf32>
    %15 = tpu.matmul %12, %14, %cst_16 {dimension_numbers = #tpu.dot_dimension_numbers<[1], [0], [0], [1], [0, 0, 1, 1], [], []>} : vector<32x8xf32>, vector<8x8xf32>, vector<32x8xf32> -> vector<32x8xf32>
    %16 = arith.addf %9, %15 : vector<32x8xf32>
    %c2 = arith.constant 2 : index
    %c0_17 = arith.constant 0 : index
    %c0_18 = arith.constant 0 : index
    %17 = vector.load %arg1[%c2, %c0_17, %c0_18] : memref<3x32x32xf32, #tpu.memory_space<vmem>>, vector<1x32x32xf32>
    %18 = vector.shape_cast %17 : vector<1x32x32xf32> to vector<32x32xf32>
    %cst_19 = arith.constant dense<0.000000e+00> : vector<32x8xf32>
    %19 = tpu.matmul %18, %1, %cst_19 {dimension_numbers = #tpu.dot_dimension_numbers<[1], [0], [0], [1], [0, 0, 1, 1], [], []>} : vector<32x32xf32>, vector<32x8xf32>, vector<32x8xf32> -> vector<32x8xf32>
    %c2_20 = arith.constant 2 : index
    %c0_21 = arith.constant 0 : index
    %c0_22 = arith.constant 0 : index
    %20 = vector.load %arg3[%c2_20, %c0_21, %c0_22] : memref<3x8x8xf32, #tpu.memory_space<vmem>>, vector<1x8x8xf32>
    %21 = vector.shape_cast %20 : vector<1x8x8xf32> to vector<8x8xf32>
    %cst_23 = arith.constant dense<0.000000e+00> : vector<32x8xf32>
    %22 = tpu.matmul %19, %21, %cst_23 {dimension_numbers = #tpu.dot_dimension_numbers<[1], [0], [0], [1], [0, 0, 1, 1], [], []>} : vector<32x8xf32>, vector<8x8xf32>, vector<32x8xf32> -> vector<32x8xf32>
    %23 = arith.addf %16, %22 : vector<32x8xf32>
    %c0_24 = arith.constant 0 : index
    %c0_25 = arith.constant 0 : index
    %24 = vector.load %arg4[%c0_24, %c0_25] : memref<1x8xf32, #tpu.memory_space<vmem>>, vector<1x8xf32>
    %25 = vector.broadcast %24 : vector<1x8xf32> to vector<32x8xf32>
    %26 = arith.addf %23, %25 : vector<32x8xf32>
    %cst_26 = arith.constant 0.000000e+00 : f32
    %27 = vector.broadcast %cst_26 : f32 to vector<32x8xf32>
    %28 = arith.maximumf %26, %27 : vector<32x8xf32>
    %29 = arith.addf %1, %28 : vector<32x8xf32>
    %c0_27 = arith.constant 0 : index
    %c0_28 = arith.constant 0 : index
    %30 = vector.load %arg7[%c0_27, %c0_28] : memref<2x32xf32, #tpu.memory_space<vmem>>, vector<2x32xf32>
    %cst_29 = arith.constant dense<0.000000e+00> : vector<2x8xf32>
    %31 = tpu.matmul %30, %29, %cst_29 {dimension_numbers = #tpu.dot_dimension_numbers<[1], [0], [0], [1], [0, 0, 1, 1], [], []>} : vector<2x32xf32>, vector<32x8xf32>, vector<2x8xf32> -> vector<2x8xf32>
    %c0_30 = arith.constant 0 : index
    %c0_31 = arith.constant 0 : index
    %32 = vector.load %arg5[%c0_30, %c0_31] : memref<8x8xf32, #tpu.memory_space<vmem>>, vector<8x8xf32>
    %c0_32 = arith.constant 0 : index
    %c0_33 = arith.constant 0 : index
    %33 = vector.load %arg6[%c0_32, %c0_33] : memref<1x8xf32, #tpu.memory_space<vmem>>, vector<1x8xf32>
    %cst_34 = arith.constant dense<0.000000e+00> : vector<2x8xf32>
    %34 = tpu.matmul %31, %32, %cst_34 {dimension_numbers = #tpu.dot_dimension_numbers<[1], [0], [0], [1], [0, 0, 1, 1], [], []>} : vector<2x8xf32>, vector<8x8xf32>, vector<2x8xf32> -> vector<2x8xf32>
    %35 = vector.broadcast %33 : vector<1x8xf32> to vector<2x8xf32>
    %36 = arith.addf %34, %35 : vector<2x8xf32>
    %cst_35 = arith.constant 0.000000e+00 : f32
    %37 = vector.broadcast %cst_35 : f32 to vector<2x8xf32>
    %38 = arith.maximumf %36, %37 : vector<2x8xf32>
    %cst_36 = arith.constant dense<0.000000e+00> : vector<2x8xf32>
    %39 = tpu.matmul %38, %32, %cst_36 {dimension_numbers = #tpu.dot_dimension_numbers<[1], [0], [0], [1], [0, 0, 1, 1], [], []>} : vector<2x8xf32>, vector<8x8xf32>, vector<2x8xf32> -> vector<2x8xf32>
    %40 = vector.broadcast %33 : vector<1x8xf32> to vector<2x8xf32>
    %41 = arith.addf %39, %40 : vector<2x8xf32>
    %42 = arith.negf %41 : vector<2x8xf32>
    %43 = math.exp %42 : vector<2x8xf32>
    %cst_37 = arith.constant 1.000000e+00 : f32
    %44 = vector.broadcast %cst_37 : f32 to vector<2x8xf32>
    %45 = arith.addf %44, %43 : vector<2x8xf32>
    %46 = arith.divf %44, %45 : vector<2x8xf32>
    %47 = vector.shape_cast %46 : vector<2x8xf32> to vector<2x1x8xf32>
    %48 = vector.shape_cast %47 : vector<2x1x8xf32> to vector<2x1x8xf32>
    %49 = vector.broadcast %48 : vector<2x1x8xf32> to vector<2x16x8xf32>
    %50 = vector.shape_cast %49 : vector<2x16x8xf32> to vector<32x8xf32>
    %51 = arith.mulf %1, %50 : vector<32x8xf32>
    %c0_38 = arith.constant 0 : index
    %c0_39 = arith.constant 0 : index
    %52 = vector.load %arg10[%c0_38, %c0_39] : memref<1x128xf32, #tpu.memory_space<vmem>>, vector<1x128xf32>
    %c0_40 = arith.constant 0 : index
    %c0_41 = arith.constant 0 : index
    %c0_42 = arith.constant 0 : index
    %53 = vector.load %arg13[%c0_40, %c0_41, %c0_42] : memref<2x1x128xf32, #tpu.memory_space<vmem>>, vector<1x1x128xf32>
    %54 = vector.shape_cast %53 : vector<1x1x128xf32> to vector<1x128xf32>
    %55 = vector.extract_strided_slice %51 {offsets = [0, 0], sizes = [32, 1], strides = [1, 1]} : vector<32x8xf32> to vector<32x1xf32>
    %56 = vector.broadcast %55 : vector<32x1xf32> to vector<32x128xf32>
    %57 = vector.broadcast %52 : vector<1x128xf32> to vector<32x128xf32>
    %58 = arith.mulf %56, %57 : vector<32x128xf32>
    %59 = vector.broadcast %54 : vector<1x128xf32> to vector<32x128xf32>
    %60 = arith.addf %58, %59 : vector<32x128xf32>
    %c0_43 = arith.constant 0 : index
    %c0_44 = arith.constant 0 : index
    %c0_45 = arith.constant 0 : index
    %61 = vector.load %arg18[%c0_43, %c0_44, %c0_45] : memref<8x32x128xf32, #tpu.memory_space<vmem>>, vector<1x32x128xf32>
    %62 = vector.shape_cast %61 : vector<1x32x128xf32> to vector<32x128xf32>
    %63 = vector.shape_cast %60 : vector<32x128xf32> to vector<1x32x128xf32>
    tpu.vector_store %arg18[%c0_43, %c0_44, %c0_45], %63 {strides = array<i32>} : memref<8x32x128xf32, #tpu.memory_space<vmem>>, vector<1x32x128xf32>,
    %64 = vector.extract_strided_slice %51 {offsets = [0, 1], sizes = [32, 1], strides = [1, 1]} : vector<32x8xf32> to vector<32x1xf32>
    %65 = vector.broadcast %64 : vector<32x1xf32> to vector<32x128xf32>
    %66 = vector.broadcast %52 : vector<1x128xf32> to vector<32x128xf32>
    %67 = arith.mulf %65, %66 : vector<32x128xf32>
    %68 = vector.broadcast %54 : vector<1x128xf32> to vector<32x128xf32>
    %69 = arith.addf %67, %68 : vector<32x128xf32>
    %c1_46 = arith.constant 1 : index
    %c0_47 = arith.constant 0 : index
    %c0_48 = arith.constant 0 : index
    %70 = vector.load %arg18[%c1_46, %c0_47, %c0_48] : memref<8x32x128xf32, #tpu.memory_space<vmem>>, vector<1x32x128xf32>
    %71 = vector.shape_cast %70 : vector<1x32x128xf32> to vector<32x128xf32>
    %72 = vector.shape_cast %69 : vector<32x128xf32> to vector<1x32x128xf32>
    tpu.vector_store %arg18[%c1_46, %c0_47, %c0_48], %72 {strides = array<i32>} : memref<8x32x128xf32, #tpu.memory_space<vmem>>, vector<1x32x128xf32>,
    %73 = vector.extract_strided_slice %51 {offsets = [0, 2], sizes = [32, 1], strides = [1, 1]} : vector<32x8xf32> to vector<32x1xf32>
    %74 = vector.broadcast %73 : vector<32x1xf32> to vector<32x128xf32>
    %75 = vector.broadcast %52 : vector<1x128xf32> to vector<32x128xf32>
    %76 = arith.mulf %74, %75 : vector<32x128xf32>
    %77 = vector.broadcast %54 : vector<1x128xf32> to vector<32x128xf32>
    %78 = arith.addf %76, %77 : vector<32x128xf32>
    %c2_49 = arith.constant 2 : index
    %c0_50 = arith.constant 0 : index
    %c0_51 = arith.constant 0 : index
    %79 = vector.load %arg18[%c2_49, %c0_50, %c0_51] : memref<8x32x128xf32, #tpu.memory_space<vmem>>, vector<1x32x128xf32>
    %80 = vector.shape_cast %79 : vector<1x32x128xf32> to vector<32x128xf32>
    %81 = vector.shape_cast %78 : vector<32x128xf32> to vector<1x32x128xf32>
    tpu.vector_store %arg18[%c2_49, %c0_50, %c0_51], %81 {strides = array<i32>} : memref<8x32x128xf32, #tpu.memory_space<vmem>>, vector<1x32x128xf32>,
    %82 = vector.extract_strided_slice %51 {offsets = [0, 3], sizes = [32, 1], strides = [1, 1]} : vector<32x8xf32> to vector<32x1xf32>
    %83 = vector.broadcast %82 : vector<32x1xf32> to vector<32x128xf32>
    %84 = vector.broadcast %52 : vector<1x128xf32> to vector<32x128xf32>
    %85 = arith.mulf %83, %84 : vector<32x128xf32>
    %86 = vector.broadcast %54 : vector<1x128xf32> to vector<32x128xf32>
    %87 = arith.addf %85, %86 : vector<32x128xf32>
    %c3 = arith.constant 3 : index
    %c0_52 = arith.constant 0 : index
    %c0_53 = arith.constant 0 : index
    %88 = vector.load %arg18[%c3, %c0_52, %c0_53] : memref<8x32x128xf32, #tpu.memory_space<vmem>>, vector<1x32x128xf32>
    %89 = vector.shape_cast %88 : vector<1x32x128xf32> to vector<32x128xf32>
    %90 = vector.shape_cast %87 : vector<32x128xf32> to vector<1x32x128xf32>
    tpu.vector_store %arg18[%c3, %c0_52, %c0_53], %90 {strides = array<i32>} : memref<8x32x128xf32, #tpu.memory_space<vmem>>, vector<1x32x128xf32>,
    %91 = vector.extract_strided_slice %51 {offsets = [0, 4], sizes = [32, 1], strides = [1, 1]} : vector<32x8xf32> to vector<32x1xf32>
    %92 = vector.broadcast %91 : vector<32x1xf32> to vector<32x128xf32>
    %93 = vector.broadcast %52 : vector<1x128xf32> to vector<32x128xf32>
    %94 = arith.mulf %92, %93 : vector<32x128xf32>
    %95 = vector.broadcast %54 : vector<1x128xf32> to vector<32x128xf32>
    %96 = arith.addf %94, %95 : vector<32x128xf32>
    %c4 = arith.constant 4 : index
    %c0_54 = arith.constant 0 : index
    %c0_55 = arith.constant 0 : index
    %97 = vector.load %arg18[%c4, %c0_54, %c0_55] : memref<8x32x128xf32, #tpu.memory_space<vmem>>, vector<1x32x128xf32>
    %98 = vector.shape_cast %97 : vector<1x32x128xf32> to vector<32x128xf32>
    %99 = vector.shape_cast %96 : vector<32x128xf32> to vector<1x32x128xf32>
    tpu.vector_store %arg18[%c4, %c0_54, %c0_55], %99 {strides = array<i32>} : memref<8x32x128xf32, #tpu.memory_space<vmem>>, vector<1x32x128xf32>,
    %100 = vector.extract_strided_slice %51 {offsets = [0, 5], sizes = [32, 1], strides = [1, 1]} : vector<32x8xf32> to vector<32x1xf32>
    %101 = vector.broadcast %100 : vector<32x1xf32> to vector<32x128xf32>
    %102 = vector.broadcast %52 : vector<1x128xf32> to vector<32x128xf32>
    %103 = arith.mulf %101, %102 : vector<32x128xf32>
    %104 = vector.broadcast %54 : vector<1x128xf32> to vector<32x128xf32>
    %105 = arith.addf %103, %104 : vector<32x128xf32>
    %c5 = arith.constant 5 : index
    %c0_56 = arith.constant 0 : index
    %c0_57 = arith.constant 0 : index
    %106 = vector.load %arg18[%c5, %c0_56, %c0_57] : memref<8x32x128xf32, #tpu.memory_space<vmem>>, vector<1x32x128xf32>
    %107 = vector.shape_cast %106 : vector<1x32x128xf32> to vector<32x128xf32>
    %108 = vector.shape_cast %105 : vector<32x128xf32> to vector<1x32x128xf32>
    tpu.vector_store %arg18[%c5, %c0_56, %c0_57], %108 {strides = array<i32>} : memref<8x32x128xf32, #tpu.memory_space<vmem>>, vector<1x32x128xf32>,
    %109 = vector.extract_strided_slice %51 {offsets = [0, 6], sizes = [32, 1], strides = [1, 1]} : vector<32x8xf32> to vector<32x1xf32>
    %110 = vector.broadcast %109 : vector<32x1xf32> to vector<32x128xf32>
    %111 = vector.broadcast %52 : vector<1x128xf32> to vector<32x128xf32>
    %112 = arith.mulf %110, %111 : vector<32x128xf32>
    %113 = vector.broadcast %54 : vector<1x128xf32> to vector<32x128xf32>
    %114 = arith.addf %112, %113 : vector<32x128xf32>
    %c6 = arith.constant 6 : index
    %c0_58 = arith.constant 0 : index
    %c0_59 = arith.constant 0 : index
    %115 = vector.load %arg18[%c6, %c0_58, %c0_59] : memref<8x32x128xf32, #tpu.memory_space<vmem>>, vector<1x32x128xf32>
    %116 = vector.shape_cast %115 : vector<1x32x128xf32> to vector<32x128xf32>
    %117 = vector.shape_cast %114 : vector<32x128xf32> to vector<1x32x128xf32>
    tpu.vector_store %arg18[%c6, %c0_58, %c0_59], %117 {strides = array<i32>} : memref<8x32x128xf32, #tpu.memory_space<vmem>>, vector<1x32x128xf32>,
    %118 = vector.extract_strided_slice %51 {offsets = [0, 7], sizes = [32, 1], strides = [1, 1]} : vector<32x8xf32> to vector<32x1xf32>
    %119 = vector.broadcast %118 : vector<32x1xf32> to vector<32x128xf32>
    %120 = vector.broadcast %52 : vector<1x128xf32> to vector<32x128xf32>
    %121 = arith.mulf %119, %120 : vector<32x128xf32>
    %122 = vector.broadcast %54 : vector<1x128xf32> to vector<32x128xf32>
    %123 = arith.addf %121, %122 : vector<32x128xf32>
    %c7 = arith.constant 7 : index
    %c0_60 = arith.constant 0 : index
    %c0_61 = arith.constant 0 : index
    %124 = vector.load %arg18[%c7, %c0_60, %c0_61] : memref<8x32x128xf32, #tpu.memory_space<vmem>>, vector<1x32x128xf32>
    %125 = vector.shape_cast %124 : vector<1x32x128xf32> to vector<32x128xf32>
    %126 = vector.shape_cast %123 : vector<32x128xf32> to vector<1x32x128xf32>
    tpu.vector_store %arg18[%c7, %c0_60, %c0_61], %126 {strides = array<i32>} : memref<8x32x128xf32, #tpu.memory_space<vmem>>, vector<1x32x128xf32>,
    %127 = tpu.iota {dimensions = array<i32: 1>} : vector<32x128xi32>
    %c64_i32 = arith.constant 64 : i32
    %128 = vector.broadcast %c64_i32 : i32 to vector<32x128xi32>
    %129 = arith.cmpi sge, %127, %128 : vector<32x128xi32>
    %c96_i32 = arith.constant 96 : i32
    %130 = vector.broadcast %c96_i32 : i32 to vector<32x128xi32>
    %131 = arith.cmpi slt, %127, %130 : vector<32x128xi32>
    %132 = arith.andi %129, %131 : vector<32x128xi1>
    %c0_62 = arith.constant 0 : index
    %c0_63 = arith.constant 0 : index
    %c0_64 = arith.constant 0 : index
    %133 = vector.load %arg12[%c0_62, %c0_63, %c0_64] : memref<2x32x128xf32, #tpu.memory_space<vmem>>, vector<1x32x128xf32>
    %134 = vector.shape_cast %133 : vector<1x32x128xf32> to vector<32x128xf32>
    %c0_65 = arith.constant 0 : index
    %c0_66 = arith.constant 0 : index
    %c0_67 = arith.constant 0 : index
    %135 = vector.load %arg8[%c0_65, %c0_66, %c0_67] : memref<2x32x32xf32, #tpu.memory_space<vmem>>, vector<1x32x32xf32>
    %136 = vector.shape_cast %135 : vector<1x32x32xf32> to vector<32x32xf32>
    %c0_68 = arith.constant 0 : index
    %c0_69 = arith.constant 0 : index
    %c0_70 = arith.constant 0 : index
    %137 = vector.load %arg9[%c0_68, %c0_69, %c0_70] : memref<2x32x32xf32, #tpu.memory_space<vmem>>, vector<1x32x32xf32>
    %138 = vector.shape_cast %137 : vector<1x32x32xf32> to vector<32x32xf32>
    %c0_i32 = arith.constant 0 : i32
    %139 = arith.index_cast %c0_i32 : i32 to index
    %c0_71 = arith.constant 0 : index
    %c0_72 = arith.constant 0 : index
    %140 = vector.load %arg18[%139, %c0_71, %c0_72] : memref<8x32x128xf32, #tpu.memory_space<vmem>>, vector<1x32x128xf32>
    %141 = vector.shape_cast %140 : vector<1x32x128xf32> to vector<32x128xf32>
    %cst_73 = arith.constant dense<0.000000e+00> : vector<32x128xf32>
    %142 = tpu.matmul %136, %134, %cst_73 {dimension_numbers = #tpu.dot_dimension_numbers<[1], [0], [0], [1], [0, 0, 1, 1], [], []>} : vector<32x32xf32>, vector<32x128xf32>, vector<32x128xf32> -> vector<32x128xf32>
    %143 = arith.addf %141, %142 : vector<32x128xf32>
    %144 = arith.negf %143 : vector<32x128xf32>
    %145 = math.exp %144 : vector<32x128xf32>
    %cst_74 = arith.constant 1.000000e+00 : f32
    %146 = vector.broadcast %cst_74 : f32 to vector<32x128xf32>
    %147 = arith.addf %146, %145 : vector<32x128xf32>
    %148 = arith.divf %146, %147 : vector<32x128xf32>
    %149 = math.tanh %143 : vector<32x128xf32>
    %150 = arith.select %132, %149, %148 : vector<32x128xi1>, vector<32x128xf32>
    %151 = vector.extract_strided_slice %150 {offsets = [0, 0], sizes = [32, 32], strides = [1, 1]} : vector<32x128xf32> to vector<32x32xf32>
    %152 = vector.extract_strided_slice %150 {offsets = [0, 32], sizes = [32, 32], strides = [1, 1]} : vector<32x128xf32> to vector<32x32xf32>
    %153 = vector.extract_strided_slice %150 {offsets = [0, 64], sizes = [32, 32], strides = [1, 1]} : vector<32x128xf32> to vector<32x32xf32>
    %154 = vector.extract_strided_slice %150 {offsets = [0, 96], sizes = [32, 32], strides = [1, 1]} : vector<32x128xf32> to vector<32x32xf32>
    %155 = arith.mulf %152, %138 : vector<32x32xf32>
    %156 = arith.mulf %151, %153 : vector<32x32xf32>
    %157 = arith.addf %155, %156 : vector<32x32xf32>
    %158 = math.tanh %157 : vector<32x32xf32>
    %159 = arith.mulf %154, %158 : vector<32x32xf32>
    %160 = arith.index_cast %c0_i32 : i32 to index
    %c0_75 = arith.constant 0 : index
    %c0_76 = arith.constant 0 : index
    %161 = vector.load %arg17[%160, %c0_75, %c0_76] : memref<8x32x32xf32, #tpu.memory_space<vmem>>, vector<1x32x32xf32>
    %162 = vector.shape_cast %161 : vector<1x32x32xf32> to vector<32x32xf32>
    %163 = vector.shape_cast %159 : vector<32x32xf32> to vector<1x32x32xf32>
    tpu.vector_store %arg17[%160, %c0_75, %c0_76], %163 {strides = array<i32>} : memref<8x32x32xf32, #tpu.memory_space<vmem>>, vector<1x32x32xf32>,
    %c1_i32 = arith.constant 1 : i32
    %164 = arith.index_cast %c1_i32 : i32 to index
    %c0_77 = arith.constant 0 : index
    %c0_78 = arith.constant 0 : index
    %165 = vector.load %arg18[%164, %c0_77, %c0_78] : memref<8x32x128xf32, #tpu.memory_space<vmem>>, vector<1x32x128xf32>
    %166 = vector.shape_cast %165 : vector<1x32x128xf32> to vector<32x128xf32>
    %cst_79 = arith.constant dense<0.000000e+00> : vector<32x128xf32>
    %167 = tpu.matmul %159, %134, %cst_79 {dimension_numbers = #tpu.dot_dimension_numbers<[1], [0], [0], [1], [0, 0, 1, 1], [], []>} : vector<32x32xf32>, vector<32x128xf32>, vector<32x128xf32> -> vector<32x128xf32>
    %168 = arith.addf %166, %167 : vector<32x128xf32>
    %169 = arith.negf %168 : vector<32x128xf32>
    %170 = math.exp %169 : vector<32x128xf32>
    %cst_80 = arith.constant 1.000000e+00 : f32
    %171 = vector.broadcast %cst_80 : f32 to vector<32x128xf32>
    %172 = arith.addf %171, %170 : vector<32x128xf32>
    %173 = arith.divf %171, %172 : vector<32x128xf32>
    %174 = math.tanh %168 : vector<32x128xf32>
    %175 = arith.select %132, %174, %173 : vector<32x128xi1>, vector<32x128xf32>
    %176 = vector.extract_strided_slice %175 {offsets = [0, 0], sizes = [32, 32], strides = [1, 1]} : vector<32x128xf32> to vector<32x32xf32>
    %177 = vector.extract_strided_slice %175 {offsets = [0, 32], sizes = [32, 32], strides = [1, 1]} : vector<32x128xf32> to vector<32x32xf32>
    %178 = vector.extract_strided_slice %175 {offsets = [0, 64], sizes = [32, 32], strides = [1, 1]} : vector<32x128xf32> to vector<32x32xf32>
    %179 = vector.extract_strided_slice %175 {offsets = [0, 96], sizes = [32, 32], strides = [1, 1]} : vector<32x128xf32> to vector<32x32xf32>
    %180 = arith.mulf %177, %157 : vector<32x32xf32>
    %181 = arith.mulf %176, %178 : vector<32x32xf32>
    %182 = arith.addf %180, %181 : vector<32x32xf32>
    %183 = math.tanh %182 : vector<32x32xf32>
    %184 = arith.mulf %179, %183 : vector<32x32xf32>
    %185 = arith.index_cast %c1_i32 : i32 to index
    %c0_81 = arith.constant 0 : index
    %c0_82 = arith.constant 0 : index
    %186 = vector.load %arg17[%185, %c0_81, %c0_82] : memref<8x32x32xf32, #tpu.memory_space<vmem>>, vector<1x32x32xf32>
    %187 = vector.shape_cast %186 : vector<1x32x32xf32> to vector<32x32xf32>
    %188 = vector.shape_cast %184 : vector<32x32xf32> to vector<1x32x32xf32>
    tpu.vector_store %arg17[%185, %c0_81, %c0_82], %188 {strides = array<i32>} : memref<8x32x32xf32, #tpu.memory_space<vmem>>, vector<1x32x32xf32>,
    %c2_i32 = arith.constant 2 : i32
    %189 = arith.index_cast %c2_i32 : i32 to index
    %c0_83 = arith.constant 0 : index
    %c0_84 = arith.constant 0 : index
    %190 = vector.load %arg18[%189, %c0_83, %c0_84] : memref<8x32x128xf32, #tpu.memory_space<vmem>>, vector<1x32x128xf32>
    %191 = vector.shape_cast %190 : vector<1x32x128xf32> to vector<32x128xf32>
    %cst_85 = arith.constant dense<0.000000e+00> : vector<32x128xf32>
    %192 = tpu.matmul %184, %134, %cst_85 {dimension_numbers = #tpu.dot_dimension_numbers<[1], [0], [0], [1], [0, 0, 1, 1], [], []>} : vector<32x32xf32>, vector<32x128xf32>, vector<32x128xf32> -> vector<32x128xf32>
    %193 = arith.addf %191, %192 : vector<32x128xf32>
    %194 = arith.negf %193 : vector<32x128xf32>
    %195 = math.exp %194 : vector<32x128xf32>
    %cst_86 = arith.constant 1.000000e+00 : f32
    %196 = vector.broadcast %cst_86 : f32 to vector<32x128xf32>
    %197 = arith.addf %196, %195 : vector<32x128xf32>
    %198 = arith.divf %196, %197 : vector<32x128xf32>
    %199 = math.tanh %193 : vector<32x128xf32>
    %200 = arith.select %132, %199, %198 : vector<32x128xi1>, vector<32x128xf32>
    %201 = vector.extract_strided_slice %200 {offsets = [0, 0], sizes = [32, 32], strides = [1, 1]} : vector<32x128xf32> to vector<32x32xf32>
    %202 = vector.extract_strided_slice %200 {offsets = [0, 32], sizes = [32, 32], strides = [1, 1]} : vector<32x128xf32> to vector<32x32xf32>
    %203 = vector.extract_strided_slice %200 {offsets = [0, 64], sizes = [32, 32], strides = [1, 1]} : vector<32x128xf32> to vector<32x32xf32>
    %204 = vector.extract_strided_slice %200 {offsets = [0, 96], sizes = [32, 32], strides = [1, 1]} : vector<32x128xf32> to vector<32x32xf32>
    %205 = arith.mulf %202, %182 : vector<32x32xf32>
    %206 = arith.mulf %201, %203 : vector<32x32xf32>
    %207 = arith.addf %205, %206 : vector<32x32xf32>
    %208 = math.tanh %207 : vector<32x32xf32>
    %209 = arith.mulf %204, %208 : vector<32x32xf32>
    %210 = arith.index_cast %c2_i32 : i32 to index
    %c0_87 = arith.constant 0 : index
    %c0_88 = arith.constant 0 : index
    %211 = vector.load %arg17[%210, %c0_87, %c0_88] : memref<8x32x32xf32, #tpu.memory_space<vmem>>, vector<1x32x32xf32>
    %212 = vector.shape_cast %211 : vector<1x32x32xf32> to vector<32x32xf32>
    %213 = vector.shape_cast %209 : vector<32x32xf32> to vector<1x32x32xf32>
    tpu.vector_store %arg17[%210, %c0_87, %c0_88], %213 {strides = array<i32>} : memref<8x32x32xf32, #tpu.memory_space<vmem>>, vector<1x32x32xf32>,
    %c3_i32 = arith.constant 3 : i32
    %214 = arith.index_cast %c3_i32 : i32 to index
    %c0_89 = arith.constant 0 : index
    %c0_90 = arith.constant 0 : index
    %215 = vector.load %arg18[%214, %c0_89, %c0_90] : memref<8x32x128xf32, #tpu.memory_space<vmem>>, vector<1x32x128xf32>
    %216 = vector.shape_cast %215 : vector<1x32x128xf32> to vector<32x128xf32>
    %cst_91 = arith.constant dense<0.000000e+00> : vector<32x128xf32>
    %217 = tpu.matmul %209, %134, %cst_91 {dimension_numbers = #tpu.dot_dimension_numbers<[1], [0], [0], [1], [0, 0, 1, 1], [], []>} : vector<32x32xf32>, vector<32x128xf32>, vector<32x128xf32> -> vector<32x128xf32>
    %218 = arith.addf %216, %217 : vector<32x128xf32>
    %219 = arith.negf %218 : vector<32x128xf32>
    %220 = math.exp %219 : vector<32x128xf32>
    %cst_92 = arith.constant 1.000000e+00 : f32
    %221 = vector.broadcast %cst_92 : f32 to vector<32x128xf32>
    %222 = arith.addf %221, %220 : vector<32x128xf32>
    %223 = arith.divf %221, %222 : vector<32x128xf32>
    %224 = math.tanh %218 : vector<32x128xf32>
    %225 = arith.select %132, %224, %223 : vector<32x128xi1>, vector<32x128xf32>
    %226 = vector.extract_strided_slice %225 {offsets = [0, 0], sizes = [32, 32], strides = [1, 1]} : vector<32x128xf32> to vector<32x32xf32>
    %227 = vector.extract_strided_slice %225 {offsets = [0, 32], sizes = [32, 32], strides = [1, 1]} : vector<32x128xf32> to vector<32x32xf32>
    %228 = vector.extract_strided_slice %225 {offsets = [0, 64], sizes = [32, 32], strides = [1, 1]} : vector<32x128xf32> to vector<32x32xf32>
    %229 = vector.extract_strided_slice %225 {offsets = [0, 96], sizes = [32, 32], strides = [1, 1]} : vector<32x128xf32> to vector<32x32xf32>
    %230 = arith.mulf %227, %207 : vector<32x32xf32>
    %231 = arith.mulf %226, %228 : vector<32x32xf32>
    %232 = arith.addf %230, %231 : vector<32x32xf32>
    %233 = math.tanh %232 : vector<32x32xf32>
    %234 = arith.mulf %229, %233 : vector<32x32xf32>
    %235 = arith.index_cast %c3_i32 : i32 to index
    %c0_93 = arith.constant 0 : index
    %c0_94 = arith.constant 0 : index
    %236 = vector.load %arg17[%235, %c0_93, %c0_94] : memref<8x32x32xf32, #tpu.memory_space<vmem>>, vector<1x32x32xf32>
    %237 = vector.shape_cast %236 : vector<1x32x32xf32> to vector<32x32xf32>
    %238 = vector.shape_cast %234 : vector<32x32xf32> to vector<1x32x32xf32>
    tpu.vector_store %arg17[%235, %c0_93, %c0_94], %238 {strides = array<i32>} : memref<8x32x32xf32, #tpu.memory_space<vmem>>, vector<1x32x32xf32>,
    %c4_i32 = arith.constant 4 : i32
    %239 = arith.index_cast %c4_i32 : i32 to index
    %c0_95 = arith.constant 0 : index
    %c0_96 = arith.constant 0 : index
    %240 = vector.load %arg18[%239, %c0_95, %c0_96] : memref<8x32x128xf32, #tpu.memory_space<vmem>>, vector<1x32x128xf32>
    %241 = vector.shape_cast %240 : vector<1x32x128xf32> to vector<32x128xf32>
    %cst_97 = arith.constant dense<0.000000e+00> : vector<32x128xf32>
    %242 = tpu.matmul %234, %134, %cst_97 {dimension_numbers = #tpu.dot_dimension_numbers<[1], [0], [0], [1], [0, 0, 1, 1], [], []>} : vector<32x32xf32>, vector<32x128xf32>, vector<32x128xf32> -> vector<32x128xf32>
    %243 = arith.addf %241, %242 : vector<32x128xf32>
    %244 = arith.negf %243 : vector<32x128xf32>
    %245 = math.exp %244 : vector<32x128xf32>
    %cst_98 = arith.constant 1.000000e+00 : f32
    %246 = vector.broadcast %cst_98 : f32 to vector<32x128xf32>
    %247 = arith.addf %246, %245 : vector<32x128xf32>
    %248 = arith.divf %246, %247 : vector<32x128xf32>
    %249 = math.tanh %243 : vector<32x128xf32>
    %250 = arith.select %132, %249, %248 : vector<32x128xi1>, vector<32x128xf32>
    %251 = vector.extract_strided_slice %250 {offsets = [0, 0], sizes = [32, 32], strides = [1, 1]} : vector<32x128xf32> to vector<32x32xf32>
    %252 = vector.extract_strided_slice %250 {offsets = [0, 32], sizes = [32, 32], strides = [1, 1]} : vector<32x128xf32> to vector<32x32xf32>
    %253 = vector.extract_strided_slice %250 {offsets = [0, 64], sizes = [32, 32], strides = [1, 1]} : vector<32x128xf32> to vector<32x32xf32>
    %254 = vector.extract_strided_slice %250 {offsets = [0, 96], sizes = [32, 32], strides = [1, 1]} : vector<32x128xf32> to vector<32x32xf32>
    %255 = arith.mulf %252, %232 : vector<32x32xf32>
    %256 = arith.mulf %251, %253 : vector<32x32xf32>
    %257 = arith.addf %255, %256 : vector<32x32xf32>
    %258 = math.tanh %257 : vector<32x32xf32>
    %259 = arith.mulf %254, %258 : vector<32x32xf32>
    %260 = arith.index_cast %c4_i32 : i32 to index
    %c0_99 = arith.constant 0 : index
    %c0_100 = arith.constant 0 : index
    %261 = vector.load %arg17[%260, %c0_99, %c0_100] : memref<8x32x32xf32, #tpu.memory_space<vmem>>, vector<1x32x32xf32>
    %262 = vector.shape_cast %261 : vector<1x32x32xf32> to vector<32x32xf32>
    %263 = vector.shape_cast %259 : vector<32x32xf32> to vector<1x32x32xf32>
    tpu.vector_store %arg17[%260, %c0_99, %c0_100], %263 {strides = array<i32>} : memref<8x32x32xf32, #tpu.memory_space<vmem>>, vector<1x32x32xf32>,
    %c5_i32 = arith.constant 5 : i32
    %264 = arith.index_cast %c5_i32 : i32 to index
    %c0_101 = arith.constant 0 : index
    %c0_102 = arith.constant 0 : index
    %265 = vector.load %arg18[%264, %c0_101, %c0_102] : memref<8x32x128xf32, #tpu.memory_space<vmem>>, vector<1x32x128xf32>
    %266 = vector.shape_cast %265 : vector<1x32x128xf32> to vector<32x128xf32>
    %cst_103 = arith.constant dense<0.000000e+00> : vector<32x128xf32>
    %267 = tpu.matmul %259, %134, %cst_103 {dimension_numbers = #tpu.dot_dimension_numbers<[1], [0], [0], [1], [0, 0, 1, 1], [], []>} : vector<32x32xf32>, vector<32x128xf32>, vector<32x128xf32> -> vector<32x128xf32>
    %268 = arith.addf %266, %267 : vector<32x128xf32>
    %269 = arith.negf %268 : vector<32x128xf32>
    %270 = math.exp %269 : vector<32x128xf32>
    %cst_104 = arith.constant 1.000000e+00 : f32
    %271 = vector.broadcast %cst_104 : f32 to vector<32x128xf32>
    %272 = arith.addf %271, %270 : vector<32x128xf32>
    %273 = arith.divf %271, %272 : vector<32x128xf32>
    %274 = math.tanh %268 : vector<32x128xf32>
    %275 = arith.select %132, %274, %273 : vector<32x128xi1>, vector<32x128xf32>
    %276 = vector.extract_strided_slice %275 {offsets = [0, 0], sizes = [32, 32], strides = [1, 1]} : vector<32x128xf32> to vector<32x32xf32>
    %277 = vector.extract_strided_slice %275 {offsets = [0, 32], sizes = [32, 32], strides = [1, 1]} : vector<32x128xf32> to vector<32x32xf32>
    %278 = vector.extract_strided_slice %275 {offsets = [0, 64], sizes = [32, 32], strides = [1, 1]} : vector<32x128xf32> to vector<32x32xf32>
    %279 = vector.extract_strided_slice %275 {offsets = [0, 96], sizes = [32, 32], strides = [1, 1]} : vector<32x128xf32> to vector<32x32xf32>
    %280 = arith.mulf %277, %257 : vector<32x32xf32>
    %281 = arith.mulf %276, %278 : vector<32x32xf32>
    %282 = arith.addf %280, %281 : vector<32x32xf32>
    %283 = math.tanh %282 : vector<32x32xf32>
    %284 = arith.mulf %279, %283 : vector<32x32xf32>
    %285 = arith.index_cast %c5_i32 : i32 to index
    %c0_105 = arith.constant 0 : index
    %c0_106 = arith.constant 0 : index
    %286 = vector.load %arg17[%285, %c0_105, %c0_106] : memref<8x32x32xf32, #tpu.memory_space<vmem>>, vector<1x32x32xf32>
    %287 = vector.shape_cast %286 : vector<1x32x32xf32> to vector<32x32xf32>
    %288 = vector.shape_cast %284 : vector<32x32xf32> to vector<1x32x32xf32>
    tpu.vector_store %arg17[%285, %c0_105, %c0_106], %288 {strides = array<i32>} : memref<8x32x32xf32, #tpu.memory_space<vmem>>, vector<1x32x32xf32>,
    %c6_i32 = arith.constant 6 : i32
    %289 = arith.index_cast %c6_i32 : i32 to index
    %c0_107 = arith.constant 0 : index
    %c0_108 = arith.constant 0 : index
    %290 = vector.load %arg18[%289, %c0_107, %c0_108] : memref<8x32x128xf32, #tpu.memory_space<vmem>>, vector<1x32x128xf32>
    %291 = vector.shape_cast %290 : vector<1x32x128xf32> to vector<32x128xf32>
    %cst_109 = arith.constant dense<0.000000e+00> : vector<32x128xf32>
    %292 = tpu.matmul %284, %134, %cst_109 {dimension_numbers = #tpu.dot_dimension_numbers<[1], [0], [0], [1], [0, 0, 1, 1], [], []>} : vector<32x32xf32>, vector<32x128xf32>, vector<32x128xf32> -> vector<32x128xf32>
    %293 = arith.addf %291, %292 : vector<32x128xf32>
    %294 = arith.negf %293 : vector<32x128xf32>
    %295 = math.exp %294 : vector<32x128xf32>
    %cst_110 = arith.constant 1.000000e+00 : f32
    %296 = vector.broadcast %cst_110 : f32 to vector<32x128xf32>
    %297 = arith.addf %296, %295 : vector<32x128xf32>
    %298 = arith.divf %296, %297 : vector<32x128xf32>
    %299 = math.tanh %293 : vector<32x128xf32>
    %300 = arith.select %132, %299, %298 : vector<32x128xi1>, vector<32x128xf32>
    %301 = vector.extract_strided_slice %300 {offsets = [0, 0], sizes = [32, 32], strides = [1, 1]} : vector<32x128xf32> to vector<32x32xf32>
    %302 = vector.extract_strided_slice %300 {offsets = [0, 32], sizes = [32, 32], strides = [1, 1]} : vector<32x128xf32> to vector<32x32xf32>
    %303 = vector.extract_strided_slice %300 {offsets = [0, 64], sizes = [32, 32], strides = [1, 1]} : vector<32x128xf32> to vector<32x32xf32>
    %304 = vector.extract_strided_slice %300 {offsets = [0, 96], sizes = [32, 32], strides = [1, 1]} : vector<32x128xf32> to vector<32x32xf32>
    %305 = arith.mulf %302, %282 : vector<32x32xf32>
    %306 = arith.mulf %301, %303 : vector<32x32xf32>
    %307 = arith.addf %305, %306 : vector<32x32xf32>
    %308 = math.tanh %307 : vector<32x32xf32>
    %309 = arith.mulf %304, %308 : vector<32x32xf32>
    %310 = arith.index_cast %c6_i32 : i32 to index
    %c0_111 = arith.constant 0 : index
    %c0_112 = arith.constant 0 : index
    %311 = vector.load %arg17[%310, %c0_111, %c0_112] : memref<8x32x32xf32, #tpu.memory_space<vmem>>, vector<1x32x32xf32>
    %312 = vector.shape_cast %311 : vector<1x32x32xf32> to vector<32x32xf32>
    %313 = vector.shape_cast %309 : vector<32x32xf32> to vector<1x32x32xf32>
    tpu.vector_store %arg17[%310, %c0_111, %c0_112], %313 {strides = array<i32>} : memref<8x32x32xf32, #tpu.memory_space<vmem>>, vector<1x32x32xf32>,
    %c7_i32 = arith.constant 7 : i32
    %314 = arith.index_cast %c7_i32 : i32 to index
    %c0_113 = arith.constant 0 : index
    %c0_114 = arith.constant 0 : index
    %315 = vector.load %arg18[%314, %c0_113, %c0_114] : memref<8x32x128xf32, #tpu.memory_space<vmem>>, vector<1x32x128xf32>
    %316 = vector.shape_cast %315 : vector<1x32x128xf32> to vector<32x128xf32>
    %cst_115 = arith.constant dense<0.000000e+00> : vector<32x128xf32>
    %317 = tpu.matmul %309, %134, %cst_115 {dimension_numbers = #tpu.dot_dimension_numbers<[1], [0], [0], [1], [0, 0, 1, 1], [], []>} : vector<32x32xf32>, vector<32x128xf32>, vector<32x128xf32> -> vector<32x128xf32>
    %318 = arith.addf %316, %317 : vector<32x128xf32>
    %319 = arith.negf %318 : vector<32x128xf32>
    %320 = math.exp %319 : vector<32x128xf32>
    %cst_116 = arith.constant 1.000000e+00 : f32
    %321 = vector.broadcast %cst_116 : f32 to vector<32x128xf32>
    %322 = arith.addf %321, %320 : vector<32x128xf32>
    %323 = arith.divf %321, %322 : vector<32x128xf32>
    %324 = math.tanh %318 : vector<32x128xf32>
    %325 = arith.select %132, %324, %323 : vector<32x128xi1>, vector<32x128xf32>
    %326 = vector.extract_strided_slice %325 {offsets = [0, 0], sizes = [32, 32], strides = [1, 1]} : vector<32x128xf32> to vector<32x32xf32>
    %327 = vector.extract_strided_slice %325 {offsets = [0, 32], sizes = [32, 32], strides = [1, 1]} : vector<32x128xf32> to vector<32x32xf32>
    %328 = vector.extract_strided_slice %325 {offsets = [0, 64], sizes = [32, 32], strides = [1, 1]} : vector<32x128xf32> to vector<32x32xf32>
    %329 = vector.extract_strided_slice %325 {offsets = [0, 96], sizes = [32, 32], strides = [1, 1]} : vector<32x128xf32> to vector<32x32xf32>
    %330 = arith.mulf %327, %307 : vector<32x32xf32>
    %331 = arith.mulf %326, %328 : vector<32x32xf32>
    %332 = arith.addf %330, %331 : vector<32x32xf32>
    %333 = math.tanh %332 : vector<32x32xf32>
    %334 = arith.mulf %329, %333 : vector<32x32xf32>
    %335 = arith.index_cast %c7_i32 : i32 to index
    %c0_117 = arith.constant 0 : index
    %c0_118 = arith.constant 0 : index
    %336 = vector.load %arg17[%335, %c0_117, %c0_118] : memref<8x32x32xf32, #tpu.memory_space<vmem>>, vector<1x32x32xf32>
    %337 = vector.shape_cast %336 : vector<1x32x32xf32> to vector<32x32xf32>
    %338 = vector.shape_cast %334 : vector<32x32xf32> to vector<1x32x32xf32>
    tpu.vector_store %arg17[%335, %c0_117, %c0_118], %338 {strides = array<i32>} : memref<8x32x32xf32, #tpu.memory_space<vmem>>, vector<1x32x32xf32>,
    %c8_i32 = arith.constant 8 : i32
    %c0_119 = arith.constant 0 : index
    %c0_120 = arith.constant 0 : index
    %c0_121 = arith.constant 0 : index
    %339 = vector.load %arg15[%c0_119, %c0_120, %c0_121] : memref<2x32x32xf32, #tpu.memory_space<vmem>>, vector<1x32x32xf32>
    %340 = vector.shape_cast %339 : vector<1x32x32xf32> to vector<32x32xf32>
    %341 = vector.shape_cast %334 : vector<32x32xf32> to vector<1x32x32xf32>
    tpu.vector_store %arg15[%c0_119, %c0_120, %c0_121], %341 {strides = array<i32>} : memref<2x32x32xf32, #tpu.memory_space<vmem>>, vector<1x32x32xf32>,
    %c0_122 = arith.constant 0 : index
    %c0_123 = arith.constant 0 : index
    %c0_124 = arith.constant 0 : index
    %342 = vector.load %arg16[%c0_122, %c0_123, %c0_124] : memref<2x32x32xf32, #tpu.memory_space<vmem>>, vector<1x32x32xf32>
    %343 = vector.shape_cast %342 : vector<1x32x32xf32> to vector<32x32xf32>
    %344 = vector.shape_cast %332 : vector<32x32xf32> to vector<1x32x32xf32>
    tpu.vector_store %arg16[%c0_122, %c0_123, %c0_124], %344 {strides = array<i32>} : memref<2x32x32xf32, #tpu.memory_space<vmem>>, vector<1x32x32xf32>,
    %c0_125 = arith.constant 0 : index
    %c0_126 = arith.constant 0 : index
    %c0_127 = arith.constant 0 : index
    %345 = vector.load %arg17[%c0_125, %c0_126, %c0_127] : memref<8x32x32xf32, #tpu.memory_space<vmem>>, vector<8x32x32xf32>
    %346 = vector.shape_cast %345 : vector<8x32x32xf32> to vector<256x32xf32>
    %c1_128 = arith.constant 1 : index
    %c0_129 = arith.constant 0 : index
    %c0_130 = arith.constant 0 : index
    %347 = vector.load %arg11[%c1_128, %c0_129, %c0_130] : memref<2x32x128xf32, #tpu.memory_space<vmem>>, vector<1x32x128xf32>
    %348 = vector.shape_cast %347 : vector<1x32x128xf32> to vector<32x128xf32>
    %cst_131 = arith.constant dense<0.000000e+00> : vector<256x128xf32>
    %349 = tpu.matmul %346, %348, %cst_131 {dimension_numbers = #tpu.dot_dimension_numbers<[1], [0], [0], [1], [0, 0, 1, 1], [], []>} : vector<256x32xf32>, vector<32x128xf32>, vector<256x128xf32> -> vector<256x128xf32>
    %c1_132 = arith.constant 1 : index
    %c0_133 = arith.constant 0 : index
    %c0_134 = arith.constant 0 : index
    %350 = vector.load %arg13[%c1_132, %c0_133, %c0_134] : memref<2x1x128xf32, #tpu.memory_space<vmem>>, vector<1x1x128xf32>
    %351 = vector.shape_cast %350 : vector<1x1x128xf32> to vector<1x128xf32>
    %352 = vector.broadcast %351 : vector<1x128xf32> to vector<256x128xf32>
    %353 = arith.addf %349, %352 : vector<256x128xf32>
    %354 = vector.shape_cast %353 : vector<256x128xf32> to vector<8x32x128xf32>
    %c0_135 = arith.constant 0 : index
    %c0_136 = arith.constant 0 : index
    %c0_137 = arith.constant 0 : index
    %355 = vector.load %arg18[%c0_135, %c0_136, %c0_137] : memref<8x32x128xf32, #tpu.memory_space<vmem>>, vector<8x32x128xf32>
    tpu.vector_store %arg18[%c0_135, %c0_136, %c0_137], %354 {strides = array<i32>} : memref<8x32x128xf32, #tpu.memory_space<vmem>>, vector<8x32x128xf32>,
    %c1_138 = arith.constant 1 : index
    %c0_139 = arith.constant 0 : index
    %c0_140 = arith.constant 0 : index
    %356 = vector.load %arg12[%c1_138, %c0_139, %c0_140] : memref<2x32x128xf32, #tpu.memory_space<vmem>>, vector<1x32x128xf32>
    %357 = vector.shape_cast %356 : vector<1x32x128xf32> to vector<32x128xf32>
    %c1_141 = arith.constant 1 : index
    %c0_142 = arith.constant 0 : index
    %c0_143 = arith.constant 0 : index
    %358 = vector.load %arg8[%c1_141, %c0_142, %c0_143] : memref<2x32x32xf32, #tpu.memory_space<vmem>>, vector<1x32x32xf32>
    %359 = vector.shape_cast %358 : vector<1x32x32xf32> to vector<32x32xf32>
    %c1_144 = arith.constant 1 : index
    %c0_145 = arith.constant 0 : index
    %c0_146 = arith.constant 0 : index
    %360 = vector.load %arg9[%c1_144, %c0_145, %c0_146] : memref<2x32x32xf32, #tpu.memory_space<vmem>>, vector<1x32x32xf32>
    %361 = vector.shape_cast %360 : vector<1x32x32xf32> to vector<32x32xf32>
    %c0_i32_147 = arith.constant 0 : i32
    %362 = arith.index_cast %c0_i32_147 : i32 to index
    %c0_148 = arith.constant 0 : index
    %c0_149 = arith.constant 0 : index
    %363 = vector.load %arg18[%362, %c0_148, %c0_149] : memref<8x32x128xf32, #tpu.memory_space<vmem>>, vector<1x32x128xf32>
    %364 = vector.shape_cast %363 : vector<1x32x128xf32> to vector<32x128xf32>
    %cst_150 = arith.constant dense<0.000000e+00> : vector<32x128xf32>
    %365 = tpu.matmul %359, %357, %cst_150 {dimension_numbers = #tpu.dot_dimension_numbers<[1], [0], [0], [1], [0, 0, 1, 1], [], []>} : vector<32x32xf32>, vector<32x128xf32>, vector<32x128xf32> -> vector<32x128xf32>
    %366 = arith.addf %364, %365 : vector<32x128xf32>
    %367 = arith.negf %366 : vector<32x128xf32>
    %368 = math.exp %367 : vector<32x128xf32>
    %cst_151 = arith.constant 1.000000e+00 : f32
    %369 = vector.broadcast %cst_151 : f32 to vector<32x128xf32>
    %370 = arith.addf %369, %368 : vector<32x128xf32>
    %371 = arith.divf %369, %370 : vector<32x128xf32>
    %372 = math.tanh %366 : vector<32x128xf32>
    %373 = arith.select %132, %372, %371 : vector<32x128xi1>, vector<32x128xf32>
    %374 = vector.extract_strided_slice %373 {offsets = [0, 0], sizes = [32, 32], strides = [1, 1]} : vector<32x128xf32> to vector<32x32xf32>
    %375 = vector.extract_strided_slice %373 {offsets = [0, 32], sizes = [32, 32], strides = [1, 1]} : vector<32x128xf32> to vector<32x32xf32>
    %376 = vector.extract_strided_slice %373 {offsets = [0, 64], sizes = [32, 32], strides = [1, 1]} : vector<32x128xf32> to vector<32x32xf32>
    %377 = vector.extract_strided_slice %373 {offsets = [0, 96], sizes = [32, 32], strides = [1, 1]} : vector<32x128xf32> to vector<32x32xf32>
    %378 = arith.mulf %375, %361 : vector<32x32xf32>
    %379 = arith.mulf %374, %376 : vector<32x32xf32>
    %380 = arith.addf %378, %379 : vector<32x32xf32>
    %381 = math.tanh %380 : vector<32x32xf32>
    %382 = arith.mulf %377, %381 : vector<32x32xf32>
    %c1_i32_152 = arith.constant 1 : i32
    %383 = arith.index_cast %c1_i32_152 : i32 to index
    %c0_153 = arith.constant 0 : index
    %c0_154 = arith.constant 0 : index
    %384 = vector.load %arg18[%383, %c0_153, %c0_154] : memref<8x32x128xf32, #tpu.memory_space<vmem>>, vector<1x32x128xf32>
    %385 = vector.shape_cast %384 : vector<1x32x128xf32> to vector<32x128xf32>
    %cst_155 = arith.constant dense<0.000000e+00> : vector<32x128xf32>
    %386 = tpu.matmul %382, %357, %cst_155 {dimension_numbers = #tpu.dot_dimension_numbers<[1], [0], [0], [1], [0, 0, 1, 1], [], []>} : vector<32x32xf32>, vector<32x128xf32>, vector<32x128xf32> -> vector<32x128xf32>
    %387 = arith.addf %385, %386 : vector<32x128xf32>
    %388 = arith.negf %387 : vector<32x128xf32>
    %389 = math.exp %388 : vector<32x128xf32>
    %cst_156 = arith.constant 1.000000e+00 : f32
    %390 = vector.broadcast %cst_156 : f32 to vector<32x128xf32>
    %391 = arith.addf %390, %389 : vector<32x128xf32>
    %392 = arith.divf %390, %391 : vector<32x128xf32>
    %393 = math.tanh %387 : vector<32x128xf32>
    %394 = arith.select %132, %393, %392 : vector<32x128xi1>, vector<32x128xf32>
    %395 = vector.extract_strided_slice %394 {offsets = [0, 0], sizes = [32, 32], strides = [1, 1]} : vector<32x128xf32> to vector<32x32xf32>
    %396 = vector.extract_strided_slice %394 {offsets = [0, 32], sizes = [32, 32], strides = [1, 1]} : vector<32x128xf32> to vector<32x32xf32>
    %397 = vector.extract_strided_slice %394 {offsets = [0, 64], sizes = [32, 32], strides = [1, 1]} : vector<32x128xf32> to vector<32x32xf32>
    %398 = vector.extract_strided_slice %394 {offsets = [0, 96], sizes = [32, 32], strides = [1, 1]} : vector<32x128xf32> to vector<32x32xf32>
    %399 = arith.mulf %396, %380 : vector<32x32xf32>
    %400 = arith.mulf %395, %397 : vector<32x32xf32>
    %401 = arith.addf %399, %400 : vector<32x32xf32>
    %402 = math.tanh %401 : vector<32x32xf32>
    %403 = arith.mulf %398, %402 : vector<32x32xf32>
    %c2_i32_157 = arith.constant 2 : i32
    %404 = arith.index_cast %c2_i32_157 : i32 to index
    %c0_158 = arith.constant 0 : index
    %c0_159 = arith.constant 0 : index
    %405 = vector.load %arg18[%404, %c0_158, %c0_159] : memref<8x32x128xf32, #tpu.memory_space<vmem>>, vector<1x32x128xf32>
    %406 = vector.shape_cast %405 : vector<1x32x128xf32> to vector<32x128xf32>
    %cst_160 = arith.constant dense<0.000000e+00> : vector<32x128xf32>
    %407 = tpu.matmul %403, %357, %cst_160 {dimension_numbers = #tpu.dot_dimension_numbers<[1], [0], [0], [1], [0, 0, 1, 1], [], []>} : vector<32x32xf32>, vector<32x128xf32>, vector<32x128xf32> -> vector<32x128xf32>
    %408 = arith.addf %406, %407 : vector<32x128xf32>
    %409 = arith.negf %408 : vector<32x128xf32>
    %410 = math.exp %409 : vector<32x128xf32>
    %cst_161 = arith.constant 1.000000e+00 : f32
    %411 = vector.broadcast %cst_161 : f32 to vector<32x128xf32>
    %412 = arith.addf %411, %410 : vector<32x128xf32>
    %413 = arith.divf %411, %412 : vector<32x128xf32>
    %414 = math.tanh %408 : vector<32x128xf32>
    %415 = arith.select %132, %414, %413 : vector<32x128xi1>, vector<32x128xf32>
    %416 = vector.extract_strided_slice %415 {offsets = [0, 0], sizes = [32, 32], strides = [1, 1]} : vector<32x128xf32> to vector<32x32xf32>
    %417 = vector.extract_strided_slice %415 {offsets = [0, 32], sizes = [32, 32], strides = [1, 1]} : vector<32x128xf32> to vector<32x32xf32>
    %418 = vector.extract_strided_slice %415 {offsets = [0, 64], sizes = [32, 32], strides = [1, 1]} : vector<32x128xf32> to vector<32x32xf32>
    %419 = vector.extract_strided_slice %415 {offsets = [0, 96], sizes = [32, 32], strides = [1, 1]} : vector<32x128xf32> to vector<32x32xf32>
    %420 = arith.mulf %417, %401 : vector<32x32xf32>
    %421 = arith.mulf %416, %418 : vector<32x32xf32>
    %422 = arith.addf %420, %421 : vector<32x32xf32>
    %423 = math.tanh %422 : vector<32x32xf32>
    %424 = arith.mulf %419, %423 : vector<32x32xf32>
    %c3_i32_162 = arith.constant 3 : i32
    %425 = arith.index_cast %c3_i32_162 : i32 to index
    %c0_163 = arith.constant 0 : index
    %c0_164 = arith.constant 0 : index
    %426 = vector.load %arg18[%425, %c0_163, %c0_164] : memref<8x32x128xf32, #tpu.memory_space<vmem>>, vector<1x32x128xf32>
    %427 = vector.shape_cast %426 : vector<1x32x128xf32> to vector<32x128xf32>
    %cst_165 = arith.constant dense<0.000000e+00> : vector<32x128xf32>
    %428 = tpu.matmul %424, %357, %cst_165 {dimension_numbers = #tpu.dot_dimension_numbers<[1], [0], [0], [1], [0, 0, 1, 1], [], []>} : vector<32x32xf32>, vector<32x128xf32>, vector<32x128xf32> -> vector<32x128xf32>
    %429 = arith.addf %427, %428 : vector<32x128xf32>
    %430 = arith.negf %429 : vector<32x128xf32>
    %431 = math.exp %430 : vector<32x128xf32>
    %cst_166 = arith.constant 1.000000e+00 : f32
    %432 = vector.broadcast %cst_166 : f32 to vector<32x128xf32>
    %433 = arith.addf %432, %431 : vector<32x128xf32>
    %434 = arith.divf %432, %433 : vector<32x128xf32>
    %435 = math.tanh %429 : vector<32x128xf32>
    %436 = arith.select %132, %435, %434 : vector<32x128xi1>, vector<32x128xf32>
    %437 = vector.extract_strided_slice %436 {offsets = [0, 0], sizes = [32, 32], strides = [1, 1]} : vector<32x128xf32> to vector<32x32xf32>
    %438 = vector.extract_strided_slice %436 {offsets = [0, 32], sizes = [32, 32], strides = [1, 1]} : vector<32x128xf32> to vector<32x32xf32>
    %439 = vector.extract_strided_slice %436 {offsets = [0, 64], sizes = [32, 32], strides = [1, 1]} : vector<32x128xf32> to vector<32x32xf32>
    %440 = vector.extract_strided_slice %436 {offsets = [0, 96], sizes = [32, 32], strides = [1, 1]} : vector<32x128xf32> to vector<32x32xf32>
    %441 = arith.mulf %438, %422 : vector<32x32xf32>
    %442 = arith.mulf %437, %439 : vector<32x32xf32>
    %443 = arith.addf %441, %442 : vector<32x32xf32>
    %444 = math.tanh %443 : vector<32x32xf32>
    %445 = arith.mulf %440, %444 : vector<32x32xf32>
    %c4_i32_167 = arith.constant 4 : i32
    %446 = arith.index_cast %c4_i32_167 : i32 to index
    %c0_168 = arith.constant 0 : index
    %c0_169 = arith.constant 0 : index
    %447 = vector.load %arg18[%446, %c0_168, %c0_169] : memref<8x32x128xf32, #tpu.memory_space<vmem>>, vector<1x32x128xf32>
    %448 = vector.shape_cast %447 : vector<1x32x128xf32> to vector<32x128xf32>
    %cst_170 = arith.constant dense<0.000000e+00> : vector<32x128xf32>
    %449 = tpu.matmul %445, %357, %cst_170 {dimension_numbers = #tpu.dot_dimension_numbers<[1], [0], [0], [1], [0, 0, 1, 1], [], []>} : vector<32x32xf32>, vector<32x128xf32>, vector<32x128xf32> -> vector<32x128xf32>
    %450 = arith.addf %448, %449 : vector<32x128xf32>
    %451 = arith.negf %450 : vector<32x128xf32>
    %452 = math.exp %451 : vector<32x128xf32>
    %cst_171 = arith.constant 1.000000e+00 : f32
    %453 = vector.broadcast %cst_171 : f32 to vector<32x128xf32>
    %454 = arith.addf %453, %452 : vector<32x128xf32>
    %455 = arith.divf %453, %454 : vector<32x128xf32>
    %456 = math.tanh %450 : vector<32x128xf32>
    %457 = arith.select %132, %456, %455 : vector<32x128xi1>, vector<32x128xf32>
    %458 = vector.extract_strided_slice %457 {offsets = [0, 0], sizes = [32, 32], strides = [1, 1]} : vector<32x128xf32> to vector<32x32xf32>
    %459 = vector.extract_strided_slice %457 {offsets = [0, 32], sizes = [32, 32], strides = [1, 1]} : vector<32x128xf32> to vector<32x32xf32>
    %460 = vector.extract_strided_slice %457 {offsets = [0, 64], sizes = [32, 32], strides = [1, 1]} : vector<32x128xf32> to vector<32x32xf32>
    %461 = vector.extract_strided_slice %457 {offsets = [0, 96], sizes = [32, 32], strides = [1, 1]} : vector<32x128xf32> to vector<32x32xf32>
    %462 = arith.mulf %459, %443 : vector<32x32xf32>
    %463 = arith.mulf %458, %460 : vector<32x32xf32>
    %464 = arith.addf %462, %463 : vector<32x32xf32>
    %465 = math.tanh %464 : vector<32x32xf32>
    %466 = arith.mulf %461, %465 : vector<32x32xf32>
    %c5_i32_172 = arith.constant 5 : i32
    %467 = arith.index_cast %c5_i32_172 : i32 to index
    %c0_173 = arith.constant 0 : index
    %c0_174 = arith.constant 0 : index
    %468 = vector.load %arg18[%467, %c0_173, %c0_174] : memref<8x32x128xf32, #tpu.memory_space<vmem>>, vector<1x32x128xf32>
    %469 = vector.shape_cast %468 : vector<1x32x128xf32> to vector<32x128xf32>
    %cst_175 = arith.constant dense<0.000000e+00> : vector<32x128xf32>
    %470 = tpu.matmul %466, %357, %cst_175 {dimension_numbers = #tpu.dot_dimension_numbers<[1], [0], [0], [1], [0, 0, 1, 1], [], []>} : vector<32x32xf32>, vector<32x128xf32>, vector<32x128xf32> -> vector<32x128xf32>
    %471 = arith.addf %469, %470 : vector<32x128xf32>
    %472 = arith.negf %471 : vector<32x128xf32>
    %473 = math.exp %472 : vector<32x128xf32>
    %cst_176 = arith.constant 1.000000e+00 : f32
    %474 = vector.broadcast %cst_176 : f32 to vector<32x128xf32>
    %475 = arith.addf %474, %473 : vector<32x128xf32>
    %476 = arith.divf %474, %475 : vector<32x128xf32>
    %477 = math.tanh %471 : vector<32x128xf32>
    %478 = arith.select %132, %477, %476 : vector<32x128xi1>, vector<32x128xf32>
    %479 = vector.extract_strided_slice %478 {offsets = [0, 0], sizes = [32, 32], strides = [1, 1]} : vector<32x128xf32> to vector<32x32xf32>
    %480 = vector.extract_strided_slice %478 {offsets = [0, 32], sizes = [32, 32], strides = [1, 1]} : vector<32x128xf32> to vector<32x32xf32>
    %481 = vector.extract_strided_slice %478 {offsets = [0, 64], sizes = [32, 32], strides = [1, 1]} : vector<32x128xf32> to vector<32x32xf32>
    %482 = vector.extract_strided_slice %478 {offsets = [0, 96], sizes = [32, 32], strides = [1, 1]} : vector<32x128xf32> to vector<32x32xf32>
    %483 = arith.mulf %480, %464 : vector<32x32xf32>
    %484 = arith.mulf %479, %481 : vector<32x32xf32>
    %485 = arith.addf %483, %484 : vector<32x32xf32>
    %486 = math.tanh %485 : vector<32x32xf32>
    %487 = arith.mulf %482, %486 : vector<32x32xf32>
    %c6_i32_177 = arith.constant 6 : i32
    %488 = arith.index_cast %c6_i32_177 : i32 to index
    %c0_178 = arith.constant 0 : index
    %c0_179 = arith.constant 0 : index
    %489 = vector.load %arg18[%488, %c0_178, %c0_179] : memref<8x32x128xf32, #tpu.memory_space<vmem>>, vector<1x32x128xf32>
    %490 = vector.shape_cast %489 : vector<1x32x128xf32> to vector<32x128xf32>
    %cst_180 = arith.constant dense<0.000000e+00> : vector<32x128xf32>
    %491 = tpu.matmul %487, %357, %cst_180 {dimension_numbers = #tpu.dot_dimension_numbers<[1], [0], [0], [1], [0, 0, 1, 1], [], []>} : vector<32x32xf32>, vector<32x128xf32>, vector<32x128xf32> -> vector<32x128xf32>
    %492 = arith.addf %490, %491 : vector<32x128xf32>
    %493 = arith.negf %492 : vector<32x128xf32>
    %494 = math.exp %493 : vector<32x128xf32>
    %cst_181 = arith.constant 1.000000e+00 : f32
    %495 = vector.broadcast %cst_181 : f32 to vector<32x128xf32>
    %496 = arith.addf %495, %494 : vector<32x128xf32>
    %497 = arith.divf %495, %496 : vector<32x128xf32>
    %498 = math.tanh %492 : vector<32x128xf32>
    %499 = arith.select %132, %498, %497 : vector<32x128xi1>, vector<32x128xf32>
    %500 = vector.extract_strided_slice %499 {offsets = [0, 0], sizes = [32, 32], strides = [1, 1]} : vector<32x128xf32> to vector<32x32xf32>
    %501 = vector.extract_strided_slice %499 {offsets = [0, 32], sizes = [32, 32], strides = [1, 1]} : vector<32x128xf32> to vector<32x32xf32>
    %502 = vector.extract_strided_slice %499 {offsets = [0, 64], sizes = [32, 32], strides = [1, 1]} : vector<32x128xf32> to vector<32x32xf32>
    %503 = vector.extract_strided_slice %499 {offsets = [0, 96], sizes = [32, 32], strides = [1, 1]} : vector<32x128xf32> to vector<32x32xf32>
    %504 = arith.mulf %501, %485 : vector<32x32xf32>
    %505 = arith.mulf %500, %502 : vector<32x32xf32>
    %506 = arith.addf %504, %505 : vector<32x32xf32>
    %507 = math.tanh %506 : vector<32x32xf32>
    %508 = arith.mulf %503, %507 : vector<32x32xf32>
    %c7_i32_182 = arith.constant 7 : i32
    %509 = arith.index_cast %c7_i32_182 : i32 to index
    %c0_183 = arith.constant 0 : index
    %c0_184 = arith.constant 0 : index
    %510 = vector.load %arg18[%509, %c0_183, %c0_184] : memref<8x32x128xf32, #tpu.memory_space<vmem>>, vector<1x32x128xf32>
    %511 = vector.shape_cast %510 : vector<1x32x128xf32> to vector<32x128xf32>
    %cst_185 = arith.constant dense<0.000000e+00> : vector<32x128xf32>
    %512 = tpu.matmul %508, %357, %cst_185 {dimension_numbers = #tpu.dot_dimension_numbers<[1], [0], [0], [1], [0, 0, 1, 1], [], []>} : vector<32x32xf32>, vector<32x128xf32>, vector<32x128xf32> -> vector<32x128xf32>
    %513 = arith.addf %511, %512 : vector<32x128xf32>
    %514 = arith.negf %513 : vector<32x128xf32>
    %515 = math.exp %514 : vector<32x128xf32>
    %cst_186 = arith.constant 1.000000e+00 : f32
    %516 = vector.broadcast %cst_186 : f32 to vector<32x128xf32>
    %517 = arith.addf %516, %515 : vector<32x128xf32>
    %518 = arith.divf %516, %517 : vector<32x128xf32>
    %519 = math.tanh %513 : vector<32x128xf32>
    %520 = arith.select %132, %519, %518 : vector<32x128xi1>, vector<32x128xf32>
    %521 = vector.extract_strided_slice %520 {offsets = [0, 0], sizes = [32, 32], strides = [1, 1]} : vector<32x128xf32> to vector<32x32xf32>
    %522 = vector.extract_strided_slice %520 {offsets = [0, 32], sizes = [32, 32], strides = [1, 1]} : vector<32x128xf32> to vector<32x32xf32>
    %523 = vector.extract_strided_slice %520 {offsets = [0, 64], sizes = [32, 32], strides = [1, 1]} : vector<32x128xf32> to vector<32x32xf32>
    %524 = vector.extract_strided_slice %520 {offsets = [0, 96], sizes = [32, 32], strides = [1, 1]} : vector<32x128xf32> to vector<32x32xf32>
    %525 = arith.mulf %522, %506 : vector<32x32xf32>
    %526 = arith.mulf %521, %523 : vector<32x32xf32>
    %527 = arith.addf %525, %526 : vector<32x32xf32>
    %528 = math.tanh %527 : vector<32x32xf32>
    %529 = arith.mulf %524, %528 : vector<32x32xf32>
    %c8_i32_187 = arith.constant 8 : i32
    %c1_188 = arith.constant 1 : index
    %c0_189 = arith.constant 0 : index
    %c0_190 = arith.constant 0 : index
    %530 = vector.load %arg15[%c1_188, %c0_189, %c0_190] : memref<2x32x32xf32, #tpu.memory_space<vmem>>, vector<1x32x32xf32>
    %531 = vector.shape_cast %530 : vector<1x32x32xf32> to vector<32x32xf32>
    %532 = vector.shape_cast %529 : vector<32x32xf32> to vector<1x32x32xf32>
    tpu.vector_store %arg15[%c1_188, %c0_189, %c0_190], %532 {strides = array<i32>} : memref<2x32x32xf32, #tpu.memory_space<vmem>>, vector<1x32x32xf32>,
    %c1_191 = arith.constant 1 : index
    %c0_192 = arith.constant 0 : index
    %c0_193 = arith.constant 0 : index
    %533 = vector.load %arg16[%c1_191, %c0_192, %c0_193] : memref<2x32x32xf32, #tpu.memory_space<vmem>>, vector<1x32x32xf32>
    %534 = vector.shape_cast %533 : vector<1x32x32xf32> to vector<32x32xf32>
    %535 = vector.shape_cast %527 : vector<32x32xf32> to vector<1x32x32xf32>
    tpu.vector_store %arg16[%c1_191, %c0_192, %c0_193], %535 {strides = array<i32>} : memref<2x32x32xf32, #tpu.memory_space<vmem>>, vector<1x32x32xf32>,
    %536 = vector.shape_cast %529 : vector<32x32xf32> to vector<2x16x32xf32>
    %c0_194 = arith.constant 0 : index
    %c0_195 = arith.constant 0 : index
    %c0_196 = arith.constant 0 : index
    %537 = vector.load %arg14[%c0_194, %c0_195, %c0_196] : memref<2x16x32xf32, #tpu.memory_space<vmem>>, vector<2x16x32xf32>
    tpu.vector_store %arg14[%c0_194, %c0_195, %c0_196], %536 {strides = array<i32>} : memref<2x16x32xf32, #tpu.memory_space<vmem>>, vector<2x16x32xf32>,
    return
  }
  func.func @transform_0(%arg0: i32) -> (i32, i32, i32) {
    %c0_i32 = arith.constant 0 : i32
    %c0_i32_0 = arith.constant 0 : i32
    %c0_i32_1 = arith.constant 0 : i32
    %c0_i32_2 = arith.constant 0 : i32
    return %c0_i32, %c0_i32_0, %c0_i32_1 : i32, i32, i32
  }
  func.func @transform_1(%arg0: i32) -> (i32, i32, i32) {
    %c0_i32 = arith.constant 0 : i32
    %c0_i32_0 = arith.constant 0 : i32
    %c0_i32_1 = arith.constant 0 : i32
    return %arg0, %c0_i32, %c0_i32_0 : i32, i32, i32
  }
  func.func @transform_2(%arg0: i32) -> (i32, i32, i32) {
    %c0_i32 = arith.constant 0 : i32
    %c0_i32_0 = arith.constant 0 : i32
    %c0_i32_1 = arith.constant 0 : i32
    %c0_i32_2 = arith.constant 0 : i32
    return %c0_i32, %c0_i32_0, %c0_i32_1 : i32, i32, i32
  }
  func.func @transform_3(%arg0: i32) -> (i32, i32) {
    %c0_i32 = arith.constant 0 : i32
    %c0_i32_0 = arith.constant 0 : i32
    %c0_i32_1 = arith.constant 0 : i32
    return %c0_i32, %c0_i32_0 : i32, i32
  }
  func.func @transform_4(%arg0: i32) -> (i32, i32) {
    %c0_i32 = arith.constant 0 : i32
    %c0_i32_0 = arith.constant 0 : i32
    %c0_i32_1 = arith.constant 0 : i32
    return %c0_i32, %c0_i32_0 : i32, i32
  }
  func.func @transform_5(%arg0: i32) -> (i32, i32) {
    %c0_i32 = arith.constant 0 : i32
    %c0_i32_0 = arith.constant 0 : i32
    %c0_i32_1 = arith.constant 0 : i32
    return %c0_i32, %c0_i32_0 : i32, i32
  }
  func.func @transform_6(%arg0: i32) -> (i32, i32) {
    %c0_i32 = arith.constant 0 : i32
    %c0_i32_0 = arith.constant 0 : i32
    %c0_i32_1 = arith.constant 0 : i32
    return %c0_i32, %c0_i32_0 : i32, i32
  }
  func.func @transform_7(%arg0: i32) -> (i32, i32, i32) {
    %c0_i32 = arith.constant 0 : i32
    %c0_i32_0 = arith.constant 0 : i32
    %c0_i32_1 = arith.constant 0 : i32
    return %c0_i32, %arg0, %c0_i32_0 : i32, i32, i32
  }
  func.func @transform_8(%arg0: i32) -> (i32, i32, i32) {
    %c0_i32 = arith.constant 0 : i32
    %c0_i32_0 = arith.constant 0 : i32
    %c0_i32_1 = arith.constant 0 : i32
    return %c0_i32, %arg0, %c0_i32_0 : i32, i32, i32
  }
  func.func @transform_9(%arg0: i32) -> (i32, i32) {
    %c0_i32 = arith.constant 0 : i32
    %c0_i32_0 = arith.constant 0 : i32
    %c0_i32_1 = arith.constant 0 : i32
    return %c0_i32, %c0_i32_0 : i32, i32
  }
  func.func @transform_10(%arg0: i32) -> (i32, i32, i32) {
    %c0_i32 = arith.constant 0 : i32
    %c0_i32_0 = arith.constant 0 : i32
    %c0_i32_1 = arith.constant 0 : i32
    %c0_i32_2 = arith.constant 0 : i32
    return %c0_i32, %c0_i32_0, %c0_i32_1 : i32, i32, i32
  }
  func.func @transform_11(%arg0: i32) -> (i32, i32, i32) {
    %c0_i32 = arith.constant 0 : i32
    %c0_i32_0 = arith.constant 0 : i32
    %c0_i32_1 = arith.constant 0 : i32
    %c0_i32_2 = arith.constant 0 : i32
    return %c0_i32, %c0_i32_0, %c0_i32_1 : i32, i32, i32
  }
  func.func @transform_12(%arg0: i32) -> (i32, i32, i32) {
    %c0_i32 = arith.constant 0 : i32
    %c0_i32_0 = arith.constant 0 : i32
    %c0_i32_1 = arith.constant 0 : i32
    %c0_i32_2 = arith.constant 0 : i32
    return %c0_i32, %c0_i32_0, %c0_i32_1 : i32, i32, i32
  }
  func.func @transform_13(%arg0: i32) -> (i32, i32, i32) {
    %c0_i32 = arith.constant 0 : i32
    %c0_i32_0 = arith.constant 0 : i32
    %c0_i32_1 = arith.constant 0 : i32
    return %arg0, %c0_i32, %c0_i32_0 : i32, i32, i32
  }
  func.func @transform_14(%arg0: i32) -> (i32, i32, i32) {
    %c0_i32 = arith.constant 0 : i32
    %c0_i32_0 = arith.constant 0 : i32
    %c0_i32_1 = arith.constant 0 : i32
    return %c0_i32, %arg0, %c0_i32_0 : i32, i32, i32
  }
  func.func @transform_15(%arg0: i32) -> (i32, i32, i32) {
    %c0_i32 = arith.constant 0 : i32
    %c0_i32_0 = arith.constant 0 : i32
    %c0_i32_1 = arith.constant 0 : i32
    return %c0_i32, %arg0, %c0_i32_0 : i32, i32, i32
  }
}

</mosaic_0001>

<bundles_post_ra>
// kernel: tpu_custom_call.1
= control target key start
LH: loop header
LB: loop body
LE: loop exit
PB: predicated region body
PF: predicated region fallthrough
CT: control target
= control target key end

     0   :  { %21 = vsyncpa [#allocation5], 0  ;;  %s8803_s0 = inlined_call_operand.hbm [shape: f32[3,32,32], index: 0, kind: input, shape index: {}]   ;;  %s8804_s1 = inlined_call_operand.vmem [shape: f32[1,32,8], index: 1, kind: input, shape index: {}]   ;;  %s8805_s2 = inlined_call_operand.hbm [shape: f32[3,8,8], index: 2, kind: input, shape index: {}]   ;;  %s8806_s3 = inlined_call_operand.hbm [shape: f32[1,8], index: 3, kind: input, shape index: {}]   ;;  %s8807_s4 = inlined_call_operand.hbm [shape: f32[8,8], index: 4, kind: input, shape index: {}]   ;;  %s8808_s5 = inlined_call_operand.hbm [shape: f32[1,8], index: 5, kind: input, shape index: {}]   ;;  %s8809_s6 = inlined_call_operand.vmem [shape: f32[2,32], index: 6, kind: input, shape index: {}]   ;;  %s8810_s7 = inlined_call_operand.vmem [shape: f32[2,32,32], index: 7, kind: input, shape index: {}]   ;;  %s8811_s8 = inlined_call_operand.hbm [shape: f32[2,32,32], index: 8, kind: input, shape index: {}]   ;;  %s8812_s9 = inlined_call_operand.vmem [shape: f32[1,128], index: 9, kind: input, shape index: {}]   ;;  %s8813_s10 = inlined_call_operand.hbm [shape: f32[2,32,128], index: 10, kind: input, shape index: {}]   ;;  %s8814_s11 = inlined_call_operand.hbm [shape: f32[2,32,128], index: 11, kind: input, shape index: {}]   ;;  %s8815_s12 = inlined_call_operand.vmem [shape: f32[2,1,128], index: 12, kind: input, shape index: {}]   ;;  %s8816_s13 = inlined_call_operand.hbm [shape: f32[2,16,32], index: 13, kind: output, shape index: {0}]   ;;  %s8817_s14 = inlined_call_operand.hbm [shape: f32[2,32,32], index: 14, kind: output, shape index: {1}]   ;;  %s8818_s15 = inlined_call_operand.hbm [shape: f32[2,32,32], index: 15, kind: output, shape index: {2}]  }
   0x1   :  { %22 = vsyncpa [#allocation8], 0 }
   0x2   :  { %23 = vsyncpa [#allocation11], 0 }
   0x3   :  { %24 = vsyncpa [#allocation14], 0 }
   0x4   :  { %25 = vsyncpa [#allocation17], 0 }
   0x5   :  { %26 = vsyncpa [#allocation6], 0 }
   0x6   :  { %27 = vsyncpa [#allocation20], 0  ;;  %s7198_s18 = smov [#allocation7]   ;;  %s7199_s20 = smov [#allocation10]  }
   0x7   :  { %s47_s19 = sshll.u32 %s7198_s18, 4  ;;  %s70_s21 = sshll.u32 %s7199_s20, 4  ;;  %s48_s19 = int_to_ptr.vmem [resolvable:$true] %s47_s19  ;;  %s71_s21 = int_to_ptr.vmem [resolvable:$true] %s70_s21 }
   0x8   :  { %s6942_s24 = scalar_lea.hbm %s8805_s2, 384 }
   0x9   :  { %p6943_p0 = scmp.ne.s32.totalorder %s8805_s2, %s6942_s24  ;;  %p6946_p1 = scmp.lt.u32.totalorder %s6942_s24, %s8805_s2 }
   0xb   :  { %p6948_p2 = pnand %p6946_p1, %p6943_p0 }
   0xd   :  { %6951 = shalt.err (!%p6948_p2)
}
   0xe   :  { %s6952_s29 = scalar_lea.vmem %s48_s19, 384  ;;  %p6957_p4 = scmp.lt.s32.totalorder %s48_s19, %s48_s19 }
   0xf   :  { %p6953_p3 = scmp.ne.s32.totalorder %s48_s19, %s6952_s29  ;;  %p6958_p5 = scmp.lt.s32.totalorder %s6952_s29, %s6952_s29 }
  0x11   :  { %p6959_p6 = por %p6958_p5, %p6957_p4 }
  0x13   :  { %p6960_p7 = pnand %p6959_p6, %p6953_p3 }
  0x15   :  { %6963 = shalt.err (!%p6960_p7)
}
  0x16   :  { %s7200_s30 = smov 128   ;;  %s7201_s16 = smov 8  }
  0x17   :  { %53 = dma.hbm_to_vmem [thread:$0]  %s8805_s2, 384, %s48_s19, [#allocation8], %s7200_s30, %s7200_s30, %s7201_s16  }
  0x18   :  { %s6964_s23 = scalar_lea.hbm %s8807_s4, 128 }
  0x19   :  { %p6965_p8 = scmp.ne.s32.totalorder %s8807_s4, %s6964_s23  ;;  %p6968_p9 = scmp.lt.u32.totalorder %s6964_s23, %s8807_s4 }
  0x1b   :  { %p6970_p10 = pnand %p6968_p9, %p6965_p8 }
  0x1d   :  { %6973 = shalt.err (!%p6970_p10)
}
  0x1e   :  { %s6974_s28 = scalar_lea.vmem %s71_s21, 128  ;;  %p6979_p12 = scmp.lt.s32.totalorder %s71_s21, %s71_s21 }
  0x1f   :  { %p6975_p11 = scmp.ne.s32.totalorder %s71_s21, %s6974_s28  ;;  %p6980_p13 = scmp.lt.s32.totalorder %s6974_s28, %s6974_s28 }
  0x21   :  { %p6981_p0 = por %p6980_p13, %p6979_p12 }
  0x23   :  { %p6982_p1 = pnand %p6981_p0, %p6975_p11 }
  0x25   :  { %6985 = shalt.err (!%p6982_p1)
}
  0x26   :  { %73 = dma.hbm_to_vmem [thread:$0]  %s8807_s4, 128, %s71_s21, [#allocation11]  }
  0x27   :  { %s7202_s29 = smov [#allocation13]   ;;  %s7203_s18 = smov [#allocation4]  }
  0x28   :  { %s93_s17 = sshll.u32 %s7202_s29, 4  ;;  %s33_s20 = sshll.u32 %s7203_s18, 4  ;;  %s94_s17 = int_to_ptr.vmem [resolvable:$true] %s93_s17  ;;  %s7333_s20 = int_to_ptr.vmem [resolvable:$true] %s33_s20 }
  0x29   :  { %s6986_s24 = scalar_lea.hbm %s8811_s8, 1024 }
  0x2a   :  { %p6987_p2 = scmp.ne.s32.totalorder %s8811_s8, %s6986_s24  ;;  %p6990_p3 = scmp.lt.u32.totalorder %s6986_s24, %s8811_s8 }
  0x2c   :  { %p6992_p4 = pnand %p6990_p3, %p6987_p2 }
  0x2e   :  { %6995 = shalt.err (!%p6992_p4)
}
  0x2f   :  { %s6996_s4 = scalar_lea.vmem %s94_s17, 1024  ;;  %p7001_p6 = scmp.lt.s32.totalorder %s94_s17, %s94_s17 }
  0x30   :  { %p6997_p5 = scmp.ne.s32.totalorder %s94_s17, %s6996_s4  ;;  %p7002_p7 = scmp.lt.s32.totalorder %s6996_s4, %s6996_s4 }
  0x32   :  { %p7003_p8 = por %p7002_p7, %p7001_p6 }
  0x34   :  { %p7004_p9 = pnand %p7003_p8, %p6997_p5 }
  0x36   :  { %7007 = shalt.err (!%p7004_p9)
}
  0x37   :  { %99 = dma.hbm_to_vmem [thread:$0]  %s8811_s8, 1024, %s94_s17, [#allocation14], %s7200_s30, %s7200_s30, %s7201_s16  }
  0x38   :  { %s7008_s18 = scalar_lea.hbm %s8803_s0, 1536 }
  0x39   :  { %p7009_p10 = scmp.ne.s32.totalorder %s8803_s0, %s7008_s18  ;;  %p7012_p11 = scmp.lt.u32.totalorder %s7008_s18, %s8803_s0 }
  0x3b   :  { %p7014_p12 = pnand %p7012_p11, %p7009_p10 }
  0x3d   :  { %7017 = shalt.err (!%p7014_p12)
}
  0x3e   :  { %s7018_s26 = scalar_lea.vmem %s7333_s20, 1536  ;;  %p7023_p0 = scmp.lt.s32.totalorder %s7333_s20, %s7333_s20 }
  0x3f   :  { %p7019_p13 = scmp.ne.s32.totalorder %s7333_s20, %s7018_s26  ;;  %p7024_p1 = scmp.lt.s32.totalorder %s7018_s26, %s7018_s26 }
  0x41   :  { %p7025_p2 = por %p7024_p1, %p7023_p0 }
  0x43   :  { %p7026_p3 = pnand %p7025_p2, %p7019_p13 }
  0x45   :  { %7029 = shalt.err (!%p7026_p3)
}
  0x46   :  { %39 = dma.hbm_to_vmem [thread:$0]  %s8803_s0, 1536, %s7333_s20, [#allocation5], %s7200_s30, %s7200_s30, %s7201_s16  }
  0x47   :  { %s7204_s27 = smov [#allocation9]   ;;  %s7205_s4 = smov [#allocation12]  }
  0x48   :  { %s60_s28 = sshll.u32 %s7204_s27, 4  ;;  %s80_s21 = sshll.u32 %s7205_s4, 4  ;;  %s61_s28 = int_to_ptr.vmem [resolvable:$true] %s60_s28  ;;  %s81_s21 = int_to_ptr.vmem [resolvable:$true] %s80_s21 }
  0x49   :  { %s7030_s29 = scalar_lea.hbm %s8806_s3, 16 }
  0x4a   :  { %p7031_p4 = scmp.ne.s32.totalorder %s8806_s3, %s7030_s29  ;;  %p7034_p5 = scmp.lt.u32.totalorder %s7030_s29, %s8806_s3 }
  0x4c   :  { %p7036_p6 = pnand %p7034_p5, %p7031_p4 }
  0x4e   :  { %7039 = shalt.err (!%p7036_p6)
}
  0x4f   :  { %s7040_s0 = scalar_lea.vmem %s61_s28, 16  ;;  %s7044_s20 = scalar_lea.vmem %s61_s28, 32 }
  0x50   :  { %p7041_p7 = scmp.ne.s32.totalorder %s61_s28, %s7040_s0  ;;  %p7045_p8 = scmp.lt.s32.totalorder %s61_s28, %s61_s28 }
  0x51   :  { %p7046_p9 = scmp.lt.s32.totalorder %s7044_s20, %s7040_s0 }
  0x53   :  { %p7047_p10 = por %p7046_p9, %p7045_p8 }
  0x55   :  { %p7048_p11 = pnand %p7047_p10, %p7041_p7 }
  0x57   :  { %7051 = shalt.err (!%p7048_p11)
}
  0x58   :  { %63 = dma.hbm_to_vmem [thread:$0]  %s8806_s3, 16, %s61_s28, [#allocation8]  }
  0x59   :  { %s7052_s27 = scalar_lea.hbm %s8808_s5, 16 }
  0x5a   :  { %p7053_p12 = scmp.ne.s32.totalorder %s8808_s5, %s7052_s27  ;;  %p7056_p13 = scmp.lt.u32.totalorder %s7052_s27, %s8808_s5 }
  0x5c   :  { %p7058_p0 = pnand %p7056_p13, %p7053_p12 }
  0x5e   :  { %7061 = shalt.err (!%p7058_p0)
}
  0x5f   :  { %s7062_s18 = scalar_lea.vmem %s81_s21, 16  ;;  %s7066_s22 = scalar_lea.vmem %s81_s21, 32 }
  0x60   :  { %p7063_p1 = scmp.ne.s32.totalorder %s81_s21, %s7062_s18  ;;  %p7067_p2 = scmp.lt.s32.totalorder %s81_s21, %s81_s21 }
  0x61   :  { %p7068_p3 = scmp.lt.s32.totalorder %s7066_s22, %s7062_s18 }
  0x63   :  { %p7069_p4 = por %p7068_p3, %p7067_p2 }
  0x65   :  { %p7070_p5 = pnand %p7069_p4, %p7063_p1 }
  0x67   :  { %7073 = shalt.err (!%p7070_p5)
}
  0x68   :  { %83 = dma.hbm_to_vmem [thread:$0]  %s8808_s5, 16, %s81_s21, [#allocation11]  }
  0x69   :  { %s7206_s23 = smov [#allocation15]   ;;  %s7207_s0 = smov [#allocation16]  }
  0x6a   :  { %s107_s24 = sshll.u32 %s7206_s23, 4  ;;  %s119_s20 = sshll.u32 %s7207_s0, 4  ;;  %s108_s24 = int_to_ptr.vmem [resolvable:$true] %s107_s24  ;;  %s7394_s20 = int_to_ptr.vmem [resolvable:$true] %s119_s20 }
  0x6b   :  { %s7074_s8 = scalar_lea.hbm %s8813_s10, 1024 }
  0x6c   :  { %p7075_p6 = scmp.ne.s32.totalorder %s8813_s10, %s7074_s8  ;;  %p7078_p7 = scmp.lt.u32.totalorder %s7074_s8, %s8813_s10 }
  0x6e   :  { %p7080_p8 = pnand %p7078_p7, %p7075_p6 }
  0x70   :  { %7083 = shalt.err (!%p7080_p8)
}
  0x71   :  { %s7084_s5 = scalar_lea.vmem %s108_s24, 1024  ;;  %p7089_p10 = scmp.lt.s32.totalorder %s108_s24, %s108_s24 }
  0x72   :  { %p7085_p9 = scmp.ne.s32.totalorder %s108_s24, %s7084_s5  ;;  %p7090_p11 = scmp.lt.s32.totalorder %s7084_s5, %s7084_s5 }
  0x74   :  { %p7091_p12 = por %p7090_p11, %p7089_p10 }
  0x76   :  { %p7092_p13 = pnand %p7091_p12, %p7085_p9 }
  0x78   :  { %7095 = shalt.err (!%p7092_p13)
}
  0x79   :  { %113 = dma.hbm_to_vmem [thread:$0]  %s8813_s10, 1024, %s108_s24, [#allocation14], %s7200_s30, %s7200_s30, %s7201_s16  }
  0x7a   :  { %s7096_s22 = scalar_lea.hbm %s8814_s11, 1024 }
  0x7b   :  { %p7097_p0 = scmp.ne.s32.totalorder %s8814_s11, %s7096_s22  ;;  %p7100_p1 = scmp.lt.u32.totalorder %s7096_s22, %s8814_s11 }
  0x7d   :  { %p7102_p2 = pnand %p7100_p1, %p7097_p0 }
  0x7f   :  { %7105 = shalt.err (!%p7102_p2)
}
  0x80   :  { %s7106_s25 = scalar_lea.vmem %s7394_s20, 1024  ;;  %p7111_p4 = scmp.lt.s32.totalorder %s7394_s20, %s7394_s20 }
  0x81   :  { %p7107_p3 = scmp.ne.s32.totalorder %s7394_s20, %s7106_s25  ;;  %p7112_p5 = scmp.lt.s32.totalorder %s7106_s25, %s7106_s25 }
  0x83   :  { %p7113_p6 = por %p7112_p5, %p7111_p4 }
  0x85   :  { %p7114_p7 = pnand %p7113_p6, %p7107_p3 }
  0x87   :  { %7117 = shalt.err (!%p7114_p7)
}
  0x88   :  { %125 = dma.hbm_to_vmem [thread:$0]  %s8814_s11, 1024, %s7394_s20, [#allocation17], %s7200_s30, %s7200_s30, %s7201_s16  }
  0x89   :  { %7184 = dma.done.wait [#allocation5], 1536  }
  0x8a   :  { %7185 = vsyncadd [#allocation5], 4294965760 }
  0x8b   :  { %7186 = dma.done.wait [#allocation8], 400  }
  0x8c   :  { %7187 = vsyncadd [#allocation8], 4294966896 }
  0x8d   :  { %7188 = dma.done.wait [#allocation11], 144  }
  0x8e   :  { %7189 = vsyncadd [#allocation11], 4294967152 }
  0x8f   :  { %7190 = dma.done.wait [#allocation14], 2048  }
  0x90   :  { %7191 = vsyncadd [#allocation14], 4294965248 }
  0x91   :  { %7192 = dma.done.wait [#allocation17], 1024  }
  0x92   :  { %7193 = vsyncadd [#allocation17], 4294966272  ;;  %vm160_vm0 = vcmask 261120   ;;  %v7434_v0 = vld [vmem:[%s8804_s1] sm:$0xff]  ;;  %v7439_v1 = vld [vmem:[%s8804_s1 + $0x8] sm:$0xff]  ;;  %vm363_vm1 = vcmask 64512  }
  0x93   :  { %v7444_v2 = vld [vmem:[%s8804_s1 + $0x10] sm:$0xff]  ;;  %v6139_v3 = vpack.c.bf16 %v7439_v1, %v7434_v0  ;;  %v7451_v4 = vld [vmem:[%s8804_s1 + $0x18] sm:$0xff]  ;;  %v260_v5 = vld [vmem:[#allocation4 + $0x20] sm:$0xff]  ;;  %v7208_v33 = vmov 0.0|0.0   ;;  %vm7209_vm2 = vmmov 0   ;;  %v7210_v34 = vmov 0.0  }
  0x94   :  { %v6143_v6 = vpack.c.bf16 %v7451_v4, %v7444_v2  ;;  %5794 = vmatprep.mubr.msk.f32.mxu1 %vm160_vm0, %v260_v5  ;;  %v156_v7 = vld [vmem:[#allocation4] sm:$0xff]  ;;  %v362_v8 = vld [vmem:[#allocation7 + $0x8] sm:$0xff]  ;;  %v262_v11 = vld [vmem:[#allocation4 + $0x30] sm:$0xff]  ;;  %s7213_s24 = smov 64   ;;  %s7214_s26 = smov 32  }
  0x95   :  { %6148 = vmatprep.subr.bf16.mxu1 %v6139_v3  ;;  %6140 = vmatprep.subr.bf16.mxu0 %v6139_v3  ;;  %v261_v9 = vld [vmem:[#allocation4 + $0x28] sm:$0xff]  ;;  %v158_v12 = vld [vmem:[#allocation4 + $0x10] sm:$0xff]  ;;  %v263_v13 = vld [vmem:[#allocation4 + $0x38] sm:$0xff]  ;;  %s7224_s10 = smov [#allocation18]  }
  0x96   :  { %6150 = vmatpush3.bf16.msra.mxu1 %v6139_v3  ;;  %6142 = vmatpush3.bf16.msra.mxu0 %v6139_v3  ;;  %v157_v10 = vld [vmem:[#allocation4 + $0x8] sm:$0xff]  ;;  %v159_v14 = vld [vmem:[#allocation4 + $0x18] sm:$0xff]  ;;  %v559_v15 = vld [vmem:[#allocation4 + $0x40] sm:$0xff] }
  0x97   :  { %6152 = vmatprep.subr.bf16.mxu1 %v6143_v6  ;;  %6144 = vmatprep.subr.bf16.mxu0 %v6143_v6  ;;  %v560_v16 = vld [vmem:[#allocation4 + $0x48] sm:$0xff]  ;;  %v561_v17 = vld [vmem:[#allocation4 + $0x50] sm:$0xff]  ;;  %v562_v18 = vld [vmem:[#allocation4 + $0x58] sm:$0xff] }
  0x98   :  { %5780 = vmatprep.mubr.msk.f32.mxu0 %vm160_vm0, %v156_v7  ;;  %v258_v19 = vld [vmem:[#allocation7] sm:$0xff]  ;;  %v661_v24 = vld [vmem:[#allocation7 + $0x10] sm:$0xff]  ;;  %v5386_v35 = vld [vmem:[#allocation9] ss:$0 sm:$0xff] }
  0x99   :  { %v782_v54 = vld [vmem:[%s8809_s6] sm:$0x3]  ;;  %v1308_v58 = vld [vmem:[#allocation16] sm:$0xff]  ;;  %v1309_v59 = vld [vmem:[#allocation16 + $0x8] sm:$0xff] }
  0x9a   :  { %6154 = vmatpush3.bf16.msra.mxu1 %v6143_v6  ;;  %6146 = vmatpush3.bf16.msra.mxu0 %v6143_v6  ;;  %v856_v55 = vld [vmem:[#allocation10] sm:$0xff]  ;;  %v7491_v61 = vpack.c.bf16 %v1309_v59, %v1308_v58  ;;  %v1313_v5 = vld [vmem:[%s8810_s7 + $0x8] sm:$0xff] }
  0x9b   :  { %6156 = vmatprep.subr.bf16.mxu1 %v6139_v3  ;;  %5800 = vmatprep.subr.mxu0 %v362_v8  ;;  %v1310_v60 = vld [vmem:[#allocation16 + $0x10] sm:$0xff]  ;;  %v1311_v62 = vld [vmem:[#allocation16 + $0x18] sm:$0xff] }
  0x9c   :  { %v1312_v63 = vld [vmem:[%s8810_s7] sm:$0xff]  ;;  %v1315_v7 = vld [vmem:[%s8810_s7 + $0x18] sm:$0xff] }
  0x9d   :  { %5795 = vmatmul.mubr.msk.f32.vlgmr.msra.gmra.mrb[0].mxu1 %vm160_vm0, %v261_v9  ;;  %5781 = vmatmul.mubr.msk.f32.vlgmr.msra.gmra.mrb[0].mxu0 %vm160_vm0, %v157_v10 }
  0x9e   :  { %5797 = vmatprep.mubr.msk.f32.mxu1 %vm160_vm0, %v262_v11  ;;  %6158 = vmatpush3.bf16.msra.mxu1 %v6139_v3  ;;  %v7496_v3 = vpack.c.bf16 %v1311_v62, %v1310_v60 }
  0x9f   :  { %5783 = vmatprep.mubr.msk.f32.mxu0 %vm160_vm0, %v158_v12  ;;  %6160 = vmatprep.subr.bf16.mxu1 %v6143_v6 }
  0xa0   :  { %5801 = vmatpush3.msra.mxu0 %v362_v8  ;;  %v5388_v8 = vld [vmem:[#allocation12] ss:$0 sm:$0xff] }
  0xa1   :  { %5798 = vmatmul.mubr.msk.f32.gmra.mrb[2].mxu1 %vm160_vm0, %v263_v13  ;;  %5784 = vmatmul.mubr.msk.f32.gmra.mrb[2].mxu0 %vm160_vm0, %v159_v14  ;;  %v7211_v13 = vmov 0  }
  0xa2   :  { %6162 = vmatpush3.bf16.msra.mxu1 %v6143_v6  ;;  %5824 = vmatprep.mubr.msk.f32.mxu1 %vm160_vm0, %v559_v15  ;;  %v1314_v6 = vld [vmem:[%s8810_s7 + $0x10] sm:$0xff] }
  0xa3   :  { %5808 = vmatprep.subr.mxu0 %v258_v19  ;;  %6163 = vmatprep.subr.bf16.mxu1 %v7208_v33 }
  0xa4   :  { %6405 = vset.pattern.permute.xlu0 %v7211_v13  ;;  %6406 = vset.pattern.permute.xlu1 %v7211_v13 }
  0xa5   :  { %5825 = vmatmul.mubr.msk.f32.vlgmr.msra.gmra.mrb[4].mxu1 %vm160_vm0, %v560_v16 }
  0xa6   :  { %5827 = vmatprep.mubr.msk.f32.mxu1 %vm160_vm0, %v561_v17 }
  0xa9   :  { %5828 = vmatmul.mubr.msk.f32.gmra.mrb[6].mxu1 %vm160_vm0, %v562_v18 }
  0xaa   :  { %5846 = vmatprep.mubr.msk.f32.mxu1 %vm7209_vm2, %v7210_v34 }
 0x170   :  { %v5796_v20 = vpop.f32.mrb[0].mxu1  ;;  %v5782_v21 = vpop.f32.mrb[0].mxu0 }
 0x171   :  { %v342_v22 = vpop.f32.mrb[1].mxu1  ;;  %v239_v23 = vpop.f32.mrb[1].mxu0 }
 0x172   :  { %5802 = vmatprep.mubr.msk.f32.mxu0 %vm363_vm1, %v342_v22  ;;  %v1021_v22 = vlaneseq }
 0x173   :  { %5803 = vmatmul.mubr.msk.f32.vlgmr.msra.gmra.mrb[4].mxu0 %vm363_vm1, %v5796_v20  ;;  %v7212_v20 = vmov 1966171168  }
 0x174   :  { %v5799_v25 = vpop.f32.mrb[2].mxu1  ;;  %5809 = vmatpush3.msra.mxu0 %v258_v19  ;;  %v5785_v26 = vpop.f32.mrb[2].mxu0 }
 0x175   :  { %v352_v27 = vpop.f32.mrb[3].mxu1  ;;  %5830 = vmatprep.subr.mxu0 %v661_v24  ;;  %v249_v28 = vpop.f32.mrb[3].mxu0 }
 0x176   :  { %5805 = vmatprep.mubr.msk.f32.mxu0 %vm363_vm1, %v352_v27 }
 0x177   :  { %5806 = vmatmul.mubr.msk.f32.gmra.mrb[6].mxu0 %vm363_vm1, %v5799_v25 }
 0x178   :  { %5810 = vmatprep.mubr.msk.f32.mxu0 %vm363_vm1, %v239_v23  ;;  %v5826_v29 = vpop.f32.mrb[4].mxu1 }
 0x179   :  { %v641_v30 = vpop.f32.mrb[5].mxu1 }
 0x17b   :  { %5811 = vmatmul.mubr.msk.f32.vlgmr.msra.gmra.mrb[4].mxu0 %vm363_vm1, %v5782_v21  ;;  %v1019_v21 = vunpack.c.l.s4 %v7212_v20 }
 0x17c   :  { %5831 = vmatpush3.msra.mxu0 %v661_v24  ;;  %5813 = vmatprep.mubr.msk.f32.mxu0 %vm363_vm1, %v249_v28  ;;  %v5829_v31 = vpop.f32.mrb[6].mxu1  ;;  %v1022_v24 = vshrl.u32 %v1021_v22, 7 }
 0x17d   :  { %v651_v32 = vpop.f32.mrb[7].mxu1  ;;  %6170 = vmatprep.subr.bf16.mxu0 %v7491_v61  ;;  %v1020_v23 = vunpack.c.0.s8 %v1019_v21 }
 0x17e   :  { %v1042_v28 = vsub.s32 0, %v1022_v24 }
 0x17f   :  { %5814 = vmatmul.mubr.msk.f32.gmra.mrb[6].mxu0 %vm363_vm1, %v5785_v26  ;;  %v1023_v25 = vsub.s32 %v1020_v23, %v1022_v24 }
 0x180   :  { %5832 = vmatprep.mubr.msk.f32.mxu0 %vm363_vm1, %v641_v30 }
 0x183   :  { %5833 = vmatmul.mubr.msk.f32.vlgmr.msra.gmra.mrb[4].mxu0 %vm363_vm1, %v5826_v29 }
 0x184   :  { %5835 = vmatprep.mubr.msk.f32.mxu0 %vm363_vm1, %v651_v32  ;;  %6172 = vmatpush3.bf16.msra.mxu0 %v7491_v61 }
 0x185   :  { %6174 = vmatprep.subr.bf16.mxu0 %v7496_v3 }
 0x187   :  { %5836 = vmatmul.mubr.msk.f32.gmra.mrb[6].mxu0 %vm363_vm1, %v5829_v31 }
 0x188   :  { %5867 = vmatprep.mubr.msk.f32.mxu0 %vm160_vm0, %v1312_v63  ;;  %6176 = vmatpush3.bf16.msra.mxu0 %v7496_v3 }
 0x189   :  { %6186 = vmatprep.subr.bf16.mxu0 %v7491_v61 }
 0x18b   :  { %5868 = vmatmul.mubr.msk.f32.vlgmr.msra.gmra.mrb[8].mxu0 %vm160_vm0, %v1313_v5 }
 0x18c   :  { %5870 = vmatprep.mubr.msk.f32.mxu0 %vm160_vm0, %v1314_v6  ;;  %6188 = vmatpush3.bf16.msra.mxu0 %v7491_v61  ;;  %v1304_v6 = vand.u32 127, %v1021_v22  ;;  %v1316_v22 = vld [vmem:[#allocation13] sm:$0xff] }
 0x18d   :  { %6190 = vmatprep.subr.bf16.mxu0 %v7496_v3 }
 0x18e   :  { %vm1305_vm3 = vcmp.ge.s32.totalorder %v1304_v6, 64  ;;  %vm1306_vm4 = vcmp.lt.s32.totalorder %v1304_v6, 96 }
 0x18f   :  { %5871 = vmatmul.mubr.msk.f32.gmra.mrb[10].mxu0 %vm160_vm0, %v1315_v7  ;;  %vm7560_vm5 = vmand %vm1305_vm3, %vm1306_vm4 }
 0x190   :  { %6192 = vmatpush3.bf16.msra.mxu0 %v7496_v3 }
 0x191   :  { %6202 = vmatprep.subr.bf16.mxu0 %v7491_v61 }
 0x256   :  { %v5834_v36 = vpop.f32.mrb[4].mxu0 }
 0x257   :  { %v771_v37 = vadd.f32 %v5834_v36, %v5386_v35  ;;  %v740_v38 = vpop.f32.mrb[5].mxu0 }
 0x258   :  { %v770_v39 = vadd.f32 %v5386_v35, %v740_v38 }
 0x259   :  { %v775_v40 = vmax.f32 %v771_v37, 0.0 }
 0x25a   :  { %v774_v41 = vmax.f32 %v770_v39, 0.0  ;;  %v5837_v42 = vpop.f32.mrb[6].mxu0 }
 0x25b   :  { %v779_v43 = vadd.f32 %v775_v40, %v7439_v1  ;;  %v773_v44 = vadd.f32 %v5837_v42, %v5386_v35  ;;  %v750_v45 = vpop.f32.mrb[7].mxu0 }
 0x25c   :  { %v778_v46 = vadd.f32 %v774_v41, %v7434_v0  ;;  %v772_v47 = vadd.f32 %v5386_v35, %v750_v45  ;;  %v7550_v41 = vld [vmem:[%s8815_s12] ss:$0 sm:$0xff] }
 0x25d   :  { %v777_v48 = vmax.f32 %v773_v44, 0.0 }
 0x25e   :  { %v6164_v49 = vpack.c.bf16 %v779_v43, %v778_v46  ;;  %v776_v50 = vmax.f32 %v772_v47, 0.0  ;;  %v5869_v37 = vpop.f32.mrb[8].mxu0 }
 0x25f   :  { %v781_v51 = vadd.f32 %v777_v48, %v7451_v4  ;;  %v1402_v38 = vpop.f32.mrb[9].mxu0 }
 0x260   :  { %v780_v52 = vadd.f32 %v776_v50, %v7444_v2  ;;  %6165 = vmatpush3.bf16.msra.mxu1 %v6164_v49 }
 0x261   :  { %6166 = vmatprep.subr.bf16.mxu1 %v7208_v33 }
 0x262   :  { %v6167_v53 = vpack.c.bf16 %v781_v51, %v780_v52  ;;  %v5872_v40 = vpop.f32.mrb[10].mxu0 }
 0x264   :  { %6168 = vmatpush3.bf16.msra.mxu1 %v6167_v53 }
 0x265   :  { %5849 = vmatprep.subr.mxu1 %v7210_v34 }
 0x267   :  { %5847 = vmatmul.mubr.msk.f32.vlgmr.msra.gmra.mrb[8].mxu1 %vm160_vm0, %v782_v54 }
 0x268   :  { %5850 = vmatpush3.msra.mxu1 %v856_v55  ;;  %5851 = vmatprep.mubr.msk.f32.mxu1 %vm7209_vm2, %v7210_v34 }
 0x269   :  { %5854 = vmatprep.subr.mxu1 %v7210_v34 }
 0x33a   :  { %v852_v56 = vpop.f32.mrb[8].mxu1 }
 0x33b   :  { %v5848_v57 = vpop.f32.mrb[9].mxu1  ;;  %5852 = vmatmul.mubr.msk.f32.vlgmr.msra.gmra.mrb[10].mxu1 %vm363_vm1, %v852_v56 }
 0x33c   :  { %5855 = vmatpush3.msra.mxu1 %v856_v55  ;;  %5856 = vmatprep.mubr.msk.f32.mxu1 %vm7209_vm2, %v7210_v34 }
 0x33d   :  { %6178 = vmatprep.subr.bf16.mxu1 %v7491_v61 }
 0x40e   :  { %v933_v9 = vpop.f32.mrb[10].mxu1 }
 0x40f   :  { %v934_v10 = vadd.f32 %v5388_v8, %v933_v9  ;;  %v5853_v11 = vpop.f32.mrb[11].mxu1 }
 0x411   :  { %v937_v12 = vmax.f32 %v934_v10, 0.0 }
 0x413   :  { %5857 = vmatmul.mubr.msk.f32.vlgmr.msra.gmra.mrb[12].mxu1 %vm363_vm1, %v937_v12 }
 0x414   :  { %6180 = vmatpush3.bf16.msra.mxu1 %v7491_v61 }
 0x415   :  { %6182 = vmatprep.subr.bf16.mxu1 %v7496_v3 }
 0x418   :  { %6184 = vmatpush3.bf16.msra.mxu1 %v7496_v3 }
 0x419   :  { %6194 = vmatprep.subr.bf16.mxu1 %v7491_v61 }
 0x4e6   :  { %v1007_v14 = vpop.f32.mrb[12].mxu1 }
 0x4e7   :  { %v1008_v15 = vadd.f32 %v5388_v8, %v1007_v14  ;;  %v5858_v16 = vpop.f32.mrb[13].mxu1 }
 0x4e9   :  { %v5391_v17 = vmul.f32 -1.442695, %v1008_v15 }
 0x4eb   :  { %6421 = vpow2.f32 %v5391_v17 }
 0x4f5   :  { %v6422_v18 = vpop.eup %6421 }
 0x4f6   :  { %v1014_v19 = vadd.f32 1.0, %v6422_v18 }
 0x4f8   :  { %6423 = vrcp.f32 %v1014_v19 }
 0x502   :  { %v6424_v26 = vpop.eup %6423 }
 0x503   :  { %v1024_v27 = vrot.slane %v6424_v26, %v1023_v25  ;;  %v1317_v26 = vld [vmem:[#allocation13 + $0x8] sm:$0xff] }
 0x505   :  { %v1025_v29 = vcombine.high %v1024_v27, %v1024_v27  ;;  %v1032_v30 = vrot.slane %v1024_v27, %v1023_v25  ;;  %v1319_v27 = vld [vmem:[#allocation13 + $0x18] sm:$0xff] }
 0x507   :  { %v1039_v31 = vrot.slane %v1025_v29, %v1023_v25  ;;  %v1043_v32 = vrot.slane %v1032_v30, %v1042_v28  ;;  %v1318_v25 = vld [vmem:[#allocation13 + $0x10] sm:$0xff] }
 0x509   :  { %v1047_v33 = vrot.slane %v1039_v31, %v1042_v28  ;;  %v7527_v34 = vmul.f32 %v1043_v32, %v7434_v0  ;;  %v7534_v36 = vmul.f32 %v1043_v32, %v7439_v1  ;;  %v1412_v0 = vpop.f32.mrb[11].mxu0 }
 0x50b   :  { %v7530_v35 = vmul.f32 %v1047_v33, %v7444_v2  ;;  %1058 = vperm.xlu0 %6405, %v7527_v34   ;;  %v7538_v39 = vmul.f32 %v1047_v33, %v7451_v4  ;;  %v7545_v2 = vld [vmem:[%s8812_s9] ss:$0 sm:$0xff] }
 0x50d   :  { %1068 = vperm.xlu1 %6406, %v7530_v35  }
 0x50f   :  { %1063 = vperm.xlu0 %6405, %v7534_v36  }
 0x511   :  { %1073 = vperm.xlu1 %6406, %v7538_v39  }
 0x58a   :  { %v1059_v1 = vpop.permute.xlu0 %1058 }
 0x58b   :  { %v1082_v4 = vmul.f32 %v7545_v2, %v1059_v1 }
 0x58c   :  { %v1069_v42 = vpop.permute.xlu1 %1068 }
 0x58d   :  { %v1084_v43 = vmul.f32 %v7545_v2, %v1069_v42  ;;  %v1092_v44 = vadd.f32 %v7550_v41, %v1082_v4 }
 0x58e   :  { %v1064_v45 = vpop.permute.xlu0 %1063 }
 0x58f   :  { %v1421_v46 = vadd.f32 %v1402_v38, %v1092_v44  ;;  %v1083_v47 = vmul.f32 %v7545_v2, %v1064_v45  ;;  %v1094_v48 = vadd.f32 %v7550_v41, %v1084_v43 }
 0x590   :  { %v1074_v49 = vpop.permute.xlu1 %1073 }
 0x591   :  { %v5398_v50 = vmul.f32 -1.442695, %v1421_v46  ;;  %v1093_v51 = vadd.f32 %v7550_v41, %v1083_v47  ;;  %v1423_v52 = vadd.f32 %v1412_v0, %v1094_v48  ;;  %v1085_v53 = vmul.f32 %v7545_v2, %v1074_v49 }
 0x593   :  { %6425 = vpow2.f32 %v5398_v50  ;;  %v1422_v54 = vadd.f32 %v5869_v37, %v1093_v51  ;;  %v5400_v55 = vmul.f32 -1.442695, %v1423_v52  ;;  %v1095_v56 = vadd.f32 %v7550_v41, %v1085_v53 }
 0x595   :  { %v5399_v57 = vmul.f32 -1.442695, %v1422_v54  ;;  %6427 = vpow2.f32 %v5400_v55  ;;  %v1424_v58 = vadd.f32 %v5872_v40, %v1095_v56 }
 0x597   :  { %6429 = vpow2.f32 %v5399_v57  ;;  %v5401_v59 = vmul.f32 -1.442695, %v1424_v58 }
 0x599   :  { %6431 = vpow2.f32 %v5401_v59 }
 0x59a   :  { %6433 = vtanh.f32 %v1421_v46 }
 0x59d   :  { %v6426_v60 = vpop.eup %6425 }
 0x59e   :  { %v1437_v62 = vadd.f32 1.0, %v6426_v60 }
 0x59f   :  { %v6428_v63 = vpop.eup %6427 }
 0x5a0   :  { %6435 = vrcp.f32 %v1437_v62  ;;  %v1439_v7 = vadd.f32 1.0, %v6428_v63 }
 0x5a1   :  { %v6430_v5 = vpop.eup %6429  ;;  %6437 = vtanh.f32 %v1423_v52 }
 0x5a2   :  { %v1438_v8 = vadd.f32 1.0, %v6430_v5  ;;  %6439 = vtanh.f32 %v1422_v54  ;;  %v7215_v54 = vmov 1  }
 0x5a3   :  { %6441 = vrcp.f32 %v1439_v7  ;;  %v6432_v9 = vpop.eup %6431  ;;  %6407 = vset.pattern.permute.xlu0 %v7215_v54  ;;  %6408 = vset.pattern.permute.xlu1 %v7215_v54 }
 0x5a4   :  { %6443 = vrcp.f32 %v1438_v8  ;;  %v1440_v10 = vadd.f32 1.0, %v6432_v9  ;;  %v6434_v12 = vpop.eup %6433 }
 0x5a6   :  { %6445 = vrcp.f32 %v1440_v10 }
 0x5a7   :  { %6447 = vtanh.f32 %v1424_v58 }
 0x5aa   :  { %v6436_v13 = vpop.eup %6435 }
 0x5ab   :  { %v6438_v14 = vpop.eup %6437  ;;  %v7566_v15 = vsel %vm7560_vm5, %v6434_v12, %v6436_v13 }
 0x5ac   :  { %v6440_v16 = vpop.eup %6439  ;;  %1481 = vrot.lane.b32.xlu0 %v7566_v15, %s7213_s24 }
 0x5ad   :  { %v6442_v17 = vpop.eup %6441 }
 0x5ae   :  { %v6444_v18 = vpop.eup %6443  ;;  %v7576_v20 = vsel %vm7560_vm5, %v6438_v14, %v6442_v17 }
 0x5af   :  { %v7572_v19 = vsel %vm7560_vm5, %v6440_v16, %v6444_v18 }
 0x5b0   :  { %1483 = vrot.lane.b32.xlu1 %v7572_v19, %s7213_s24  ;;  %1485 = vrot.lane.b32.xlu0 %v7576_v20, %s7213_s24  ;;  %v6446_v21 = vpop.eup %6445 }
 0x5b1   :  { %v6448_v23 = vpop.eup %6447 }
 0x5b2   :  { %v7584_v24 = vsel %vm7560_vm5, %v6448_v23, %v6446_v21 }
 0x5b4   :  { %1461 = vrot.lane.b32.xlu0 %v1316_v22, %s7214_s26  ;;  %1487 = vrot.lane.b32.xlu1 %v7584_v24, %s7213_s24 }
 0x5b8   :  { %1465 = vrot.lane.b32.xlu0 %v1318_v25, %s7214_s26  ;;  %1463 = vrot.lane.b32.xlu1 %v1317_v26, %s7214_s26 }
 0x5bc   :  { %1467 = vrot.lane.b32.xlu1 %v1319_v27, %s7214_s26 }
 0x61e   :  { %v1482_v28 = vpop.permute.xlu0 %1481 }
 0x61f   :  { %v1493_v29 = vmul.f32 %v1482_v28, %v7566_v15 }
 0x621   :  { %1501 = vrot.lane.b32.xlu0 %v1493_v29, %s7214_s26 }
 0x622   :  { %v1486_v30 = vpop.permute.xlu0 %1485  ;;  %v1484_v31 = vpop.permute.xlu1 %1483 }
 0x623   :  { %v1495_v32 = vmul.f32 %v1486_v30, %v7576_v20  ;;  %v1494_v33 = vmul.f32 %v1484_v31, %v7572_v19 }
 0x625   :  { %1505 = vrot.lane.b32.xlu0 %v1495_v32, %s7214_s26  ;;  %1503 = vrot.lane.b32.xlu1 %v1494_v33, %s7214_s26 }
 0x626   :  { %v1488_v37 = vpop.permute.xlu1 %1487  ;;  %v1462_v40 = vpop.permute.xlu0 %1461 }
 0x627   :  { %v1496_v38 = vmul.f32 %v1488_v37, %v7584_v24  ;;  %v1473_v4 = vmul.f32 %v1462_v40, %v7566_v15 }
 0x629   :  { %1507 = vrot.lane.b32.xlu1 %v1496_v38, %s7214_s26 }
 0x62a   :  { %v1464_v0 = vpop.permute.xlu1 %1463  ;;  %v1466_v1 = vpop.permute.xlu0 %1465 }
 0x62b   :  { %v1475_v45 = vmul.f32 %v1466_v1, %v7576_v20  ;;  %v1474_v46 = vmul.f32 %v1464_v0, %v7572_v19 }
 0x62e   :  { %v1468_v42 = vpop.permute.xlu1 %1467 }
 0x62f   :  { %v1476_v51 = vmul.f32 %v1468_v42, %v7584_v24 }
 0x693   :  { %v1502_v43 = vpop.permute.xlu0 %1501 }
 0x694   :  { %v7601_v44 = vadd.f32 %v1502_v43, %v1473_v4 }
 0x696   :  { %6449 = vtanh.f32 %v7601_v44 }
 0x697   :  { %v1506_v47 = vpop.permute.xlu0 %1505  ;;  %v1504_v48 = vpop.permute.xlu1 %1503 }
 0x698   :  { %v7606_v49 = vadd.f32 %v1506_v47, %v1475_v45  ;;  %v7608_v50 = vadd.f32 %v1504_v48, %v1474_v46 }
 0x69a   :  { %6451 = vtanh.f32 %v7606_v49 }
 0x69b   :  { %6453 = vtanh.f32 %v7608_v50  ;;  %v1508_v52 = vpop.permute.xlu1 %1507 }
 0x69c   :  { %v7613_v53 = vadd.f32 %v1508_v52, %v1476_v51 }
 0x69e   :  { %6455 = vtanh.f32 %v7613_v53 }
 0x6a0   :  { %v6450_v55 = vpop.eup %6449 }
 0x6a1   :  { %1525 = vrot.lane.b32.xlu0 %v6450_v55, %s7213_s24 }
 0x6a4   :  { %v6452_v56 = vpop.eup %6451 }
 0x6a5   :  { %v6454_v57 = vpop.eup %6453  ;;  %1529 = vrot.lane.b32.xlu0 %v6452_v56, %s7213_s24 }
 0x6a6   :  { %1527 = vrot.lane.b32.xlu1 %v6454_v57, %s7213_s24 }
 0x6a8   :  { %v6456_v58 = vpop.eup %6455 }
 0x6aa   :  { %1531 = vrot.lane.b32.xlu1 %v6456_v58, %s7213_s24 }
 0x713   :  { %v1526_v59 = vpop.permute.xlu0 %1525 }
 0x714   :  { %v1537_v60 = vmul.f32 %v1526_v59, %v7566_v15 }
 0x716   :  { %1545 = vrot.lane.b32.xlu0 %v1537_v60, %s7214_s26 }
 0x717   :  { %v1530_v62 = vpop.permute.xlu0 %1529 }
 0x718   :  { %v1539_v63 = vmul.f32 %v1530_v62, %v7576_v20  ;;  %v1528_v5 = vpop.permute.xlu1 %1527 }
 0x719   :  { %v1538_v6 = vmul.f32 %v1528_v5, %v7572_v19 }
 0x71a   :  { %1549 = vrot.lane.b32.xlu0 %v1539_v63, %s7214_s26 }
 0x71b   :  { %1547 = vrot.lane.b32.xlu1 %v1538_v6, %s7214_s26 }
 0x71c   :  { %v1532_v7 = vpop.permute.xlu1 %1531 }
 0x71d   :  { %v1540_v8 = vmul.f32 %v1532_v7, %v7584_v24 }
 0x71e   :  { %1101 = vperm.xlu0 %6407, %v7527_v34  }
 0x71f   :  { %1551 = vrot.lane.b32.xlu1 %v1540_v8, %s7214_s26 }
 0x722   :  { %1113 = vperm.xlu0 %6407, %v7538_v39  }
 0x723   :  { %1105 = vperm.xlu1 %6408, %v7534_v36  }
 0x727   :  { %1109 = vperm.xlu1 %6408, %v7530_v35  }
 0x788   :  { %v1546_v9 = vpop.permute.xlu0 %1545 }
 0x789   :  { %1557 = vst.msk [vmem:[#allocation2] sm:$0xff] %vm160_vm0, %v1546_v9  ;;  %5881 = vmatprep.mubr.msk.f32.mxu1 %vm160_vm0, %v1546_v9 }
 0x78c   :  { %v1550_v10 = vpop.permute.xlu0 %1549 }
 0x78d   :  { %1559 = vst.msk [vmem:[#allocation2 + $0x10] sm:$0xff] %vm160_vm0, %v1550_v10  ;;  %v1548_v12 = vpop.permute.xlu1 %1547 }
 0x78e   :  { %1558 = vst.msk [vmem:[#allocation2 + $0x8] sm:$0xff] %vm160_vm0, %v1548_v12  ;;  %5882 = vmatmul.mubr.msk.f32.vlgmr.msra.gmra.mrb[14].mxu1 %vm160_vm0, %v1548_v12 }
 0x78f   :  { %5884 = vmatprep.mubr.msk.f32.mxu1 %vm160_vm0, %v1550_v10  ;;  %6196 = vmatpush3.bf16.msra.mxu1 %v7491_v61 }
 0x790   :  { %6198 = vmatprep.subr.bf16.mxu1 %v7496_v3 }
 0x791   :  { %v1552_v13 = vpop.permute.xlu1 %1551 }
 0x792   :  { %1560 = vst.msk [vmem:[#allocation2 + $0x18] sm:$0xff] %vm160_vm0, %v1552_v13  ;;  %5885 = vmatmul.mubr.msk.f32.gmra.mrb[16].mxu1 %vm160_vm0, %v1552_v13 }
 0x793   :  { %6200 = vmatpush3.bf16.msra.mxu1 %v7496_v3 }
 0x794   :  { %6210 = vmatprep.subr.bf16.mxu1 %v7491_v61 }
 0x79d   :  { %v1102_v14 = vpop.permute.xlu0 %1101 }
 0x79e   :  { %v1116_v17 = vmul.f32 %v7545_v2, %v1102_v14 }
 0x7a0   :  { %v1120_v24 = vadd.f32 %v7550_v41, %v1116_v17 }
 0x7a1   :  { %v1114_v18 = vpop.permute.xlu0 %1113 }
 0x7a2   :  { %v1106_v15 = vpop.permute.xlu1 %1105  ;;  %v1119_v20 = vmul.f32 %v7545_v2, %v1114_v18 }
 0x7a3   :  { %v1117_v16 = vmul.f32 %v7545_v2, %v1106_v15 }
 0x7a4   :  { %v1123_v29 = vadd.f32 %v7550_v41, %v1119_v20 }
 0x7a5   :  { %v1121_v21 = vadd.f32 %v7550_v41, %v1117_v16 }
 0x7a6   :  { %v1110_v19 = vpop.permute.xlu1 %1109 }
 0x7a7   :  { %v1118_v22 = vmul.f32 %v7545_v2, %v1110_v19 }
 0x7a9   :  { %v1122_v32 = vadd.f32 %v7550_v41, %v1118_v22 }
 0x861   :  { %v5883_v23 = vpop.f32.mrb[14].mxu1 }
 0x862   :  { %v1659_v25 = vadd.f32 %v5883_v23, %v1121_v21  ;;  %v1639_v26 = vpop.f32.mrb[15].mxu1 }
 0x863   :  { %v1658_v27 = vadd.f32 %v1639_v26, %v1120_v24 }
 0x864   :  { %v5407_v28 = vmul.f32 -1.442695, %v1659_v25 }
 0x865   :  { %v5406_v30 = vmul.f32 -1.442695, %v1658_v27  ;;  %v5886_v31 = vpop.f32.mrb[16].mxu1 }
 0x866   :  { %6457 = vpow2.f32 %v5407_v28  ;;  %v1661_v33 = vadd.f32 %v5886_v31, %v1123_v29  ;;  %v1649_v37 = vpop.f32.mrb[17].mxu1 }
 0x867   :  { %6459 = vpow2.f32 %v5406_v30  ;;  %v1660_v38 = vadd.f32 %v1649_v37, %v1122_v32 }
 0x868   :  { %v5409_v40 = vmul.f32 -1.442695, %v1661_v33 }
 0x869   :  { %v5408_v0 = vmul.f32 -1.442695, %v1660_v38 }
 0x86a   :  { %6461 = vpow2.f32 %v5409_v40 }
 0x86b   :  { %6463 = vpow2.f32 %v5408_v0 }
 0x86c   :  { %6465 = vtanh.f32 %v1659_v25 }
 0x86d   :  { %6467 = vtanh.f32 %v1658_v27 }
 0x870   :  { %v6458_v1 = vpop.eup %6457 }
 0x871   :  { %v6460_v4 = vpop.eup %6459  ;;  %v1675_v42 = vadd.f32 1.0, %v6458_v1 }
 0x872   :  { %v1674_v43 = vadd.f32 1.0, %v6460_v4 }
 0x873   :  { %6469 = vrcp.f32 %v1675_v42 }
 0x874   :  { %v6462_v45 = vpop.eup %6461  ;;  %6471 = vrcp.f32 %v1674_v43 }
 0x875   :  { %v6464_v46 = vpop.eup %6463  ;;  %v1677_v47 = vadd.f32 1.0, %v6462_v45  ;;  %6473 = vtanh.f32 %v1661_v33 }
 0x876   :  { %v1676_v48 = vadd.f32 1.0, %v6464_v46  ;;  %6475 = vtanh.f32 %v1660_v38  ;;  %v6466_v51 = vpop.eup %6465 }
 0x877   :  { %6477 = vrcp.f32 %v1677_v47  ;;  %v6468_v52 = vpop.eup %6467 }
 0x878   :  { %6479 = vrcp.f32 %v1676_v48 }
 0x87d   :  { %v6470_v54 = vpop.eup %6469 }
 0x87e   :  { %v6472_v55 = vpop.eup %6471  ;;  %v1691_v56 = vsel %vm7560_vm5, %v6466_v51, %v6470_v54 }
 0x87f   :  { %v6474_v57 = vpop.eup %6473  ;;  %1704 = vrot.lane.b32.xlu0 %v1691_v56, %s7213_s24  ;;  %v1690_v58 = vsel %vm7560_vm5, %v6468_v52, %v6472_v55  ;;  %v1695_v15 = vmul.f32 %v1691_v56, %v7608_v50 }
 0x880   :  { %v6476_v59 = vpop.eup %6475  ;;  %1702 = vrot.lane.b32.xlu1 %v1690_v58, %s7213_s24  ;;  %v1694_v17 = vmul.f32 %v1690_v58, %v7601_v44  ;;  %v7216_v44 = vmov 2  }
 0x881   :  { %v6478_v60 = vpop.eup %6477  ;;  %6410 = vset.pattern.permute.xlu0 %v7216_v44  ;;  %6409 = vset.pattern.permute.xlu1 %v7216_v44 }
 0x882   :  { %v6480_v62 = vpop.eup %6479  ;;  %v1693_v63 = vsel %vm7560_vm5, %v6474_v57, %v6478_v60 }
 0x883   :  { %1708 = vrot.lane.b32.xlu0 %v1693_v63, %s7213_s24  ;;  %v1692_v5 = vsel %vm7560_vm5, %v6476_v59, %v6480_v62  ;;  %v1697_v21 = vmul.f32 %v1693_v63, %v7613_v53 }
 0x884   :  { %1706 = vrot.lane.b32.xlu1 %v1692_v5, %s7213_s24  ;;  %v1696_v23 = vmul.f32 %v1692_v5, %v7606_v49 }
 0x8f1   :  { %v1705_v6 = vpop.permute.xlu0 %1704 }
 0x8f2   :  { %v1715_v7 = vmul.f32 %v1705_v6, %v1691_v56  ;;  %v1703_v8 = vpop.permute.xlu1 %1702 }
 0x8f3   :  { %v1714_v9 = vmul.f32 %v1703_v8, %v1690_v58 }
 0x8f4   :  { %1724 = vrot.lane.b32.xlu0 %v1715_v7, %s7214_s26 }
 0x8f5   :  { %v1709_v10 = vpop.permute.xlu0 %1708  ;;  %1722 = vrot.lane.b32.xlu1 %v1714_v9, %s7214_s26 }
 0x8f6   :  { %v1717_v12 = vmul.f32 %v1709_v10, %v1693_v63  ;;  %v1707_v13 = vpop.permute.xlu1 %1706 }
 0x8f7   :  { %v1716_v14 = vmul.f32 %v1707_v13, %v1692_v5 }
 0x8f8   :  { %1728 = vrot.lane.b32.xlu0 %v1717_v12, %s7214_s26 }
 0x8f9   :  { %1726 = vrot.lane.b32.xlu1 %v1716_v14, %s7214_s26 }
 0x966   :  { %v1725_v16 = vpop.permute.xlu0 %1724 }
 0x967   :  { %v7670_v18 = vadd.f32 %v1725_v16, %v1695_v15  ;;  %v1723_v19 = vpop.permute.xlu1 %1722 }
 0x968   :  { %v7672_v20 = vadd.f32 %v1723_v19, %v1694_v17 }
 0x969   :  { %6481 = vtanh.f32 %v7670_v18 }
 0x96a   :  { %6483 = vtanh.f32 %v7672_v20  ;;  %v1729_v22 = vpop.permute.xlu0 %1728 }
 0x96b   :  { %v7678_v24 = vadd.f32 %v1729_v22, %v1697_v21  ;;  %v1727_v50 = vpop.permute.xlu1 %1726 }
 0x96c   :  { %v7680_v25 = vadd.f32 %v1727_v50, %v1696_v23 }
 0x96d   :  { %6485 = vtanh.f32 %v7678_v24 }
 0x96e   :  { %6487 = vtanh.f32 %v7680_v25 }
 0x973   :  { %v6482_v26 = vpop.eup %6481 }
 0x974   :  { %v6484_v27 = vpop.eup %6483  ;;  %1748 = vrot.lane.b32.xlu0 %v6482_v26, %s7213_s24 }
 0x975   :  { %1746 = vrot.lane.b32.xlu1 %v6484_v27, %s7213_s24 }
 0x977   :  { %v6486_v53 = vpop.eup %6485 }
 0x978   :  { %v6488_v49 = vpop.eup %6487  ;;  %1752 = vrot.lane.b32.xlu0 %v6486_v53, %s7213_s24 }
 0x979   :  { %1750 = vrot.lane.b32.xlu1 %v6488_v49, %s7213_s24 }
 0x9e6   :  { %v1749_v28 = vpop.permute.xlu0 %1748 }
 0x9e7   :  { %v1759_v29 = vmul.f32 %v1749_v28, %v1691_v56  ;;  %v1747_v30 = vpop.permute.xlu1 %1746 }
 0x9e8   :  { %v1758_v31 = vmul.f32 %v1747_v30, %v1690_v58 }
 0x9e9   :  { %1768 = vrot.lane.b32.xlu0 %v1759_v29, %s7214_s26 }
 0x9ea   :  { %v1753_v32 = vpop.permute.xlu0 %1752  ;;  %1766 = vrot.lane.b32.xlu1 %v1758_v31, %s7214_s26 }
 0x9eb   :  { %v1761_v33 = vmul.f32 %v1753_v32, %v1693_v63  ;;  %v1751_v37 = vpop.permute.xlu1 %1750 }
 0x9ec   :  { %v1760_v38 = vmul.f32 %v1751_v37, %v1692_v5 }
 0x9ed   :  { %1772 = vrot.lane.b32.xlu0 %v1761_v33, %s7214_s26 }
 0x9ee   :  { %1770 = vrot.lane.b32.xlu1 %v1760_v38, %s7214_s26 }
 0x9f1   :  { %1134 = vperm.xlu0 %6410, %v7534_v36  }
 0x9f2   :  { %1130 = vperm.xlu1 %6409, %v7527_v34  }
 0x9f6   :  { %1138 = vperm.xlu1 %6409, %v7530_v35  }
 0x9fa   :  { %1142 = vperm.xlu1 %6409, %v7538_v39  }
 0xa5b   :  { %v1769_v40 = vpop.permute.xlu0 %1768 }
 0xa5c   :  { %1780 = vst.msk [vmem:[#allocation2 + $0x28] sm:$0xff] %vm160_vm0, %v1769_v40  ;;  %v1767_v0 = vpop.permute.xlu1 %1766 }
 0xa5d   :  { %1779 = vst.msk [vmem:[#allocation2 + $0x20] sm:$0xff] %vm160_vm0, %v1767_v0  ;;  %5895 = vmatprep.mubr.msk.f32.mxu0 %vm160_vm0, %v1767_v0 }
 0xa5e   :  { %5896 = vmatmul.mubr.msk.f32.vlgmr.msra.gmra.mrb[12].mxu0 %vm160_vm0, %v1769_v40 }
 0xa5f   :  { %v1773_v1 = vpop.permute.xlu0 %1772  ;;  %6204 = vmatpush3.bf16.msra.mxu0 %v7491_v61 }
 0xa60   :  { %1782 = vst.msk [vmem:[#allocation2 + $0x38] sm:$0xff] %vm160_vm0, %v1773_v1  ;;  %v1771_v4 = vpop.permute.xlu1 %1770  ;;  %6206 = vmatprep.subr.bf16.mxu0 %v7496_v3 }
 0xa61   :  { %1781 = vst.msk [vmem:[#allocation2 + $0x30] sm:$0xff] %vm160_vm0, %v1771_v4  ;;  %5898 = vmatprep.mubr.msk.f32.mxu0 %vm160_vm0, %v1771_v4 }
 0xa62   :  { %5899 = vmatmul.mubr.msk.f32.gmra.mrb[14].mxu0 %vm160_vm0, %v1773_v1 }
 0xa63   :  { %6208 = vmatpush3.bf16.msra.mxu0 %v7496_v3 }
 0xa64   :  { %6218 = vmatprep.subr.bf16.mxu0 %v7491_v61 }
 0xa70   :  { %v1135_v45 = vpop.permute.xlu0 %1134 }
 0xa71   :  { %v1131_v42 = vpop.permute.xlu1 %1130  ;;  %v1146_v46 = vmul.f32 %v7545_v2, %v1135_v45 }
 0xa72   :  { %v1145_v47 = vmul.f32 %v7545_v2, %v1131_v42 }
 0xa73   :  { %v1150_v52 = vadd.f32 %v7550_v41, %v1146_v46 }
 0xa74   :  { %v1149_v56 = vadd.f32 %v7550_v41, %v1145_v47 }
 0xa75   :  { %v1139_v43 = vpop.permute.xlu1 %1138 }
 0xa76   :  { %v1147_v54 = vmul.f32 %v7545_v2, %v1139_v43 }
 0xa78   :  { %v1151_v6 = vadd.f32 %v7550_v41, %v1147_v54 }
 0xa79   :  { %v1143_v48 = vpop.permute.xlu1 %1142 }
 0xa7a   :  { %v1148_v51 = vmul.f32 %v7545_v2, %v1143_v48 }
 0xa7c   :  { %v1152_v62 = vadd.f32 %v7550_v41, %v1148_v51 }
 0xb31   :  { %v5897_v55 = vpop.f32.mrb[12].mxu0 }
 0xb32   :  { %v1881_v57 = vadd.f32 %v5897_v55, %v1150_v52  ;;  %v1861_v58 = vpop.f32.mrb[13].mxu0 }
 0xb33   :  { %v1880_v59 = vadd.f32 %v1861_v58, %v1149_v56 }
 0xb34   :  { %v5415_v60 = vmul.f32 -1.442695, %v1881_v57 }
 0xb35   :  { %v5414_v63 = vmul.f32 -1.442695, %v1880_v59  ;;  %v5900_v5 = vpop.f32.mrb[14].mxu0 }
 0xb36   :  { %6489 = vpow2.f32 %v5415_v60  ;;  %v1883_v7 = vadd.f32 %v5900_v5, %v1152_v62  ;;  %v1871_v8 = vpop.f32.mrb[15].mxu0 }
 0xb37   :  { %6491 = vpow2.f32 %v5414_v63  ;;  %v1882_v9 = vadd.f32 %v1871_v8, %v1151_v6 }
 0xb38   :  { %v5417_v10 = vmul.f32 -1.442695, %v1883_v7 }
 0xb39   :  { %v5416_v12 = vmul.f32 -1.442695, %v1882_v9 }
 0xb3a   :  { %6493 = vpow2.f32 %v5417_v10 }
 0xb3b   :  { %6495 = vpow2.f32 %v5416_v12 }
 0xb3c   :  { %6497 = vtanh.f32 %v1881_v57 }
 0xb3d   :  { %6499 = vtanh.f32 %v1880_v59 }
 0xb40   :  { %v6490_v13 = vpop.eup %6489 }
 0xb41   :  { %v6492_v14 = vpop.eup %6491  ;;  %v1897_v15 = vadd.f32 1.0, %v6490_v13 }
 0xb42   :  { %v1896_v16 = vadd.f32 1.0, %v6492_v14 }
 0xb43   :  { %6501 = vrcp.f32 %v1897_v15 }
 0xb44   :  { %v6494_v17 = vpop.eup %6493  ;;  %6503 = vrcp.f32 %v1896_v16 }
 0xb45   :  { %v6496_v19 = vpop.eup %6495  ;;  %v1899_v21 = vadd.f32 1.0, %v6494_v17  ;;  %6505 = vtanh.f32 %v1883_v7 }
 0xb46   :  { %v1898_v22 = vadd.f32 1.0, %v6496_v19  ;;  %6507 = vtanh.f32 %v1882_v9  ;;  %v6498_v23 = vpop.eup %6497 }
 0xb47   :  { %6509 = vrcp.f32 %v1899_v21  ;;  %v6500_v50 = vpop.eup %6499 }
 0xb48   :  { %6511 = vrcp.f32 %v1898_v22 }
 0xb4d   :  { %v6502_v44 = vpop.eup %6501 }
 0xb4e   :  { %v6504_v26 = vpop.eup %6503  ;;  %v1913_v27 = vsel %vm7560_vm5, %v6498_v23, %v6502_v44 }
 0xb4f   :  { %v6506_v53 = vpop.eup %6505  ;;  %1926 = vrot.lane.b32.xlu1 %v1913_v27, %s7213_s24  ;;  %v1912_v49 = vsel %vm7560_vm5, %v6500_v50, %v6504_v26  ;;  %v1917_v43 = vmul.f32 %v1913_v27, %v7670_v18 }
 0xb50   :  { %v6508_v28 = vpop.eup %6507  ;;  %1924 = vrot.lane.b32.xlu0 %v1912_v49, %s7213_s24  ;;  %v1916_v46 = vmul.f32 %v1912_v49, %v7672_v20  ;;  %v7217_v20 = vmov 3  }
 0xb51   :  { %v6510_v29 = vpop.eup %6509  ;;  %6412 = vset.pattern.permute.xlu1 %v7217_v20  ;;  %6411 = vset.pattern.permute.xlu0 %v7217_v20 }
 0xb52   :  { %v6512_v30 = vpop.eup %6511  ;;  %v1915_v31 = vsel %vm7560_vm5, %v6506_v53, %v6510_v29 }
 0xb53   :  { %1930 = vrot.lane.b32.xlu1 %v1915_v31, %s7213_s24  ;;  %v1914_v32 = vsel %vm7560_vm5, %v6508_v28, %v6512_v30  ;;  %v1919_v52 = vmul.f32 %v1915_v31, %v7678_v24 }
 0xb54   :  { %1928 = vrot.lane.b32.xlu0 %v1914_v32, %s7213_s24  ;;  %v1918_v55 = vmul.f32 %v1914_v32, %v7680_v25 }
 0xbc1   :  { %v1927_v33 = vpop.permute.xlu1 %1926 }
 0xbc2   :  { %v1937_v37 = vmul.f32 %v1927_v33, %v1913_v27  ;;  %v1925_v38 = vpop.permute.xlu0 %1924 }
 0xbc3   :  { %v1936_v40 = vmul.f32 %v1925_v38, %v1912_v49 }
 0xbc4   :  { %1946 = vrot.lane.b32.xlu1 %v1937_v37, %s7214_s26 }
 0xbc5   :  { %1944 = vrot.lane.b32.xlu0 %v1936_v40, %s7214_s26  ;;  %v1931_v0 = vpop.permute.xlu1 %1930 }
 0xbc6   :  { %v1939_v1 = vmul.f32 %v1931_v0, %v1915_v31  ;;  %v1929_v4 = vpop.permute.xlu0 %1928 }
 0xbc7   :  { %v1938_v42 = vmul.f32 %v1929_v4, %v1914_v32 }
 0xbc8   :  { %1950 = vrot.lane.b32.xlu1 %v1939_v1, %s7214_s26 }
 0xbc9   :  { %1948 = vrot.lane.b32.xlu0 %v1938_v42, %s7214_s26 }
 0xc36   :  { %v1947_v45 = vpop.permute.xlu1 %1946 }
 0xc37   :  { %v7734_v47 = vadd.f32 %v1947_v45, %v1917_v43  ;;  %v1945_v48 = vpop.permute.xlu0 %1944 }
 0xc38   :  { %v7736_v51 = vadd.f32 %v1945_v48, %v1916_v46 }
 0xc39   :  { %6513 = vtanh.f32 %v7734_v47 }
 0xc3a   :  { %6515 = vtanh.f32 %v7736_v51  ;;  %v1951_v54 = vpop.permute.xlu1 %1950 }
 0xc3b   :  { %v7742_v56 = vadd.f32 %v1951_v54, %v1919_v52  ;;  %v1949_v18 = vpop.permute.xlu0 %1948 }
 0xc3c   :  { %v7744_v57 = vadd.f32 %v1949_v18, %v1918_v55 }
 0xc3d   :  { %6517 = vtanh.f32 %v7742_v56 }
 0xc3e   :  { %6519 = vtanh.f32 %v7744_v57 }
 0xc43   :  { %v6514_v58 = vpop.eup %6513 }
 0xc44   :  { %v6516_v59 = vpop.eup %6515  ;;  %1970 = vrot.lane.b32.xlu1 %v6514_v58, %s7213_s24 }
 0xc45   :  { %1968 = vrot.lane.b32.xlu0 %v6516_v59, %s7213_s24 }
 0xc47   :  { %v6518_v24 = vpop.eup %6517 }
 0xc48   :  { %v6520_v25 = vpop.eup %6519  ;;  %1974 = vrot.lane.b32.xlu1 %v6518_v24, %s7213_s24 }
 0xc49   :  { %1972 = vrot.lane.b32.xlu0 %v6520_v25, %s7213_s24 }
 0xcb6   :  { %v1971_v60 = vpop.permute.xlu1 %1970 }
 0xcb7   :  { %v1981_v62 = vmul.f32 %v1971_v60, %v1913_v27  ;;  %v1969_v63 = vpop.permute.xlu0 %1968 }
 0xcb8   :  { %v1980_v5 = vmul.f32 %v1969_v63, %v1912_v49 }
 0xcb9   :  { %1990 = vrot.lane.b32.xlu1 %v1981_v62, %s7214_s26 }
 0xcba   :  { %1988 = vrot.lane.b32.xlu0 %v1980_v5, %s7214_s26  ;;  %v1975_v6 = vpop.permute.xlu1 %1974 }
 0xcbb   :  { %v1983_v7 = vmul.f32 %v1975_v6, %v1915_v31  ;;  %v1973_v8 = vpop.permute.xlu0 %1972 }
 0xcbc   :  { %v1982_v9 = vmul.f32 %v1973_v8, %v1914_v32 }
 0xcbd   :  { %1994 = vrot.lane.b32.xlu1 %v1983_v7, %s7214_s26 }
 0xcbe   :  { %1992 = vrot.lane.b32.xlu0 %v1982_v9, %s7214_s26 }
 0xcc1   :  { %1163 = vperm.xlu1 %6412, %v7534_v36  }
 0xcc2   :  { %1159 = vperm.xlu0 %6411, %v7527_v34  }
 0xcc5   :  { %1167 = vperm.xlu1 %6412, %v7530_v35  }
 0xcc6   :  { %1171 = vperm.xlu0 %6411, %v7538_v39  }
 0xd2b   :  { %v1991_v10 = vpop.permute.xlu1 %1990 }
 0xd2c   :  { %2002 = vst.msk [vmem:[#allocation2 + $0x48] sm:$0xff] %vm160_vm0, %v1991_v10  ;;  %v1989_v12 = vpop.permute.xlu0 %1988 }
 0xd2d   :  { %2001 = vst.msk [vmem:[#allocation2 + $0x40] sm:$0xff] %vm160_vm0, %v1989_v12  ;;  %5909 = vmatprep.mubr.msk.f32.mxu1 %vm160_vm0, %v1989_v12 }
 0xd2e   :  { %5910 = vmatmul.mubr.msk.f32.vlgmr.msra.gmra.mrb[18].mxu1 %vm160_vm0, %v1991_v10 }
 0xd2f   :  { %v1995_v13 = vpop.permute.xlu1 %1994  ;;  %6212 = vmatpush3.bf16.msra.mxu1 %v7491_v61 }
 0xd30   :  { %2004 = vst.msk [vmem:[#allocation2 + $0x58] sm:$0xff] %vm160_vm0, %v1995_v13  ;;  %v1993_v14 = vpop.permute.xlu0 %1992  ;;  %6214 = vmatprep.subr.bf16.mxu1 %v7496_v3 }
 0xd31   :  { %2003 = vst.msk [vmem:[#allocation2 + $0x50] sm:$0xff] %vm160_vm0, %v1993_v14  ;;  %5912 = vmatprep.mubr.msk.f32.mxu1 %vm160_vm0, %v1993_v14 }
 0xd32   :  { %5913 = vmatmul.mubr.msk.f32.gmra.mrb[20].mxu1 %vm160_vm0, %v1995_v13 }
 0xd33   :  { %6216 = vmatpush3.bf16.msra.mxu1 %v7496_v3 }
 0xd34   :  { %6226 = vmatprep.subr.bf16.mxu1 %v7491_v61 }
 0xd40   :  { %v1164_v16 = vpop.permute.xlu1 %1163 }
 0xd41   :  { %v1160_v15 = vpop.permute.xlu0 %1159  ;;  %v1175_v17 = vmul.f32 %v7545_v2, %v1164_v16 }
 0xd42   :  { %v1174_v19 = vmul.f32 %v7545_v2, %v1160_v15 }
 0xd43   :  { %v1179_v50 = vadd.f32 %v7550_v41, %v1175_v17 }
 0xd44   :  { %v1168_v22 = vpop.permute.xlu1 %1167  ;;  %v1178_v27 = vadd.f32 %v7550_v41, %v1174_v19 }
 0xd45   :  { %v1172_v21 = vpop.permute.xlu0 %1171  ;;  %v1176_v44 = vmul.f32 %v7545_v2, %v1168_v22 }
 0xd46   :  { %v1177_v23 = vmul.f32 %v7545_v2, %v1172_v21 }
 0xd47   :  { %v1180_v33 = vadd.f32 %v7550_v41, %v1176_v44 }
 0xd48   :  { %v1181_v30 = vadd.f32 %v7550_v41, %v1177_v23 }
 0xe01   :  { %v5911_v26 = vpop.f32.mrb[18].mxu1 }
 0xe02   :  { %v2103_v53 = vadd.f32 %v5911_v26, %v1179_v50  ;;  %v2083_v49 = vpop.f32.mrb[19].mxu1 }
 0xe03   :  { %v2102_v28 = vadd.f32 %v2083_v49, %v1178_v27 }
 0xe04   :  { %v5423_v29 = vmul.f32 -1.442695, %v2103_v53 }
 0xe05   :  { %v5422_v31 = vmul.f32 -1.442695, %v2102_v28  ;;  %v5914_v32 = vpop.f32.mrb[20].mxu1 }
 0xe06   :  { %6521 = vpow2.f32 %v5423_v29  ;;  %v2105_v37 = vadd.f32 %v5914_v32, %v1181_v30  ;;  %v2093_v38 = vpop.f32.mrb[21].mxu1 }
 0xe07   :  { %6523 = vpow2.f32 %v5422_v31  ;;  %v2104_v40 = vadd.f32 %v2093_v38, %v1180_v33 }
 0xe08   :  { %v5425_v0 = vmul.f32 -1.442695, %v2105_v37 }
 0xe09   :  { %v5424_v2 = vmul.f32 -1.442695, %v2104_v40 }
 0xe0a   :  { %6525 = vpow2.f32 %v5425_v0 }
 0xe0b   :  { %6527 = vpow2.f32 %v5424_v2 }
 0xe0c   :  { %6529 = vtanh.f32 %v2103_v53 }
 0xe0d   :  { %6531 = vtanh.f32 %v2102_v28 }
 0xe10   :  { %v6522_v1 = vpop.eup %6521 }
 0xe11   :  { %v6524_v4 = vpop.eup %6523  ;;  %v2119_v42 = vadd.f32 1.0, %v6522_v1 }
 0xe12   :  { %v2118_v43 = vadd.f32 1.0, %v6524_v4 }
 0xe13   :  { %6533 = vrcp.f32 %v2119_v42 }
 0xe14   :  { %v6526_v45 = vpop.eup %6525  ;;  %6535 = vrcp.f32 %v2118_v43  ;;  %v7838_v43 = vld [vmem:[%s8812_s9] ss:$0 sm:$0xff] }
 0xe15   :  { %v6528_v46 = vpop.eup %6527  ;;  %v2121_v41 = vadd.f32 1.0, %v6526_v45  ;;  %6537 = vtanh.f32 %v2105_v37 }
 0xe16   :  { %v2120_v48 = vadd.f32 1.0, %v6528_v46  ;;  %6539 = vtanh.f32 %v2104_v40  ;;  %v6530_v52 = vpop.eup %6529 }
 0xe17   :  { %6541 = vrcp.f32 %v2121_v41  ;;  %v6532_v54 = vpop.eup %6531 }
 0xe18   :  { %6543 = vrcp.f32 %v2120_v48 }
 0xe1d   :  { %v6534_v55 = vpop.eup %6533 }
 0xe1e   :  { %v6536_v18 = vpop.eup %6535  ;;  %v2135_v20 = vsel %vm7560_vm5, %v6530_v52, %v6534_v55  ;;  %v7846_v52 = vld [vmem:[%s8815_s12] ss:$0 sm:$0xff] }
 0xe1f   :  { %v6538_v58 = vpop.eup %6537  ;;  %2148 = vrot.lane.b32.xlu0 %v2135_v20, %s7213_s24  ;;  %v2134_v59 = vsel %vm7560_vm5, %v6532_v54, %v6536_v18  ;;  %v2139_v14 = vmul.f32 %v2135_v20, %v7734_v47 }
 0xe20   :  { %v6540_v24 = vpop.eup %6539  ;;  %2146 = vrot.lane.b32.xlu1 %v2134_v59, %s7213_s24  ;;  %v2138_v16 = vmul.f32 %v2134_v59, %v7736_v51  ;;  %v7218_v51 = vmov 4  }
 0xe21   :  { %v6542_v25 = vpop.eup %6541  ;;  %6414 = vset.pattern.permute.xlu0 %v7218_v51  ;;  %6413 = vset.pattern.permute.xlu1 %v7218_v51 }
 0xe22   :  { %v6544_v60 = vpop.eup %6543  ;;  %v2137_v62 = vsel %vm7560_vm5, %v6538_v58, %v6542_v25 }
 0xe23   :  { %2152 = vrot.lane.b32.xlu0 %v2137_v62, %s7213_s24  ;;  %v2136_v63 = vsel %vm7560_vm5, %v6540_v24, %v6544_v60  ;;  %v2141_v22 = vmul.f32 %v2137_v62, %v7742_v56 }
 0xe24   :  { %2150 = vrot.lane.b32.xlu1 %v2136_v63, %s7213_s24  ;;  %v2140_v50 = vmul.f32 %v2136_v63, %v7744_v57 }
 0xe91   :  { %v2149_v5 = vpop.permute.xlu0 %2148 }
 0xe92   :  { %v2159_v6 = vmul.f32 %v2149_v5, %v2135_v20  ;;  %v2147_v7 = vpop.permute.xlu1 %2146 }
 0xe93   :  { %v2158_v8 = vmul.f32 %v2147_v7, %v2134_v59 }
 0xe94   :  { %2168 = vrot.lane.b32.xlu0 %v2159_v6, %s7214_s26 }
 0xe95   :  { %v2153_v9 = vpop.permute.xlu0 %2152  ;;  %2166 = vrot.lane.b32.xlu1 %v2158_v8, %s7214_s26 }
 0xe96   :  { %v2161_v10 = vmul.f32 %v2153_v9, %v2137_v62  ;;  %v2151_v12 = vpop.permute.xlu1 %2150 }
 0xe97   :  { %v2160_v13 = vmul.f32 %v2151_v12, %v2136_v63 }
 0xe98   :  { %2172 = vrot.lane.b32.xlu0 %v2161_v10, %s7214_s26 }
 0xe99   :  { %2170 = vrot.lane.b32.xlu1 %v2160_v13, %s7214_s26 }
 0xf06   :  { %v2169_v15 = vpop.permute.xlu0 %2168 }
 0xf07   :  { %v7798_v17 = vadd.f32 %v2169_v15, %v2139_v14  ;;  %v2167_v19 = vpop.permute.xlu1 %2166 }
 0xf08   :  { %v7800_v21 = vadd.f32 %v2167_v19, %v2138_v16 }
 0xf09   :  { %6545 = vtanh.f32 %v7798_v17 }
 0xf0a   :  { %6547 = vtanh.f32 %v7800_v21  ;;  %v2173_v23 = vpop.permute.xlu0 %2172 }
 0xf0b   :  { %v7806_v44 = vadd.f32 %v2173_v23, %v2141_v22  ;;  %v2171_v47 = vpop.permute.xlu1 %2170 }
 0xf0c   :  { %v7808_v26 = vadd.f32 %v2171_v47, %v2140_v50 }
 0xf0d   :  { %6549 = vtanh.f32 %v7806_v44 }
 0xf0e   :  { %6551 = vtanh.f32 %v7808_v26 }
 0xf13   :  { %v6546_v27 = vpop.eup %6545 }
 0xf14   :  { %v6548_v53 = vpop.eup %6547  ;;  %2192 = vrot.lane.b32.xlu0 %v6546_v27, %s7213_s24 }
 0xf15   :  { %2190 = vrot.lane.b32.xlu1 %v6548_v53, %s7213_s24 }
 0xf17   :  { %v6550_v56 = vpop.eup %6549 }
 0xf18   :  { %v6552_v57 = vpop.eup %6551  ;;  %2196 = vrot.lane.b32.xlu0 %v6550_v56, %s7213_s24 }
 0xf19   :  { %2194 = vrot.lane.b32.xlu1 %v6552_v57, %s7213_s24 }
 0xf86   :  { %v2193_v49 = vpop.permute.xlu0 %2192 }
 0xf87   :  { %v2203_v28 = vmul.f32 %v2193_v49, %v2135_v20  ;;  %v2191_v29 = vpop.permute.xlu1 %2190 }
 0xf88   :  { %v2202_v30 = vmul.f32 %v2191_v29, %v2134_v59 }
 0xf89   :  { %2212 = vrot.lane.b32.xlu0 %v2203_v28, %s7214_s26 }
 0xf8a   :  { %v2197_v31 = vpop.permute.xlu0 %2196  ;;  %2210 = vrot.lane.b32.xlu1 %v2202_v30, %s7214_s26 }
 0xf8b   :  { %v2205_v32 = vmul.f32 %v2197_v31, %v2137_v62  ;;  %v2195_v33 = vpop.permute.xlu1 %2194 }
 0xf8c   :  { %v2204_v37 = vmul.f32 %v2195_v33, %v2136_v63 }
 0xf8d   :  { %2216 = vrot.lane.b32.xlu0 %v2205_v32, %s7214_s26 }
 0xf8e   :  { %2214 = vrot.lane.b32.xlu1 %v2204_v37, %s7214_s26 }
 0xf91   :  { %1192 = vperm.xlu0 %6414, %v7534_v36  }
 0xf92   :  { %1188 = vperm.xlu1 %6413, %v7527_v34  }
 0xf96   :  { %1196 = vperm.xlu1 %6413, %v7530_v35  }
 0xf9a   :  { %1200 = vperm.xlu1 %6413, %v7538_v39  }
 0xffb   :  { %v2213_v38 = vpop.permute.xlu0 %2212 }
 0xffc   :  { %2224 = vst.msk [vmem:[#allocation2 + $0x68] sm:$0xff] %vm160_vm0, %v2213_v38  ;;  %v2211_v40 = vpop.permute.xlu1 %2210 }
 0xffd   :  { %2223 = vst.msk [vmem:[#allocation2 + $0x60] sm:$0xff] %vm160_vm0, %v2211_v40  ;;  %5923 = vmatprep.mubr.msk.f32.mxu0 %vm160_vm0, %v2211_v40 }
 0xffe   :  { %5924 = vmatmul.mubr.msk.f32.vlgmr.msra.gmra.mrb[16].mxu0 %vm160_vm0, %v2213_v38 }
 0xfff   :  { %v2217_v0 = vpop.permute.xlu0 %2216  ;;  %6220 = vmatpush3.bf16.msra.mxu0 %v7491_v61 }
0x1000   :  { %2226 = vst.msk [vmem:[#allocation2 + $0x78] sm:$0xff] %vm160_vm0, %v2217_v0  ;;  %v2215_v2 = vpop.permute.xlu1 %2214  ;;  %6222 = vmatprep.subr.bf16.mxu0 %v7496_v3 }
0x1001   :  { %2225 = vst.msk [vmem:[#allocation2 + $0x70] sm:$0xff] %vm160_vm0, %v2215_v2  ;;  %5926 = vmatprep.mubr.msk.f32.mxu0 %vm160_vm0, %v2215_v2 }
0x1002   :  { %5927 = vmatmul.mubr.msk.f32.gmra.mrb[18].mxu0 %vm160_vm0, %v2217_v0 }
0x1003   :  { %6224 = vmatpush3.bf16.msra.mxu0 %v7496_v3 }
0x1010   :  { %v1193_v42 = vpop.permute.xlu0 %1192 }
0x1011   :  { %v1189_v1 = vpop.permute.xlu1 %1188  ;;  %v1204_v45 = vmul.f32 %v7838_v43, %v1193_v42 }
0x1012   :  { %v1203_v46 = vmul.f32 %v7838_v43, %v1189_v1 }
0x1013   :  { %v1208_v54 = vadd.f32 %v7846_v52, %v1204_v45 }
0x1014   :  { %v1207_v20 = vadd.f32 %v7846_v52, %v1203_v46 }
0x1015   :  { %v1197_v4 = vpop.permute.xlu1 %1196 }
0x1016   :  { %v1205_v55 = vmul.f32 %v7838_v43, %v1197_v4 }
0x1018   :  { %v1209_v5 = vadd.f32 %v7846_v52, %v1205_v55 }
0x1019   :  { %v1201_v41 = vpop.permute.xlu1 %1200 }
0x101a   :  { %v1206_v48 = vmul.f32 %v7838_v43, %v1201_v41 }
0x101c   :  { %v1210_v60 = vadd.f32 %v7846_v52, %v1206_v48 }
0x10d1   :  { %v5925_v18 = vpop.f32.mrb[16].mxu0 }
0x10d2   :  { %v2325_v58 = vadd.f32 %v5925_v18, %v1208_v54  ;;  %v2305_v59 = vpop.f32.mrb[17].mxu0 }
0x10d3   :  { %v2324_v24 = vadd.f32 %v2305_v59, %v1207_v20 }
0x10d4   :  { %v5431_v25 = vmul.f32 -1.442695, %v2325_v58 }
0x10d5   :  { %v5430_v62 = vmul.f32 -1.442695, %v2324_v24  ;;  %v5928_v63 = vpop.f32.mrb[18].mxu0 }
0x10d6   :  { %6553 = vpow2.f32 %v5431_v25  ;;  %v2327_v6 = vadd.f32 %v5928_v63, %v1210_v60  ;;  %v2315_v7 = vpop.f32.mrb[19].mxu0 }
0x10d7   :  { %6555 = vpow2.f32 %v5430_v62  ;;  %v2326_v8 = vadd.f32 %v2315_v7, %v1209_v5 }
0x10d8   :  { %v5433_v9 = vmul.f32 -1.442695, %v2327_v6 }
0x10d9   :  { %v5432_v10 = vmul.f32 -1.442695, %v2326_v8 }
0x10da   :  { %6557 = vpow2.f32 %v5433_v9 }
0x10db   :  { %6559 = vpow2.f32 %v5432_v10 }
0x10dc   :  { %6561 = vtanh.f32 %v2325_v58 }
0x10dd   :  { %6563 = vtanh.f32 %v2324_v24 }
0x10e0   :  { %v6554_v12 = vpop.eup %6553 }
0x10e1   :  { %v6556_v13 = vpop.eup %6555  ;;  %v2341_v14 = vadd.f32 1.0, %v6554_v12 }
0x10e2   :  { %v2340_v15 = vadd.f32 1.0, %v6556_v13 }
0x10e3   :  { %6565 = vrcp.f32 %v2341_v14 }
0x10e4   :  { %v6558_v16 = vpop.eup %6557  ;;  %6567 = vrcp.f32 %v2340_v15 }
0x10e5   :  { %v6560_v19 = vpop.eup %6559  ;;  %v2343_v22 = vadd.f32 1.0, %v6558_v16  ;;  %6569 = vtanh.f32 %v2327_v6 }
0x10e6   :  { %v2342_v23 = vadd.f32 1.0, %v6560_v19  ;;  %6571 = vtanh.f32 %v2326_v8  ;;  %v6562_v50 = vpop.eup %6561 }
0x10e7   :  { %6573 = vrcp.f32 %v2343_v22  ;;  %v6564_v47 = vpop.eup %6563 }
0x10e8   :  { %6575 = vrcp.f32 %v2342_v23 }
0x10ed   :  { %v6566_v51 = vpop.eup %6565 }
0x10ee   :  { %v6568_v27 = vpop.eup %6567  ;;  %v2357_v53 = vsel %vm7560_vm5, %v6562_v50, %v6566_v51 }
0x10ef   :  { %v6570_v56 = vpop.eup %6569  ;;  %2370 = vrot.lane.b32.xlu1 %v2357_v53, %s7213_s24  ;;  %v2356_v57 = vsel %vm7560_vm5, %v6564_v47, %v6568_v27  ;;  %v2361_v4 = vmul.f32 %v2357_v53, %v7798_v17 }
0x10f0   :  { %v6572_v49 = vpop.eup %6571  ;;  %2368 = vrot.lane.b32.xlu0 %v2356_v57, %s7213_s24  ;;  %v2360_v45 = vmul.f32 %v2356_v57, %v7800_v21  ;;  %v7219_v21 = vmov 5  }
0x10f1   :  { %v6574_v28 = vpop.eup %6573  ;;  %6416 = vset.pattern.permute.xlu1 %v7219_v21  ;;  %6415 = vset.pattern.permute.xlu0 %v7219_v21 }
0x10f2   :  { %v6576_v29 = vpop.eup %6575  ;;  %v2359_v30 = vsel %vm7560_vm5, %v6570_v56, %v6574_v28 }
0x10f3   :  { %2374 = vrot.lane.b32.xlu1 %v2359_v30, %s7213_s24  ;;  %v2358_v31 = vsel %vm7560_vm5, %v6572_v49, %v6576_v29  ;;  %v2363_v54 = vmul.f32 %v2359_v30, %v7806_v44 }
0x10f4   :  { %2372 = vrot.lane.b32.xlu0 %v2358_v31, %s7213_s24  ;;  %v2362_v18 = vmul.f32 %v2358_v31, %v7808_v26 }
0x1161   :  { %v2371_v32 = vpop.permute.xlu1 %2370 }
0x1162   :  { %v2381_v33 = vmul.f32 %v2371_v32, %v2357_v53  ;;  %v2369_v37 = vpop.permute.xlu0 %2368 }
0x1163   :  { %v2380_v38 = vmul.f32 %v2369_v37, %v2356_v57 }
0x1164   :  { %2390 = vrot.lane.b32.xlu1 %v2381_v33, %s7214_s26 }
0x1165   :  { %2388 = vrot.lane.b32.xlu0 %v2380_v38, %s7214_s26  ;;  %v2375_v40 = vpop.permute.xlu1 %2374 }
0x1166   :  { %v2383_v0 = vmul.f32 %v2375_v40, %v2359_v30  ;;  %v2373_v2 = vpop.permute.xlu0 %2372 }
0x1167   :  { %v2382_v1 = vmul.f32 %v2373_v2, %v2358_v31 }
0x1168   :  { %2394 = vrot.lane.b32.xlu1 %v2383_v0, %s7214_s26 }
0x1169   :  { %2392 = vrot.lane.b32.xlu0 %v2382_v1, %s7214_s26 }
0x11d6   :  { %v2391_v42 = vpop.permute.xlu1 %2390 }
0x11d7   :  { %v7871_v46 = vadd.f32 %v2391_v42, %v2361_v4  ;;  %v2389_v41 = vpop.permute.xlu0 %2388 }
0x11d8   :  { %v7873_v48 = vadd.f32 %v2389_v41, %v2360_v45 }
0x11d9   :  { %6577 = vtanh.f32 %v7871_v46 }
0x11da   :  { %6579 = vtanh.f32 %v7873_v48  ;;  %v2395_v55 = vpop.permute.xlu1 %2394 }
0x11db   :  { %v7879_v20 = vadd.f32 %v2395_v55, %v2363_v54  ;;  %v2393_v17 = vpop.permute.xlu0 %2392 }
0x11dc   :  { %v7881_v58 = vadd.f32 %v2393_v17, %v2362_v18 }
0x11dd   :  { %6581 = vtanh.f32 %v7879_v20 }
0x11de   :  { %6583 = vtanh.f32 %v7881_v58 }
0x11e3   :  { %v6578_v59 = vpop.eup %6577 }
0x11e4   :  { %v6580_v24 = vpop.eup %6579  ;;  %2414 = vrot.lane.b32.xlu1 %v6578_v59, %s7213_s24 }
0x11e5   :  { %2412 = vrot.lane.b32.xlu0 %v6580_v24, %s7213_s24 }
0x11e7   :  { %v6582_v44 = vpop.eup %6581 }
0x11e8   :  { %v6584_v26 = vpop.eup %6583  ;;  %2418 = vrot.lane.b32.xlu1 %v6582_v44, %s7213_s24 }
0x11e9   :  { %2416 = vrot.lane.b32.xlu0 %v6584_v26, %s7213_s24 }
0x1256   :  { %v2415_v25 = vpop.permute.xlu1 %2414 }
0x1257   :  { %v2425_v60 = vmul.f32 %v2415_v25, %v2357_v53  ;;  %v2413_v62 = vpop.permute.xlu0 %2412 }
0x1258   :  { %v2424_v63 = vmul.f32 %v2413_v62, %v2356_v57 }
0x1259   :  { %2434 = vrot.lane.b32.xlu1 %v2425_v60, %s7214_s26 }
0x125a   :  { %2432 = vrot.lane.b32.xlu0 %v2424_v63, %s7214_s26  ;;  %v2419_v5 = vpop.permute.xlu1 %2418 }
0x125b   :  { %v2427_v6 = vmul.f32 %v2419_v5, %v2359_v30  ;;  %v2417_v7 = vpop.permute.xlu0 %2416 }
0x125c   :  { %v2426_v8 = vmul.f32 %v2417_v7, %v2358_v31 }
0x125d   :  { %2438 = vrot.lane.b32.xlu1 %v2427_v6, %s7214_s26 }
0x125e   :  { %2436 = vrot.lane.b32.xlu0 %v2426_v8, %s7214_s26 }
0x1261   :  { %1221 = vperm.xlu1 %6416, %v7534_v36  }
0x1262   :  { %1217 = vperm.xlu0 %6415, %v7527_v34  }
0x1265   :  { %1225 = vperm.xlu1 %6416, %v7530_v35  }
0x1266   :  { %1229 = vperm.xlu0 %6415, %v7538_v39  }
0x12cb   :  { %v2435_v9 = vpop.permute.xlu1 %2434 }
0x12cc   :  { %2446 = vst.msk [vmem:[#allocation2 + $0x88] sm:$0xff] %vm160_vm0, %v2435_v9  ;;  %v2433_v10 = vpop.permute.xlu0 %2432 }
0x12cd   :  { %2445 = vst.msk [vmem:[#allocation2 + $0x80] sm:$0xff] %vm160_vm0, %v2433_v10  ;;  %5937 = vmatprep.mubr.msk.f32.mxu1 %vm160_vm0, %v2433_v10 }
0x12ce   :  { %5938 = vmatmul.mubr.msk.f32.vlgmr.msra.gmra.mrb[22].mxu1 %vm160_vm0, %v2435_v9 }
0x12cf   :  { %v2439_v12 = vpop.permute.xlu1 %2438  ;;  %6228 = vmatpush3.bf16.msra.mxu1 %v7491_v61 }
0x12d0   :  { %2448 = vst.msk [vmem:[#allocation2 + $0x98] sm:$0xff] %vm160_vm0, %v2439_v12  ;;  %v2437_v13 = vpop.permute.xlu0 %2436  ;;  %6230 = vmatprep.subr.bf16.mxu1 %v7496_v3 }
0x12d1   :  { %2447 = vst.msk [vmem:[#allocation2 + $0x90] sm:$0xff] %vm160_vm0, %v2437_v13  ;;  %5940 = vmatprep.mubr.msk.f32.mxu1 %vm160_vm0, %v2437_v13 }
0x12d2   :  { %5941 = vmatmul.mubr.msk.f32.gmra.mrb[24].mxu1 %vm160_vm0, %v2439_v12 }
0x12d3   :  { %6232 = vmatpush3.bf16.msra.mxu1 %v7496_v3 }
0x12e0   :  { %v1222_v15 = vpop.permute.xlu1 %1221 }
0x12e1   :  { %v1218_v14 = vpop.permute.xlu0 %1217  ;;  %v1233_v16 = vmul.f32 %v7838_v43, %v1222_v15 }
0x12e2   :  { %v1232_v19 = vmul.f32 %v7838_v43, %v1218_v14 }
0x12e3   :  { %v1237_v50 = vadd.f32 %v7846_v52, %v1233_v16 }
0x12e4   :  { %v1226_v22 = vpop.permute.xlu1 %1225  ;;  %v1236_v27 = vadd.f32 %v7846_v52, %v1232_v19 }
0x12e5   :  { %v1230_v61 = vpop.permute.xlu0 %1229  ;;  %v1234_v47 = vmul.f32 %v7838_v43, %v1226_v22 }
0x12e6   :  { %v1235_v23 = vmul.f32 %v7838_v43, %v1230_v61 }
0x12e7   :  { %v1238_v30 = vadd.f32 %v7846_v52, %v1234_v47 }
0x12e8   :  { %v1239_v49 = vadd.f32 %v7846_v52, %v1235_v23 }
0x13a1   :  { %v5939_v51 = vpop.f32.mrb[22].mxu1 }
0x13a2   :  { %v2547_v53 = vadd.f32 %v5939_v51, %v1237_v50  ;;  %v2527_v56 = vpop.f32.mrb[23].mxu1 }
0x13a3   :  { %v2546_v3 = vadd.f32 %v2527_v56, %v1236_v27 }
0x13a4   :  { %v5439_v57 = vmul.f32 -1.442695, %v2547_v53 }
0x13a5   :  { %v5438_v28 = vmul.f32 -1.442695, %v2546_v3  ;;  %v5942_v29 = vpop.f32.mrb[24].mxu1 }
0x13a6   :  { %6585 = vpow2.f32 %v5439_v57  ;;  %v2549_v31 = vadd.f32 %v5942_v29, %v1239_v49  ;;  %v2537_v32 = vpop.f32.mrb[25].mxu1 }
0x13a7   :  { %6587 = vpow2.f32 %v5438_v28  ;;  %v2548_v33 = vadd.f32 %v2537_v32, %v1238_v30 }
0x13a8   :  { %v5441_v37 = vmul.f32 -1.442695, %v2549_v31 }
0x13a9   :  { %v5440_v38 = vmul.f32 -1.442695, %v2548_v33 }
0x13aa   :  { %6589 = vpow2.f32 %v5441_v37 }
0x13ab   :  { %6591 = vpow2.f32 %v5440_v38 }
0x13ac   :  { %6593 = vtanh.f32 %v2547_v53 }
0x13ad   :  { %6595 = vtanh.f32 %v2546_v3 }
0x13b0   :  { %v6586_v40 = vpop.eup %6585 }
0x13b1   :  { %v6588_v0 = vpop.eup %6587  ;;  %v2563_v2 = vadd.f32 1.0, %v6586_v40 }
0x13b2   :  { %v2562_v1 = vadd.f32 1.0, %v6588_v0 }
0x13b3   :  { %6597 = vrcp.f32 %v2563_v2 }
0x13b4   :  { %v6590_v4 = vpop.eup %6589  ;;  %6599 = vrcp.f32 %v2562_v1 }
0x13b5   :  { %v6592_v42 = vpop.eup %6591  ;;  %v2565_v45 = vadd.f32 1.0, %v6590_v4  ;;  %6601 = vtanh.f32 %v2549_v31 }
0x13b6   :  { %v2564_v41 = vadd.f32 1.0, %v6592_v42  ;;  %6603 = vtanh.f32 %v2548_v33  ;;  %v6594_v54 = vpop.eup %6593 }
0x13b7   :  { %6605 = vrcp.f32 %v2565_v45  ;;  %v6596_v55 = vpop.eup %6595 }
0x13b8   :  { %6607 = vrcp.f32 %v2564_v41 }
0x13bd   :  { %v6598_v18 = vpop.eup %6597 }
0x13be   :  { %v6600_v17 = vpop.eup %6599  ;;  %v2579_v21 = vsel %vm7560_vm5, %v6594_v54, %v6598_v18 }
0x13bf   :  { %v6602_v59 = vpop.eup %6601  ;;  %2592 = vrot.lane.b32.xlu0 %v2579_v21, %s7213_s24  ;;  %v2578_v24 = vsel %vm7560_vm5, %v6596_v55, %v6600_v17  ;;  %v2583_v13 = vmul.f32 %v2579_v21, %v7871_v46 }
0x13c0   :  { %v6604_v44 = vpop.eup %6603  ;;  %2590 = vrot.lane.b32.xlu1 %v2578_v24, %s7213_s24  ;;  %v2582_v15 = vmul.f32 %v2578_v24, %v7873_v48  ;;  %v7220_v48 = vmov 6  }
0x13c1   :  { %v6606_v26 = vpop.eup %6605  ;;  %6418 = vset.pattern.permute.xlu0 %v7220_v48  ;;  %6417 = vset.pattern.permute.xlu1 %v7220_v48 }
0x13c2   :  { %v6608_v25 = vpop.eup %6607  ;;  %v2581_v60 = vsel %vm7560_vm5, %v6602_v59, %v6606_v26 }
0x13c3   :  { %2596 = vrot.lane.b32.xlu0 %v2581_v60, %s7213_s24  ;;  %v2580_v62 = vsel %vm7560_vm5, %v6604_v44, %v6608_v25  ;;  %v2585_v22 = vmul.f32 %v2581_v60, %v7879_v20 }
0x13c4   :  { %2594 = vrot.lane.b32.xlu1 %v2580_v62, %s7213_s24  ;;  %v2584_v50 = vmul.f32 %v2580_v62, %v7881_v58 }
0x1431   :  { %v2593_v63 = vpop.permute.xlu0 %2592 }
0x1432   :  { %v2603_v5 = vmul.f32 %v2593_v63, %v2579_v21  ;;  %v2591_v6 = vpop.permute.xlu1 %2590 }
0x1433   :  { %v2602_v7 = vmul.f32 %v2591_v6, %v2578_v24 }
0x1434   :  { %2612 = vrot.lane.b32.xlu0 %v2603_v5, %s7214_s26 }
0x1435   :  { %v2597_v8 = vpop.permute.xlu0 %2596  ;;  %2610 = vrot.lane.b32.xlu1 %v2602_v7, %s7214_s26 }
0x1436   :  { %v2605_v9 = vmul.f32 %v2597_v8, %v2581_v60  ;;  %v2595_v10 = vpop.permute.xlu1 %2594 }
0x1437   :  { %v2604_v12 = vmul.f32 %v2595_v10, %v2580_v62 }
0x1438   :  { %2616 = vrot.lane.b32.xlu0 %v2605_v9, %s7214_s26 }
0x1439   :  { %2614 = vrot.lane.b32.xlu1 %v2604_v12, %s7214_s26 }
0x14a6   :  { %v2613_v14 = vpop.permute.xlu0 %2612 }
0x14a7   :  { %v7934_v16 = vadd.f32 %v2613_v14, %v2583_v13  ;;  %v2611_v19 = vpop.permute.xlu1 %2610 }
0x14a8   :  { %v7936_v61 = vadd.f32 %v2611_v19, %v2582_v15 }
0x14a9   :  { %6609 = vtanh.f32 %v7934_v16 }
0x14aa   :  { %6611 = vtanh.f32 %v7936_v61  ;;  %v2617_v23 = vpop.permute.xlu0 %2616 }
0x14ab   :  { %v7942_v47 = vadd.f32 %v2617_v23, %v2585_v22  ;;  %v2615_v46 = vpop.permute.xlu1 %2614 }
0x14ac   :  { %v7944_v51 = vadd.f32 %v2615_v46, %v2584_v50 }
0x14ad   :  { %6613 = vtanh.f32 %v7942_v47 }
0x14ae   :  { %6615 = vtanh.f32 %v7944_v51 }
0x14b3   :  { %v6610_v27 = vpop.eup %6609 }
0x14b4   :  { %v6612_v53 = vpop.eup %6611  ;;  %2636 = vrot.lane.b32.xlu0 %v6610_v27, %s7213_s24 }
0x14b5   :  { %2634 = vrot.lane.b32.xlu1 %v6612_v53, %s7213_s24 }
0x14b7   :  { %v6614_v20 = vpop.eup %6613 }
0x14b8   :  { %v6616_v58 = vpop.eup %6615  ;;  %2640 = vrot.lane.b32.xlu0 %v6614_v20, %s7213_s24 }
0x14b9   :  { %2638 = vrot.lane.b32.xlu1 %v6616_v58, %s7213_s24 }
0x1526   :  { %v2637_v56 = vpop.permute.xlu0 %2636 }
0x1527   :  { %v2647_v3 = vmul.f32 %v2637_v56, %v2579_v21  ;;  %v2635_v57 = vpop.permute.xlu1 %2634 }
0x1528   :  { %v2646_v49 = vmul.f32 %v2635_v57, %v2578_v24 }
0x1529   :  { %2656 = vrot.lane.b32.xlu0 %v2647_v3, %s7214_s26 }
0x152a   :  { %v2641_v28 = vpop.permute.xlu0 %2640  ;;  %2654 = vrot.lane.b32.xlu1 %v2646_v49, %s7214_s26 }
0x152b   :  { %v2649_v29 = vmul.f32 %v2641_v28, %v2581_v60  ;;  %v2639_v30 = vpop.permute.xlu1 %2638 }
0x152c   :  { %v2648_v31 = vmul.f32 %v2639_v30, %v2580_v62 }
0x152d   :  { %2660 = vrot.lane.b32.xlu0 %v2649_v29, %s7214_s26 }
0x152e   :  { %2658 = vrot.lane.b32.xlu1 %v2648_v31, %s7214_s26 }
0x1531   :  { %1250 = vperm.xlu0 %6418, %v7534_v36  }
0x1532   :  { %1246 = vperm.xlu1 %6417, %v7527_v34  }
0x1536   :  { %1254 = vperm.xlu1 %6417, %v7530_v35  }
0x153a   :  { %1258 = vperm.xlu1 %6417, %v7538_v39  }
0x159b   :  { %v2657_v32 = vpop.permute.xlu0 %2656 }
0x159c   :  { %2668 = vst.msk [vmem:[#allocation2 + $0xa8] sm:$0xff] %vm160_vm0, %v2657_v32  ;;  %v2655_v33 = vpop.permute.xlu1 %2654 }
0x159d   :  { %2667 = vst.msk [vmem:[#allocation2 + $0xa0] sm:$0xff] %vm160_vm0, %v2655_v33  ;;  %5951 = vmatprep.mubr.msk.f32.mxu0 %vm160_vm0, %v2655_v33 }
0x159e   :  { %5952 = vmatmul.mubr.msk.f32.vlgmr.msra.gmra.mrb[20].mxu0 %vm160_vm0, %v2657_v32 }
0x159f   :  { %v2661_v37 = vpop.permute.xlu0 %2660 }
0x15a0   :  { %2670 = vst.msk [vmem:[#allocation2 + $0xb8] sm:$0xff] %vm160_vm0, %v2661_v37  ;;  %v2659_v38 = vpop.permute.xlu1 %2658 }
0x15a1   :  { %2669 = vst.msk [vmem:[#allocation2 + $0xb0] sm:$0xff] %vm160_vm0, %v2659_v38  ;;  %5954 = vmatprep.mubr.msk.f32.mxu0 %vm160_vm0, %v2659_v38 }
0x15a2   :  { %5955 = vmatmul.mubr.msk.f32.gmra.mrb[22].mxu0 %vm160_vm0, %v2661_v37 }
0x15b0   :  { %v1251_v2 = vpop.permute.xlu0 %1250 }
0x15b1   :  { %v1247_v40 = vpop.permute.xlu1 %1246  ;;  %v1262_v1 = vmul.f32 %v7838_v43, %v1251_v2 }
0x15b2   :  { %v1261_v4 = vmul.f32 %v7838_v43, %v1247_v40 }
0x15b3   :  { %v1266_v41 = vadd.f32 %v7846_v52, %v1262_v1 }
0x15b4   :  { %v1265_v18 = vadd.f32 %v7846_v52, %v1261_v4 }
0x15b5   :  { %v1255_v0 = vpop.permute.xlu1 %1254 }
0x15b6   :  { %v1263_v54 = vmul.f32 %v7838_v43, %v1255_v0 }
0x15b8   :  { %v1267_v60 = vadd.f32 %v7846_v52, %v1263_v54 }
0x15b9   :  { %v1259_v42 = vpop.permute.xlu1 %1258 }
0x15ba   :  { %v1264_v45 = vmul.f32 %v7838_v43, %v1259_v42 }
0x15bc   :  { %v1268_v44 = vadd.f32 %v7846_v52, %v1264_v45 }
0x1671   :  { %v5953_v55 = vpop.f32.mrb[20].mxu0 }
0x1672   :  { %v2769_v17 = vadd.f32 %v5953_v55, %v1266_v41  ;;  %v2749_v21 = vpop.f32.mrb[21].mxu0 }
0x1673   :  { %v2768_v59 = vadd.f32 %v2749_v21, %v1265_v18  ;;  %v3173_v18 = vld [vmem:[#allocation15 + $0x28] sm:$0xff]  ;;  %v3538_v21 = vld [vmem:[#allocation16 + $0x20] sm:$0xff] }
0x1674   :  { %v5447_v24 = vmul.f32 -1.442695, %v2769_v17 }
0x1675   :  { %v5446_v26 = vmul.f32 -1.442695, %v2768_v59  ;;  %v5956_v25 = vpop.f32.mrb[22].mxu0 }
0x1676   :  { %6617 = vpow2.f32 %v5447_v24  ;;  %v2771_v62 = vadd.f32 %v5956_v25, %v1268_v44  ;;  %v2759_v63 = vpop.f32.mrb[23].mxu0  ;;  %v3540_v44 = vld [vmem:[#allocation16 + $0x30] sm:$0xff] }
0x1677   :  { %6619 = vpow2.f32 %v5446_v26  ;;  %v2770_v5 = vadd.f32 %v2759_v63, %v1267_v60  ;;  %v3541_v26 = vld [vmem:[#allocation16 + $0x38] sm:$0xff]  ;;  %v5493_v63 = vld [vmem:[%s8810_s7 + $0x28] sm:$0xff] }
0x1678   :  { %v5449_v6 = vmul.f32 -1.442695, %v2771_v62  ;;  %v8036_v25 = vpack.c.bf16 %v3541_v26, %v3540_v44  ;;  %v5492_v60 = vld [vmem:[%s8810_s7 + $0x20] sm:$0xff] }
0x1679   :  { %v5448_v43 = vmul.f32 -1.442695, %v2770_v5  ;;  %6035 = vmatprep.mubr.msk.f32.mxu0 %vm160_vm0, %v5492_v60 }
0x167a   :  { %6621 = vpow2.f32 %v5449_v6 }
0x167b   :  { %6623 = vpow2.f32 %v5448_v43 }
0x167c   :  { %6625 = vtanh.f32 %v2769_v17 }
0x167d   :  { %6627 = vtanh.f32 %v2768_v59  ;;  %v3539_v59 = vld [vmem:[#allocation16 + $0x28] sm:$0xff] }
0x167e   :  { %v8032_v24 = vpack.c.bf16 %v3539_v59, %v3538_v21 }
0x1680   :  { %v6618_v7 = vpop.eup %6617  ;;  %6242 = vmatprep.subr.bf16.mxu0 %v8032_v24 }
0x1681   :  { %v6620_v8 = vpop.eup %6619  ;;  %v2785_v9 = vadd.f32 1.0, %v6618_v7  ;;  %6244 = vmatpush3.bf16.msra.mxu0 %v8032_v24  ;;  %v5494_v7 = vld [vmem:[%s8810_s7 + $0x30] sm:$0xff] }
0x1682   :  { %v2784_v10 = vadd.f32 1.0, %v6620_v8  ;;  %6246 = vmatprep.subr.bf16.mxu0 %v8036_v25 }
0x1683   :  { %6629 = vrcp.f32 %v2785_v9  ;;  %v5495_v9 = vld [vmem:[%s8810_s7 + $0x38] sm:$0xff] }
0x1684   :  { %v6622_v12 = vpop.eup %6621  ;;  %6631 = vrcp.f32 %v2784_v10 }
0x1685   :  { %v6624_v13 = vpop.eup %6623  ;;  %v2787_v52 = vadd.f32 1.0, %v6622_v12  ;;  %6633 = vtanh.f32 %v2771_v62  ;;  %6248 = vmatpush3.bf16.msra.mxu0 %v8036_v25 }
0x1686   :  { %v2786_v14 = vadd.f32 1.0, %v6624_v13  ;;  %6635 = vtanh.f32 %v2770_v5  ;;  %v6626_v15 = vpop.eup %6625  ;;  %6250 = vmatprep.subr.bf16.mxu0 %v8032_v24 }
0x1687   :  { %6637 = vrcp.f32 %v2787_v52  ;;  %v6628_v19 = vpop.eup %6627  ;;  %v3174_v52 = vld [vmem:[#allocation15 + $0x30] sm:$0xff] }
0x1688   :  { %6639 = vrcp.f32 %v2786_v14  ;;  %6036 = vmatmul.mubr.msk.f32.vlgmr.msra.gmra.mrb[24].mxu0 %vm160_vm0, %v5493_v63  ;;  %v3175_v14 = vld [vmem:[#allocation15 + $0x38] sm:$0xff] }
0x1689   :  { %6252 = vmatpush3.bf16.msra.mxu0 %v8032_v24  ;;  %6038 = vmatprep.mubr.msk.f32.mxu0 %vm160_vm0, %v5494_v7  ;;  %v8116_v63 = vld [vmem:[%s8815_s12 + $0x1] ss:$0 sm:$0xff] }
0x168a   :  { %6254 = vmatprep.subr.bf16.mxu0 %v8036_v25 }
0x168c   :  { %6039 = vmatmul.mubr.msk.f32.gmra.mrb[26].mxu0 %vm160_vm0, %v5495_v9 }
0x168d   :  { %v6630_v22 = vpop.eup %6629  ;;  %6256 = vmatpush3.bf16.msra.mxu0 %v8036_v25 }
0x168e   :  { %v6632_v23 = vpop.eup %6631  ;;  %v7978_v50 = vsel %vm7560_vm5, %v6626_v15, %v6630_v22  ;;  %6258 = vmatprep.subr.bf16.mxu0 %v8032_v24  ;;  %v6237_v22 = vpack.c.bf16 %v3175_v14, %v3174_v52 }
0x168f   :  { %v6634_v46 = vpop.eup %6633  ;;  %2814 = vrot.lane.b32.xlu1 %v7978_v50, %s7213_s24  ;;  %v7984_v48 = vsel %vm7560_vm5, %v6628_v19, %v6632_v23  ;;  %v2805_v33 = vmul.f32 %v7978_v50, %v7934_v16 }
0x1690   :  { %v6636_v27 = vpop.eup %6635  ;;  %2812 = vrot.lane.b32.xlu0 %v7984_v48, %s7213_s24  ;;  %v2804_v38 = vmul.f32 %v7984_v48, %v7936_v61 }
0x1691   :  { %v6638_v53 = vpop.eup %6637 }
0x1692   :  { %v6640_v20 = vpop.eup %6639  ;;  %v7990_v58 = vsel %vm7560_vm5, %v6634_v46, %v6638_v53  ;;  %v3139_v46 = vld [vmem:[#allocation2] sm:$0xff]  ;;  %v3142_v53 = vld [vmem:[#allocation2 + $0x18] sm:$0xff] }
0x1693   :  { %2818 = vrot.lane.b32.xlu1 %v7990_v58, %s7213_s24  ;;  %v7996_v56 = vsel %vm7560_vm5, %v6636_v27, %v6640_v20  ;;  %v2807_v1 = vmul.f32 %v7990_v58, %v7942_v47  ;;  %v3141_v27 = vld [vmem:[#allocation2 + $0x10] sm:$0xff]  ;;  %v3143_v20 = vld [vmem:[#allocation2 + $0x20] sm:$0xff] }
0x1694   :  { %2816 = vrot.lane.b32.xlu0 %v7996_v56, %s7213_s24  ;;  %v2806_v16 = vmul.f32 %v7996_v56, %v7944_v51  ;;  %v3172_v51 = vld [vmem:[#allocation15 + $0x20] sm:$0xff] }
0x1695   :  { %v6233_v17 = vpack.c.bf16 %v3173_v18, %v3172_v51 }
0x1697   :  { %6234 = vmatprep.subr.bf16.mxu1 %v6233_v17 }
0x1701   :  { %v2815_v3 = vpop.permute.xlu1 %2814 }
0x1702   :  { %v2825_v57 = vmul.f32 %v2815_v3, %v7978_v50  ;;  %v2813_v49 = vpop.permute.xlu0 %2812  ;;  %v3146_v3 = vld [vmem:[#allocation2 + $0x38] sm:$0xff] }
0x1703   :  { %v2824_v28 = vmul.f32 %v2813_v49, %v7984_v48  ;;  %v3148_v49 = vld [vmem:[#allocation2 + $0x48] sm:$0xff] }
0x1704   :  { %2834 = vrot.lane.b32.xlu1 %v2825_v57, %s7214_s26  ;;  %v3147_v57 = vld [vmem:[#allocation2 + $0x40] sm:$0xff] }
0x1705   :  { %2832 = vrot.lane.b32.xlu0 %v2824_v28, %s7214_s26  ;;  %v2819_v29 = vpop.permute.xlu1 %2818  ;;  %v3149_v28 = vld [vmem:[#allocation2 + $0x50] sm:$0xff] }
0x1706   :  { %v2827_v30 = vmul.f32 %v2819_v29, %v7990_v58  ;;  %v2817_v31 = vpop.permute.xlu0 %2816  ;;  %v3150_v29 = vld [vmem:[#allocation2 + $0x58] sm:$0xff] }
0x1707   :  { %v2826_v32 = vmul.f32 %v2817_v31, %v7996_v56  ;;  %v3152_v31 = vld [vmem:[#allocation2 + $0x68] sm:$0xff] }
0x1708   :  { %2838 = vrot.lane.b32.xlu1 %v2827_v30, %s7214_s26  ;;  %v3151_v30 = vld [vmem:[#allocation2 + $0x60] sm:$0xff] }
0x1709   :  { %2836 = vrot.lane.b32.xlu0 %v2826_v32, %s7214_s26  ;;  %v3153_v32 = vld [vmem:[#allocation2 + $0x70] sm:$0xff] }
0x175b   :  { %v6037_v18 = vpop.f32.mrb[24].mxu0 }
0x1776   :  { %v2835_v37 = vpop.permute.xlu1 %2834 }
0x1777   :  { %v8012_v40 = vadd.f32 %v2835_v37, %v2805_v33  ;;  %v2833_v0 = vpop.permute.xlu0 %2832  ;;  %v3154_v33 = vld [vmem:[#allocation2 + $0x78] sm:$0xff]  ;;  %v3155_v37 = vld [vmem:[#allocation2 + $0x80] sm:$0xff] }
0x1778   :  { %v8014_v2 = vadd.f32 %v2833_v0, %v2804_v38  ;;  %v3156_v38 = vld [vmem:[#allocation2 + $0x88] sm:$0xff]  ;;  %v3157_v0 = vld [vmem:[#allocation2 + $0x90] sm:$0xff] }
0x1779   :  { %6641 = vtanh.f32 %v8012_v40 }
0x177a   :  { %6643 = vtanh.f32 %v8014_v2  ;;  %v2839_v4 = vpop.permute.xlu1 %2838 }
0x177b   :  { %v8022_v42 = vadd.f32 %v2839_v4, %v2807_v1  ;;  %v2837_v45 = vpop.permute.xlu0 %2836  ;;  %v3158_v1 = vld [vmem:[#allocation2 + $0x98] sm:$0xff]  ;;  %v3159_v4 = vld [vmem:[#allocation2 + $0xa0] sm:$0xff] }
0x177c   :  { %v8024_v61 = vadd.f32 %v2837_v45, %v2806_v16  ;;  %v3160_v16 = vld [vmem:[#allocation2 + $0xa8] sm:$0xff]  ;;  %v3161_v45 = vld [vmem:[#allocation2 + $0xb0] sm:$0xff] }
0x177d   :  { %6645 = vtanh.f32 %v8022_v42 }
0x177e   :  { %6647 = vtanh.f32 %v8024_v61 }
0x1783   :  { %v6642_v41 = vpop.eup %6641 }
0x1784   :  { %v6644_v54 = vpop.eup %6643  ;;  %2858 = vrot.lane.b32.xlu1 %v6642_v41, %s7213_s24  ;;  %v3162_v41 = vld [vmem:[#allocation2 + $0xb8] sm:$0xff] }
0x1785   :  { %2856 = vrot.lane.b32.xlu0 %v6644_v54, %s7213_s24 }
0x1787   :  { %v6646_v47 = vpop.eup %6645 }
0x1788   :  { %v6648_v55 = vpop.eup %6647  ;;  %2862 = vrot.lane.b32.xlu1 %v6646_v47, %s7213_s24 }
0x1789   :  { %2860 = vrot.lane.b32.xlu0 %v6648_v55, %s7213_s24 }
0x17f6   :  { %v2859_v62 = vpop.permute.xlu1 %2858 }
0x17f7   :  { %v2869_v5 = vmul.f32 %v2859_v62, %v7978_v50  ;;  %v2857_v6 = vpop.permute.xlu0 %2856 }
0x17f8   :  { %v2868_v43 = vmul.f32 %v2857_v6, %v7984_v48  ;;  %v3140_v48 = vld [vmem:[#allocation2 + $0x8] sm:$0xff] }
0x17f9   :  { %2878 = vrot.lane.b32.xlu1 %v2869_v5, %s7214_s26 }
0x17fa   :  { %2876 = vrot.lane.b32.xlu0 %v2868_v43, %s7214_s26  ;;  %v2863_v8 = vpop.permute.xlu1 %2862 }
0x17fb   :  { %v2871_v10 = vmul.f32 %v2863_v8, %v7990_v58  ;;  %v2861_v12 = vpop.permute.xlu0 %2860  ;;  %v3144_v58 = vld [vmem:[#allocation2 + $0x28] sm:$0xff] }
0x17fc   :  { %v2870_v13 = vmul.f32 %v2861_v12, %v7996_v56  ;;  %v3145_v56 = vld [vmem:[#allocation2 + $0x30] sm:$0xff] }
0x17fd   :  { %2882 = vrot.lane.b32.xlu1 %v2871_v10, %s7214_s26 }
0x17fe   :  { %2880 = vrot.lane.b32.xlu0 %v2870_v13, %s7214_s26 }
0x186b   :  { %v2879_v15 = vpop.permute.xlu1 %2878 }
0x186c   :  { %2890 = vst.msk [vmem:[#allocation2 + $0xc8] sm:$0xff] %vm160_vm0, %v2879_v15  ;;  %v2877_v19 = vpop.permute.xlu0 %2876 }
0x186d   :  { %2889 = vst.msk [vmem:[#allocation2 + $0xc0] sm:$0xff] %vm160_vm0, %v2877_v19  ;;  %5965 = vmatprep.mubr.msk.f32.mxu1 %vm160_vm0, %v2877_v19 }
0x186e   :  { %5966 = vmatmul.mubr.msk.f32.vlgmr.msra.gmra.mrb[26].mxu1 %vm160_vm0, %v2879_v15 }
0x186f   :  { %6236 = vmatpush3.bf16.msra.mxu1 %v6233_v17  ;;  %v2883_v23 = vpop.permute.xlu1 %2882  ;;  %v3634_v17 = vpop.f32.mrb[25].mxu0 }
0x1870   :  { %2892 = vst.msk [vmem:[#allocation2 + $0xd8] sm:$0xff] %vm160_vm0, %v2883_v23  ;;  %v2881_v50 = vpop.permute.xlu0 %2880  ;;  %6238 = vmatprep.subr.bf16.mxu1 %v6237_v22  ;;  %v6040_v21 = vpop.f32.mrb[26].mxu0 }
0x1871   :  { %2891 = vst.msk [vmem:[#allocation2 + $0xd0] sm:$0xff] %vm160_vm0, %v2881_v50  ;;  %5968 = vmatprep.mubr.msk.f32.mxu1 %vm160_vm0, %v2881_v50  ;;  %v3644_v59 = vpop.f32.mrb[27].mxu0 }
0x1872   :  { %5969 = vmatmul.mubr.msk.f32.gmra.mrb[28].mxu1 %vm160_vm0, %v2883_v23 }
0x1873   :  { %6240 = vmatpush3.bf16.msra.mxu1 %v6237_v22  ;;  %5979 = vmatprep.mubr.msk.f32.mxu1 %vm160_vm0, %v3139_v46  ;;  %v3164_v47 = vld [vmem:[#allocation2 + $0xc8] sm:$0xff] }
0x1874   :  { %v3163_v54 = vld [vmem:[#allocation2 + $0xc0] sm:$0xff] }
0x1876   :  { %5980 = vmatmul.mubr.msk.f32.vlgmr.msra.gmra.mrb[30].mxu1 %vm160_vm0, %v3140_v48 }
0x1877   :  { %5982 = vmatprep.mubr.msk.f32.mxu1 %vm160_vm0, %v3141_v27  ;;  %v3166_v51 = vld [vmem:[#allocation2 + $0xd8] sm:$0xff] }
0x1878   :  { %v3165_v55 = vld [vmem:[#allocation2 + $0xd0] sm:$0xff] }
0x187a   :  { %5983 = vmatmul.mubr.msk.f32.gmra.mrb[32].mxu1 %vm160_vm0, %v3142_v53 }
0x187b   :  { %5985 = vmatprep.mubr.msk.f32.mxu1 %vm160_vm0, %v3143_v20 }
0x187e   :  { %5986 = vmatmul.mubr.msk.f32.gmra.mrb[34].mxu1 %vm160_vm0, %v3144_v58 }
0x187f   :  { %5988 = vmatprep.mubr.msk.f32.mxu1 %vm160_vm0, %v3145_v56 }
0x1882   :  { %5989 = vmatmul.mubr.msk.f32.gmra.mrb[36].mxu1 %vm160_vm0, %v3146_v3 }
0x1883   :  { %5991 = vmatprep.mubr.msk.f32.mxu1 %vm160_vm0, %v3147_v57 }
0x1886   :  { %5992 = vmatmul.mubr.msk.f32.gmra.mrb[38].mxu1 %vm160_vm0, %v3148_v49 }
0x1887   :  { %5994 = vmatprep.mubr.msk.f32.mxu1 %vm160_vm0, %v3149_v28 }
0x188a   :  { %5995 = vmatmul.mubr.msk.f32.gmra.mrb[40].mxu1 %vm160_vm0, %v3150_v29 }
0x188b   :  { %5997 = vmatprep.mubr.msk.f32.mxu1 %vm160_vm0, %v3151_v30 }
0x188e   :  { %5998 = vmatmul.mubr.msk.f32.gmra.mrb[42].mxu1 %vm160_vm0, %v3152_v31 }
0x188f   :  { %6000 = vmatprep.mubr.msk.f32.mxu1 %vm160_vm0, %v3153_v32 }
0x1892   :  { %6001 = vmatmul.mubr.msk.f32.gmra.mrb[44].mxu1 %vm160_vm0, %v3154_v33 }
0x1893   :  { %6003 = vmatprep.mubr.msk.f32.mxu1 %vm160_vm0, %v3155_v37 }
0x1896   :  { %6004 = vmatmul.mubr.msk.f32.gmra.mrb[46].mxu1 %vm160_vm0, %v3156_v38 }
0x1897   :  { %6006 = vmatprep.mubr.msk.f32.mxu1 %vm160_vm0, %v3157_v0 }
0x189a   :  { %6007 = vmatmul.mubr.msk.f32.gmra.mrb[48].mxu1 %vm160_vm0, %v3158_v1 }
0x189b   :  { %6009 = vmatprep.mubr.msk.f32.mxu1 %vm160_vm0, %v3159_v4 }
0x189e   :  { %6010 = vmatmul.mubr.msk.f32.gmra.mrb[50].mxu1 %vm160_vm0, %v3160_v16 }
0x189f   :  { %6012 = vmatprep.mubr.msk.f32.mxu1 %vm160_vm0, %v3161_v45 }
0x18a2   :  { %6013 = vmatmul.mubr.msk.f32.gmra.mrb[52].mxu1 %vm160_vm0, %v3162_v41 }
0x18a3   :  { %6015 = vmatprep.mubr.msk.f32.mxu1 %vm160_vm0, %v3163_v54 }
0x18a6   :  { %6016 = vmatmul.mubr.msk.f32.gmra.mrb[54].mxu1 %vm160_vm0, %v3164_v47 }
0x18a7   :  { %6018 = vmatprep.mubr.msk.f32.mxu1 %vm160_vm0, %v3165_v55 }
0x18aa   :  { %6019 = vmatmul.mubr.msk.f32.gmra.mrb[56].mxu1 %vm160_vm0, %v3166_v51 }
0x1941   :  { %v8105_v44 = vpop.f32.mrb[26].mxu1 }
0x1942   :  { %v8107_v26 = vpop.f32.mrb[27].mxu1 }
0x1945   :  { %v8109_v60 = vpop.f32.mrb[28].mxu1 }
0x1946   :  { %v8111_v62 = vpop.f32.mrb[29].mxu1 }
0x1949   :  { %v5981_v5 = vpop.f32.mrb[30].mxu1 }
0x194a   :  { %v3352_v6 = vadd.f32 %v5981_v5, %v8116_v63  ;;  %v3346_v43 = vpop.f32.mrb[31].mxu1 }
0x194b   :  { %v3347_v7 = vadd.f32 %v8116_v63, %v3346_v43 }
0x194c   :  { %v3654_v8 = vadd.f32 %v6037_v18, %v3352_v6 }
0x194d   :  { %v3653_v9 = vadd.f32 %v3634_v17, %v3347_v7  ;;  %v5984_v10 = vpop.f32.mrb[32].mxu1 }
0x194e   :  { %v5501_v12 = vmul.f32 -1.442695, %v3654_v8  ;;  %v3362_v13 = vadd.f32 %v5984_v10, %v8116_v63  ;;  %v3356_v52 = vpop.f32.mrb[33].mxu1 }
0x194f   :  { %v5500_v14 = vmul.f32 -1.442695, %v3653_v9  ;;  %v3357_v15 = vadd.f32 %v8116_v63, %v3356_v52  ;;  %v3550_v52 = vld [vmem:[#allocation13 + $0x30] sm:$0xff] }
0x1950   :  { %6649 = vpow2.f32 %v5501_v12  ;;  %v3656_v19 = vadd.f32 %v6040_v21, %v3362_v13  ;;  %v3551_v13 = vld [vmem:[#allocation13 + $0x38] sm:$0xff] }
0x1951   :  { %6651 = vpow2.f32 %v5500_v14  ;;  %v3655_v22 = vadd.f32 %v3644_v59, %v3357_v15  ;;  %v8122_v23 = vpop.f32.mrb[34].mxu1 }
0x1952   :  { %v5503_v50 = vmul.f32 -1.442695, %v3656_v19  ;;  %v8124_v46 = vpop.f32.mrb[35].mxu1 }
0x1953   :  { %v5502_v48 = vmul.f32 -1.442695, %v3655_v22 }
0x1954   :  { %6653 = vpow2.f32 %v5503_v50 }
0x1955   :  { %6655 = vpow2.f32 %v5502_v48  ;;  %v8126_v27 = vpop.f32.mrb[36].mxu1 }
0x1956   :  { %v8128_v53 = vpop.f32.mrb[37].mxu1  ;;  %6657 = vtanh.f32 %v3654_v8  ;;  %v3549_v8 = vld [vmem:[#allocation13 + $0x28] sm:$0xff] }
0x1957   :  { %6659 = vtanh.f32 %v3653_v9  ;;  %v3548_v9 = vld [vmem:[#allocation13 + $0x20] sm:$0xff] }
0x1959   :  { %v8130_v20 = vpop.f32.mrb[38].mxu1 }
0x195a   :  { %v6650_v58 = vpop.eup %6649  ;;  %v8132_v56 = vpop.f32.mrb[39].mxu1 }
0x195b   :  { %v6652_v3 = vpop.eup %6651  ;;  %v3670_v57 = vadd.f32 1.0, %v6650_v58 }
0x195c   :  { %v3669_v49 = vadd.f32 1.0, %v6652_v3 }
0x195d   :  { %6661 = vrcp.f32 %v3670_v57  ;;  %v8134_v28 = vpop.f32.mrb[40].mxu1 }
0x195e   :  { %v6654_v29 = vpop.eup %6653  ;;  %6663 = vrcp.f32 %v3669_v49  ;;  %v8136_v30 = vpop.f32.mrb[41].mxu1 }
0x195f   :  { %v6656_v31 = vpop.eup %6655  ;;  %v3672_v32 = vadd.f32 1.0, %v6654_v29  ;;  %6665 = vtanh.f32 %v3656_v19 }
0x1960   :  { %v3671_v33 = vadd.f32 1.0, %v6656_v31  ;;  %6667 = vtanh.f32 %v3655_v22  ;;  %v6658_v0 = vpop.eup %6657 }
0x1961   :  { %6669 = vrcp.f32 %v3672_v32  ;;  %v8138_v37 = vpop.f32.mrb[42].mxu1  ;;  %v6660_v4 = vpop.eup %6659 }
0x1962   :  { %6671 = vrcp.f32 %v3671_v33  ;;  %v8140_v38 = vpop.f32.mrb[43].mxu1 }
0x1965   :  { %v8142_v1 = vpop.f32.mrb[44].mxu1 }
0x1966   :  { %v8144_v16 = vpop.f32.mrb[45].mxu1 }
0x1967   :  { %v6662_v45 = vpop.eup %6661 }
0x1968   :  { %v6664_v41 = vpop.eup %6663  ;;  %v8148_v54 = vsel %vm7560_vm5, %v6658_v0, %v6662_v45 }
0x1969   :  { %v6666_v47 = vpop.eup %6665  ;;  %3715 = vrot.lane.b32.xlu1 %v8148_v54, %s7213_s24  ;;  %v8152_v55 = vpop.f32.mrb[46].mxu1  ;;  %v8156_v51 = vsel %vm7560_vm5, %v6660_v4, %v6664_v41 }
0x196a   :  { %v6668_v18 = vpop.eup %6667  ;;  %v8158_v17 = vpop.f32.mrb[47].mxu1  ;;  %3713 = vrot.lane.b32.xlu0 %v8156_v51, %s7213_s24 }
0x196b   :  { %v6670_v21 = vpop.eup %6669 }
0x196c   :  { %v6672_v59 = vpop.eup %6671  ;;  %v8164_v5 = vsel %vm7560_vm5, %v6666_v47, %v6670_v21 }
0x196d   :  { %3719 = vrot.lane.b32.xlu1 %v8164_v5, %s7213_s24  ;;  %v8168_v6 = vpop.f32.mrb[48].mxu1  ;;  %v8172_v43 = vsel %vm7560_vm5, %v6668_v18, %v6672_v59 }
0x196e   :  { %v8174_v7 = vpop.f32.mrb[49].mxu1  ;;  %3717 = vrot.lane.b32.xlu0 %v8172_v43, %s7213_s24 }
0x1971   :  { %3695 = vrot.lane.b32.xlu1 %v3549_v8, %s7214_s26  ;;  %v8179_v10 = vpop.f32.mrb[50].mxu1 }
0x1972   :  { %v8181_v12 = vpop.f32.mrb[51].mxu1  ;;  %3693 = vrot.lane.b32.xlu0 %v3548_v9, %s7214_s26 }
0x1975   :  { %3699 = vrot.lane.b32.xlu1 %v3551_v13, %s7214_s26  ;;  %v8185_v14 = vpop.f32.mrb[52].mxu1 }
0x1976   :  { %v8187_v15 = vpop.f32.mrb[53].mxu1  ;;  %3697 = vrot.lane.b32.xlu0 %v3550_v52, %s7214_s26 }
0x1979   :  { %v8190_v19 = vpop.f32.mrb[54].mxu1 }
0x197a   :  { %v8192_v22 = vpop.f32.mrb[55].mxu1 }
0x197d   :  { %v8194_v50 = vpop.f32.mrb[56].mxu1 }
0x197e   :  { %v8196_v48 = vpop.f32.mrb[57].mxu1 }
0x19db   :  { %v3716_v58 = vpop.permute.xlu1 %3715 }
0x19dc   :  { %v3726_v3 = vmul.f32 %v3716_v58, %v8148_v54  ;;  %v3714_v57 = vpop.permute.xlu0 %3713 }
0x19dd   :  { %v3725_v49 = vmul.f32 %v3714_v57, %v8156_v51 }
0x19de   :  { %3735 = vrot.lane.b32.xlu1 %v3726_v3, %s7214_s26 }
0x19df   :  { %v3720_v29 = vpop.permute.xlu1 %3719  ;;  %3733 = vrot.lane.b32.xlu0 %v3725_v49, %s7214_s26 }
0x19e0   :  { %v3728_v31 = vmul.f32 %v3720_v29, %v8164_v5  ;;  %v3718_v32 = vpop.permute.xlu0 %3717 }
0x19e1   :  { %v3727_v33 = vmul.f32 %v3718_v32, %v8172_v43 }
0x19e2   :  { %3739 = vrot.lane.b32.xlu1 %v3728_v31, %s7214_s26 }
0x19e3   :  { %3737 = vrot.lane.b32.xlu0 %v3727_v33, %s7214_s26  ;;  %v3696_v0 = vpop.permute.xlu1 %3695 }
0x19e4   :  { %v3694_v4 = vpop.permute.xlu0 %3693  ;;  %v3706_v47 = vmul.f32 %v3696_v0, %v8148_v54 }
0x19e5   :  { %v3705_v18 = vmul.f32 %v3694_v4, %v8156_v51 }
0x19e7   :  { %v3700_v45 = vpop.permute.xlu1 %3699 }
0x19e8   :  { %v3698_v41 = vpop.permute.xlu0 %3697  ;;  %v3708_v13 = vmul.f32 %v3700_v45, %v8164_v5 }
0x19e9   :  { %v3707_v52 = vmul.f32 %v3698_v41, %v8172_v43 }
0x1a50   :  { %v3736_v21 = vpop.permute.xlu1 %3735 }
0x1a51   :  { %v8208_v59 = vadd.f32 %v3736_v21, %v3706_v47  ;;  %v3734_v8 = vpop.permute.xlu0 %3733 }
0x1a52   :  { %v8210_v9 = vadd.f32 %v3734_v8, %v3705_v18 }
0x1a53   :  { %6673 = vtanh.f32 %v8208_v59 }
0x1a54   :  { %6675 = vtanh.f32 %v8210_v9  ;;  %v3740_v58 = vpop.permute.xlu1 %3739 }
0x1a55   :  { %v8216_v3 = vadd.f32 %v3740_v58, %v3708_v13  ;;  %v3738_v57 = vpop.permute.xlu0 %3737 }
0x1a56   :  { %v8218_v49 = vadd.f32 %v3738_v57, %v3707_v52 }
0x1a57   :  { %6677 = vtanh.f32 %v8216_v3 }
0x1a58   :  { %6679 = vtanh.f32 %v8218_v49 }
0x1a5d   :  { %v6674_v29 = vpop.eup %6673 }
0x1a5e   :  { %v6676_v31 = vpop.eup %6675  ;;  %3759 = vrot.lane.b32.xlu1 %v6674_v29, %s7213_s24 }
0x1a5f   :  { %3757 = vrot.lane.b32.xlu0 %v6676_v31, %s7213_s24 }
0x1a61   :  { %v6678_v32 = vpop.eup %6677 }
0x1a62   :  { %v6680_v33 = vpop.eup %6679  ;;  %3763 = vrot.lane.b32.xlu1 %v6678_v32, %s7213_s24  ;;  %v3382_v32 = vadd.f32 %v8126_v27, %v8116_v63 }
0x1a63   :  { %3761 = vrot.lane.b32.xlu0 %v6680_v33, %s7213_s24 }
0x1ad0   :  { %v3760_v0 = vpop.permute.xlu1 %3759 }
0x1ad1   :  { %v3770_v4 = vmul.f32 %v3760_v0, %v8148_v54  ;;  %v3758_v45 = vpop.permute.xlu0 %3757  ;;  %v3377_v0 = vadd.f32 %v8116_v63, %v8128_v53 }
0x1ad2   :  { %v3769_v41 = vmul.f32 %v3758_v45, %v8156_v51 }
0x1ad3   :  { %3783 = vrot.lane.b32.xlu1 %v3770_v4, %s7214_s26 }
0x1ad4   :  { %v3764_v47 = vpop.permute.xlu1 %3763  ;;  %3781 = vrot.lane.b32.xlu0 %v3769_v41, %s7214_s26 }
0x1ad5   :  { %v3772_v18 = vmul.f32 %v3764_v47, %v8164_v5  ;;  %v3762_v21 = vpop.permute.xlu0 %3761  ;;  %v3372_v5 = vadd.f32 %v8122_v23, %v8116_v63 }
0x1ad6   :  { %v3771_v8 = vmul.f32 %v3762_v21, %v8172_v43  ;;  %v3367_v43 = vadd.f32 %v8116_v63, %v8124_v46 }
0x1ad7   :  { %3787 = vrot.lane.b32.xlu1 %v3772_v18, %s7214_s26 }
0x1ad8   :  { %3785 = vrot.lane.b32.xlu0 %v3771_v8, %s7214_s26 }
0x1b45   :  { %v3784_v13 = vpop.permute.xlu1 %3783 }
0x1b46   :  { %v3782_v52 = vpop.permute.xlu0 %3781 }
0x1b47   :  { %6049 = vmatprep.mubr.msk.f32.mxu0 %vm160_vm0, %v3782_v52 }
0x1b48   :  { %6050 = vmatmul.mubr.msk.f32.vlgmr.msra.gmra.mrb[28].mxu0 %vm160_vm0, %v3784_v13 }
0x1b49   :  { %6260 = vmatpush3.bf16.msra.mxu0 %v8032_v24  ;;  %v3788_v51 = vpop.permute.xlu1 %3787 }
0x1b4a   :  { %v3786_v54 = vpop.permute.xlu0 %3785  ;;  %6262 = vmatprep.subr.bf16.mxu0 %v8036_v25 }
0x1b4b   :  { %6052 = vmatprep.mubr.msk.f32.mxu0 %vm160_vm0, %v3786_v54 }
0x1b4c   :  { %6053 = vmatmul.mubr.msk.f32.gmra.mrb[30].mxu0 %vm160_vm0, %v3788_v51 }
0x1b4d   :  { %6264 = vmatpush3.bf16.msra.mxu0 %v8036_v25 }
0x1b4e   :  { %6266 = vmatprep.subr.bf16.mxu0 %v8032_v24 }
0x1c1b   :  { %v6051_v58 = vpop.f32.mrb[28].mxu0 }
0x1c1c   :  { %v3883_v57 = vadd.f32 %v6051_v58, %v3372_v5  ;;  %v3863_v29 = vpop.f32.mrb[29].mxu0 }
0x1c1d   :  { %v3882_v31 = vadd.f32 %v3863_v29, %v3367_v43 }
0x1c1e   :  { %v5509_v33 = vmul.f32 -1.442695, %v3883_v57 }
0x1c1f   :  { %v5508_v4 = vmul.f32 -1.442695, %v3882_v31  ;;  %v6054_v45 = vpop.f32.mrb[30].mxu0 }
0x1c20   :  { %6681 = vpow2.f32 %v5509_v33  ;;  %v3885_v41 = vadd.f32 %v6054_v45, %v3382_v32  ;;  %v3873_v47 = vpop.f32.mrb[31].mxu0 }
0x1c21   :  { %6683 = vpow2.f32 %v5508_v4  ;;  %v3884_v23 = vadd.f32 %v3873_v47, %v3377_v0 }
0x1c22   :  { %v5511_v18 = vmul.f32 -1.442695, %v3885_v41 }
0x1c23   :  { %v5510_v46 = vmul.f32 -1.442695, %v3884_v23 }
0x1c24   :  { %6685 = vpow2.f32 %v5511_v18 }
0x1c25   :  { %6687 = vpow2.f32 %v5510_v46 }
0x1c26   :  { %6689 = vtanh.f32 %v3883_v57 }
0x1c27   :  { %6691 = vtanh.f32 %v3882_v31 }
0x1c2a   :  { %v6682_v21 = vpop.eup %6681 }
0x1c2b   :  { %v6684_v8 = vpop.eup %6683  ;;  %v3899_v13 = vadd.f32 1.0, %v6682_v21 }
0x1c2c   :  { %v3898_v27 = vadd.f32 1.0, %v6684_v8 }
0x1c2d   :  { %6693 = vrcp.f32 %v3899_v13 }
0x1c2e   :  { %v6686_v52 = vpop.eup %6685  ;;  %6695 = vrcp.f32 %v3898_v27 }
0x1c2f   :  { %v6688_v53 = vpop.eup %6687  ;;  %v3901_v54 = vadd.f32 1.0, %v6686_v52  ;;  %6697 = vtanh.f32 %v3885_v41 }
0x1c30   :  { %v3900_v51 = vadd.f32 1.0, %v6688_v53  ;;  %6699 = vtanh.f32 %v3884_v23  ;;  %v6690_v5 = vpop.eup %6689 }
0x1c31   :  { %6701 = vrcp.f32 %v3901_v54  ;;  %v6692_v43 = vpop.eup %6691 }
0x1c32   :  { %6703 = vrcp.f32 %v3900_v51 }
0x1c37   :  { %v6694_v58 = vpop.eup %6693 }
0x1c38   :  { %v6696_v29 = vpop.eup %6695  ;;  %v3915_v32 = vsel %vm7560_vm5, %v6690_v5, %v6694_v58 }
0x1c39   :  { %v6698_v57 = vpop.eup %6697  ;;  %3928 = vrot.lane.b32.xlu1 %v3915_v32, %s7213_s24  ;;  %v3914_v31 = vsel %vm7560_vm5, %v6692_v43, %v6696_v29  ;;  %v3919_v52 = vmul.f32 %v3915_v32, %v8208_v59 }
0x1c3a   :  { %v6700_v33 = vpop.eup %6699  ;;  %3926 = vrot.lane.b32.xlu0 %v3914_v31, %s7213_s24  ;;  %v3918_v54 = vmul.f32 %v3914_v31, %v8210_v9 }
0x1c3b   :  { %v6702_v0 = vpop.eup %6701 }
0x1c3c   :  { %v6704_v4 = vpop.eup %6703  ;;  %v3917_v45 = vsel %vm7560_vm5, %v6698_v57, %v6702_v0 }
0x1c3d   :  { %3932 = vrot.lane.b32.xlu1 %v3917_v45, %s7213_s24  ;;  %v3916_v41 = vsel %vm7560_vm5, %v6700_v33, %v6704_v4  ;;  %v3921_v58 = vmul.f32 %v3917_v45, %v8216_v3 }
0x1c3e   :  { %3930 = vrot.lane.b32.xlu0 %v3916_v41, %s7213_s24  ;;  %v3920_v57 = vmul.f32 %v3916_v41, %v8218_v49 }
0x1cab   :  { %v3929_v47 = vpop.permute.xlu1 %3928 }
0x1cac   :  { %v3939_v23 = vmul.f32 %v3929_v47, %v3915_v32  ;;  %v3927_v18 = vpop.permute.xlu0 %3926 }
0x1cad   :  { %v3938_v46 = vmul.f32 %v3927_v18, %v3914_v31 }
0x1cae   :  { %3948 = vrot.lane.b32.xlu1 %v3939_v23, %s7214_s26 }
0x1caf   :  { %v3933_v21 = vpop.permute.xlu1 %3932  ;;  %3946 = vrot.lane.b32.xlu0 %v3938_v46, %s7214_s26 }
0x1cb0   :  { %v3941_v8 = vmul.f32 %v3933_v21, %v3917_v45  ;;  %v3931_v13 = vpop.permute.xlu0 %3930 }
0x1cb1   :  { %v3940_v27 = vmul.f32 %v3931_v13, %v3916_v41 }
0x1cb2   :  { %3952 = vrot.lane.b32.xlu1 %v3941_v8, %s7214_s26 }
0x1cb3   :  { %3950 = vrot.lane.b32.xlu0 %v3940_v27, %s7214_s26 }
0x1d20   :  { %v3949_v53 = vpop.permute.xlu1 %3948 }
0x1d21   :  { %v8268_v51 = vadd.f32 %v3949_v53, %v3919_v52  ;;  %v3947_v5 = vpop.permute.xlu0 %3946 }
0x1d22   :  { %v8270_v43 = vadd.f32 %v3947_v5, %v3918_v54 }
0x1d23   :  { %6705 = vtanh.f32 %v8268_v51 }
0x1d24   :  { %6707 = vtanh.f32 %v8270_v43  ;;  %v3953_v29 = vpop.permute.xlu1 %3952 }
0x1d25   :  { %v8276_v33 = vadd.f32 %v3953_v29, %v3921_v58  ;;  %v3951_v59 = vpop.permute.xlu0 %3950 }
0x1d26   :  { %v8278_v0 = vadd.f32 %v3951_v59, %v3920_v57  ;;  %v3402_v57 = vadd.f32 %v8134_v28, %v8116_v63 }
0x1d27   :  { %6709 = vtanh.f32 %v8276_v33 }
0x1d28   :  { %6711 = vtanh.f32 %v8278_v0 }
0x1d2d   :  { %v6706_v9 = vpop.eup %6705 }
0x1d2e   :  { %v6708_v4 = vpop.eup %6707  ;;  %3972 = vrot.lane.b32.xlu1 %v6706_v9, %s7213_s24  ;;  %v3397_v9 = vadd.f32 %v8116_v63, %v8136_v30 }
0x1d2f   :  { %3970 = vrot.lane.b32.xlu0 %v6708_v4, %s7213_s24 }
0x1d31   :  { %v6710_v3 = vpop.eup %6709 }
0x1d32   :  { %v6712_v47 = vpop.eup %6711  ;;  %3976 = vrot.lane.b32.xlu1 %v6710_v3, %s7213_s24 }
0x1d33   :  { %3974 = vrot.lane.b32.xlu0 %v6712_v47, %s7213_s24 }
0x1da0   :  { %v3973_v49 = vpop.permute.xlu1 %3972 }
0x1da1   :  { %v3983_v23 = vmul.f32 %v3973_v49, %v3915_v32  ;;  %v3971_v18 = vpop.permute.xlu0 %3970 }
0x1da2   :  { %v3982_v46 = vmul.f32 %v3971_v18, %v3914_v31 }
0x1da3   :  { %3996 = vrot.lane.b32.xlu1 %v3983_v23, %s7214_s26 }
0x1da4   :  { %v3977_v21 = vpop.permute.xlu1 %3976  ;;  %3994 = vrot.lane.b32.xlu0 %v3982_v46, %s7214_s26 }
0x1da5   :  { %v3985_v8 = vmul.f32 %v3977_v21, %v3917_v45  ;;  %v3975_v13 = vpop.permute.xlu0 %3974  ;;  %v3392_v45 = vadd.f32 %v8130_v20, %v8116_v63 }
0x1da6   :  { %v3984_v27 = vmul.f32 %v3975_v13, %v3916_v41  ;;  %v3387_v41 = vadd.f32 %v8116_v63, %v8132_v56 }
0x1da7   :  { %4000 = vrot.lane.b32.xlu1 %v3985_v8, %s7214_s26 }
0x1da8   :  { %3998 = vrot.lane.b32.xlu0 %v3984_v27, %s7214_s26 }
0x1e15   :  { %v3997_v52 = vpop.permute.xlu1 %3996 }
0x1e16   :  { %v3995_v53 = vpop.permute.xlu0 %3994 }
0x1e17   :  { %6063 = vmatprep.mubr.msk.f32.mxu0 %vm160_vm0, %v3995_v53 }
0x1e18   :  { %6064 = vmatmul.mubr.msk.f32.vlgmr.msra.gmra.mrb[32].mxu0 %vm160_vm0, %v3997_v52 }
0x1e19   :  { %6268 = vmatpush3.bf16.msra.mxu0 %v8032_v24  ;;  %v4001_v31 = vpop.permute.xlu1 %4000 }
0x1e1a   :  { %v3999_v32 = vpop.permute.xlu0 %3998  ;;  %6270 = vmatprep.subr.bf16.mxu0 %v8036_v25 }
0x1e1b   :  { %6066 = vmatprep.mubr.msk.f32.mxu0 %vm160_vm0, %v3999_v32 }
0x1e1c   :  { %6067 = vmatmul.mubr.msk.f32.gmra.mrb[34].mxu0 %vm160_vm0, %v4001_v31 }
0x1e1d   :  { %6272 = vmatpush3.bf16.msra.mxu0 %v8036_v25 }
0x1e1e   :  { %6274 = vmatprep.subr.bf16.mxu0 %v8032_v24 }
0x1eeb   :  { %v6065_v54 = vpop.f32.mrb[32].mxu0 }
0x1eec   :  { %v4096_v5 = vadd.f32 %v6065_v54, %v3392_v45  ;;  %v4076_v58 = vpop.f32.mrb[33].mxu0 }
0x1eed   :  { %v4095_v29 = vadd.f32 %v4076_v58, %v3387_v41 }
0x1eee   :  { %v5517_v59 = vmul.f32 -1.442695, %v4096_v5 }
0x1eef   :  { %v5516_v4 = vmul.f32 -1.442695, %v4095_v29  ;;  %v6068_v3 = vpop.f32.mrb[34].mxu0 }
0x1ef0   :  { %6713 = vpow2.f32 %v5517_v59  ;;  %v4098_v47 = vadd.f32 %v6068_v3, %v3402_v57  ;;  %v4086_v49 = vpop.f32.mrb[35].mxu0 }
0x1ef1   :  { %6715 = vpow2.f32 %v5516_v4  ;;  %v4097_v20 = vadd.f32 %v4086_v49, %v3397_v9 }
0x1ef2   :  { %v5519_v23 = vmul.f32 -1.442695, %v4098_v47 }
0x1ef3   :  { %v5518_v56 = vmul.f32 -1.442695, %v4097_v20 }
0x1ef4   :  { %6717 = vpow2.f32 %v5519_v23 }
0x1ef5   :  { %6719 = vpow2.f32 %v5518_v56 }
0x1ef6   :  { %6721 = vtanh.f32 %v4096_v5 }
0x1ef7   :  { %6723 = vtanh.f32 %v4095_v29 }
0x1efa   :  { %v6714_v18 = vpop.eup %6713 }
0x1efb   :  { %v6716_v46 = vpop.eup %6715  ;;  %v4112_v21 = vadd.f32 1.0, %v6714_v18 }
0x1efc   :  { %v4111_v28 = vadd.f32 1.0, %v6716_v46 }
0x1efd   :  { %6725 = vrcp.f32 %v4112_v21 }
0x1efe   :  { %v6718_v8 = vpop.eup %6717  ;;  %6727 = vrcp.f32 %v4111_v28 }
0x1eff   :  { %v6720_v30 = vpop.eup %6719  ;;  %v4114_v13 = vadd.f32 1.0, %v6718_v8  ;;  %6729 = vtanh.f32 %v4098_v47 }
0x1f00   :  { %v4113_v27 = vadd.f32 1.0, %v6720_v30  ;;  %6731 = vtanh.f32 %v4097_v20  ;;  %v6722_v52 = vpop.eup %6721 }
0x1f01   :  { %6733 = vrcp.f32 %v4114_v13  ;;  %v6724_v53 = vpop.eup %6723 }
0x1f02   :  { %6735 = vrcp.f32 %v4113_v27 }
0x1f07   :  { %v6726_v32 = vpop.eup %6725 }
0x1f08   :  { %v6728_v31 = vpop.eup %6727  ;;  %v4128_v45 = vsel %vm7560_vm5, %v6722_v52, %v6726_v32 }
0x1f09   :  { %v6730_v41 = vpop.eup %6729  ;;  %4141 = vrot.lane.b32.xlu1 %v4128_v45, %s7213_s24  ;;  %v4127_v54 = vsel %vm7560_vm5, %v6724_v53, %v6728_v31  ;;  %v4132_v18 = vmul.f32 %v4128_v45, %v8268_v51 }
0x1f0a   :  { %v6732_v5 = vpop.eup %6731  ;;  %4139 = vrot.lane.b32.xlu0 %v4127_v54, %s7213_s24  ;;  %v4131_v21 = vmul.f32 %v4127_v54, %v8270_v43 }
0x1f0b   :  { %v6734_v58 = vpop.eup %6733 }
0x1f0c   :  { %v6736_v29 = vpop.eup %6735  ;;  %v4130_v57 = vsel %vm7560_vm5, %v6730_v41, %v6734_v58 }
0x1f0d   :  { %4145 = vrot.lane.b32.xlu1 %v4130_v57, %s7213_s24  ;;  %v4129_v59 = vsel %vm7560_vm5, %v6732_v5, %v6736_v29  ;;  %v4134_v13 = vmul.f32 %v4130_v57, %v8276_v33 }
0x1f0e   :  { %4143 = vrot.lane.b32.xlu0 %v4129_v59, %s7213_s24  ;;  %v4133_v52 = vmul.f32 %v4129_v59, %v8278_v0 }
0x1f7b   :  { %v4142_v9 = vpop.permute.xlu1 %4141 }
0x1f7c   :  { %v4152_v4 = vmul.f32 %v4142_v9, %v4128_v45  ;;  %v4140_v3 = vpop.permute.xlu0 %4139 }
0x1f7d   :  { %v4151_v47 = vmul.f32 %v4140_v3, %v4127_v54 }
0x1f7e   :  { %4161 = vrot.lane.b32.xlu1 %v4152_v4, %s7214_s26 }
0x1f7f   :  { %v4146_v49 = vpop.permute.xlu1 %4145  ;;  %4159 = vrot.lane.b32.xlu0 %v4151_v47, %s7214_s26 }
0x1f80   :  { %v4154_v20 = vmul.f32 %v4146_v49, %v4130_v57  ;;  %v4144_v23 = vpop.permute.xlu0 %4143 }
0x1f81   :  { %v4153_v56 = vmul.f32 %v4144_v23, %v4129_v59 }
0x1f82   :  { %4165 = vrot.lane.b32.xlu1 %v4154_v20, %s7214_s26 }
0x1f83   :  { %4163 = vrot.lane.b32.xlu0 %v4153_v56, %s7214_s26 }
0x1ff0   :  { %v4162_v46 = vpop.permute.xlu1 %4161 }
0x1ff1   :  { %v8324_v28 = vadd.f32 %v4162_v46, %v4132_v18  ;;  %v4160_v8 = vpop.permute.xlu0 %4159 }
0x1ff2   :  { %v8326_v30 = vadd.f32 %v4160_v8, %v4131_v21  ;;  %v3422_v21 = vadd.f32 %v8142_v1, %v8116_v63 }
0x1ff3   :  { %6737 = vtanh.f32 %v8324_v28 }
0x1ff4   :  { %6739 = vtanh.f32 %v8326_v30  ;;  %v4166_v27 = vpop.permute.xlu1 %4165 }
0x1ff5   :  { %v8332_v53 = vadd.f32 %v4166_v27, %v4134_v13  ;;  %v4164_v51 = vpop.permute.xlu0 %4163  ;;  %v3417_v13 = vadd.f32 %v8116_v63, %v8144_v16 }
0x1ff6   :  { %v8334_v32 = vadd.f32 %v4164_v51, %v4133_v52 }
0x1ff7   :  { %6741 = vtanh.f32 %v8332_v53 }
0x1ff8   :  { %6743 = vtanh.f32 %v8334_v32 }
0x1ffd   :  { %v6738_v43 = vpop.eup %6737 }
0x1ffe   :  { %v6740_v31 = vpop.eup %6739  ;;  %4185 = vrot.lane.b32.xlu1 %v6738_v43, %s7213_s24 }
0x1fff   :  { %4183 = vrot.lane.b32.xlu0 %v6740_v31, %s7213_s24 }
0x2001   :  { %v6742_v33 = vpop.eup %6741 }
0x2002   :  { %v6744_v41 = vpop.eup %6743  ;;  %4189 = vrot.lane.b32.xlu1 %v6742_v33, %s7213_s24 }
0x2003   :  { %4187 = vrot.lane.b32.xlu0 %v6744_v41, %s7213_s24 }
0x2070   :  { %v4186_v0 = vpop.permute.xlu1 %4185 }
0x2071   :  { %v4196_v5 = vmul.f32 %v4186_v0, %v4128_v45  ;;  %v4184_v58 = vpop.permute.xlu0 %4183 }
0x2072   :  { %v4195_v29 = vmul.f32 %v4184_v58, %v4127_v54 }
0x2073   :  { %4209 = vrot.lane.b32.xlu1 %v4196_v5, %s7214_s26 }
0x2074   :  { %v4190_v9 = vpop.permute.xlu1 %4189  ;;  %4207 = vrot.lane.b32.xlu0 %v4195_v29, %s7214_s26 }
0x2075   :  { %v4198_v4 = vmul.f32 %v4190_v9, %v4130_v57  ;;  %v4188_v3 = vpop.permute.xlu0 %4187  ;;  %v3412_v57 = vadd.f32 %v8138_v37, %v8116_v63 }
0x2076   :  { %v4197_v47 = vmul.f32 %v4188_v3, %v4129_v59  ;;  %v3407_v59 = vadd.f32 %v8116_v63, %v8140_v38 }
0x2077   :  { %4213 = vrot.lane.b32.xlu1 %v4198_v4, %s7214_s26 }
0x2078   :  { %4211 = vrot.lane.b32.xlu0 %v4197_v47, %s7214_s26 }
0x20e5   :  { %v4210_v49 = vpop.permute.xlu1 %4209 }
0x20e6   :  { %v4208_v20 = vpop.permute.xlu0 %4207 }
0x20e7   :  { %6077 = vmatprep.mubr.msk.f32.mxu0 %vm160_vm0, %v4208_v20 }
0x20e8   :  { %6078 = vmatmul.mubr.msk.f32.vlgmr.msra.gmra.mrb[36].mxu0 %vm160_vm0, %v4210_v49 }
0x20e9   :  { %6276 = vmatpush3.bf16.msra.mxu0 %v8032_v24  ;;  %v4214_v54 = vpop.permute.xlu1 %4213 }
0x20ea   :  { %v4212_v45 = vpop.permute.xlu0 %4211  ;;  %6278 = vmatprep.subr.bf16.mxu0 %v8036_v25 }
0x20eb   :  { %6080 = vmatprep.mubr.msk.f32.mxu0 %vm160_vm0, %v4212_v45 }
0x20ec   :  { %6081 = vmatmul.mubr.msk.f32.gmra.mrb[38].mxu0 %vm160_vm0, %v4214_v54 }
0x20ed   :  { %6280 = vmatpush3.bf16.msra.mxu0 %v8036_v25 }
0x20ee   :  { %6282 = vmatprep.subr.bf16.mxu0 %v8032_v24 }
0x21bb   :  { %v6079_v23 = vpop.f32.mrb[36].mxu0 }
0x21bc   :  { %v4309_v56 = vadd.f32 %v6079_v23, %v3412_v57  ;;  %v4289_v18 = vpop.f32.mrb[37].mxu0 }
0x21bd   :  { %v4308_v46 = vadd.f32 %v4289_v18, %v3407_v59 }
0x21be   :  { %v5525_v8 = vmul.f32 -1.442695, %v4309_v56 }
0x21bf   :  { %v5524_v27 = vmul.f32 -1.442695, %v4308_v46  ;;  %v6082_v52 = vpop.f32.mrb[38].mxu0 }
0x21c0   :  { %6745 = vpow2.f32 %v5525_v8  ;;  %v4311_v51 = vadd.f32 %v6082_v52, %v3422_v21  ;;  %v4299_v43 = vpop.f32.mrb[39].mxu0 }
0x21c1   :  { %6747 = vpow2.f32 %v5524_v27  ;;  %v4310_v37 = vadd.f32 %v4299_v43, %v3417_v13 }
0x21c2   :  { %v5527_v31 = vmul.f32 -1.442695, %v4311_v51 }
0x21c3   :  { %v5526_v38 = vmul.f32 -1.442695, %v4310_v37 }
0x21c4   :  { %6749 = vpow2.f32 %v5527_v31 }
0x21c5   :  { %6751 = vpow2.f32 %v5526_v38 }
0x21c6   :  { %6753 = vtanh.f32 %v4309_v56 }
0x21c7   :  { %6755 = vtanh.f32 %v4308_v46 }
0x21ca   :  { %v6746_v33 = vpop.eup %6745 }
0x21cb   :  { %v6748_v41 = vpop.eup %6747  ;;  %v4325_v0 = vadd.f32 1.0, %v6746_v33 }
0x21cc   :  { %v4324_v1 = vadd.f32 1.0, %v6748_v41 }
0x21cd   :  { %6757 = vrcp.f32 %v4325_v0 }
0x21ce   :  { %v6750_v5 = vpop.eup %6749  ;;  %6759 = vrcp.f32 %v4324_v1 }
0x21cf   :  { %v6752_v16 = vpop.eup %6751  ;;  %v4327_v58 = vadd.f32 1.0, %v6750_v5  ;;  %6761 = vtanh.f32 %v4311_v51 }
0x21d0   :  { %v4326_v29 = vadd.f32 1.0, %v6752_v16  ;;  %6763 = vtanh.f32 %v4310_v37  ;;  %v6754_v9 = vpop.eup %6753 }
0x21d1   :  { %6765 = vrcp.f32 %v4327_v58  ;;  %v6756_v4 = vpop.eup %6755 }
0x21d2   :  { %6767 = vrcp.f32 %v4326_v29 }
0x21d7   :  { %v6758_v3 = vpop.eup %6757 }
0x21d8   :  { %v6760_v47 = vpop.eup %6759  ;;  %v4341_v49 = vsel %vm7560_vm5, %v6754_v9, %v6758_v3 }
0x21d9   :  { %v6762_v20 = vpop.eup %6761  ;;  %4354 = vrot.lane.b32.xlu1 %v4341_v49, %s7213_s24  ;;  %v4340_v45 = vsel %vm7560_vm5, %v6756_v4, %v6760_v47  ;;  %v4345_v43 = vmul.f32 %v4341_v49, %v8324_v28 }
0x21da   :  { %v6764_v54 = vpop.eup %6763  ;;  %4352 = vrot.lane.b32.xlu0 %v4340_v45, %s7213_s24  ;;  %v4344_v31 = vmul.f32 %v4340_v45, %v8326_v30 }
0x21db   :  { %v6766_v57 = vpop.eup %6765 }
0x21dc   :  { %v6768_v59 = vpop.eup %6767  ;;  %v4343_v23 = vsel %vm7560_vm5, %v6762_v20, %v6766_v57 }
0x21dd   :  { %4358 = vrot.lane.b32.xlu1 %v4343_v23, %s7213_s24  ;;  %v4342_v56 = vsel %vm7560_vm5, %v6764_v54, %v6768_v59  ;;  %v4347_v0 = vmul.f32 %v4343_v23, %v8332_v53 }
0x21de   :  { %4356 = vrot.lane.b32.xlu0 %v4342_v56, %s7213_s24  ;;  %v4346_v5 = vmul.f32 %v4342_v56, %v8334_v32 }
0x224b   :  { %v4355_v18 = vpop.permute.xlu1 %4354 }
0x224c   :  { %v4365_v46 = vmul.f32 %v4355_v18, %v4341_v49  ;;  %v4353_v21 = vpop.permute.xlu0 %4352 }
0x224d   :  { %v4364_v8 = vmul.f32 %v4353_v21, %v4340_v45 }
0x224e   :  { %4374 = vrot.lane.b32.xlu1 %v4365_v46, %s7214_s26 }
0x224f   :  { %v4359_v13 = vpop.permute.xlu1 %4358  ;;  %4372 = vrot.lane.b32.xlu0 %v4364_v8, %s7214_s26 }
0x2250   :  { %v4367_v27 = vmul.f32 %v4359_v13, %v4343_v23  ;;  %v4357_v52 = vpop.permute.xlu0 %4356 }
0x2251   :  { %v4366_v51 = vmul.f32 %v4357_v52, %v4342_v56  ;;  %v3442_v52 = vadd.f32 %v8168_v6, %v8116_v63 }
0x2252   :  { %4378 = vrot.lane.b32.xlu1 %v4367_v27, %s7214_s26 }
0x2253   :  { %4376 = vrot.lane.b32.xlu0 %v4366_v51, %s7214_s26 }
0x22c0   :  { %v4375_v37 = vpop.permute.xlu1 %4374 }
0x22c1   :  { %v8380_v38 = vadd.f32 %v4375_v37, %v4345_v43  ;;  %v4373_v33 = vpop.permute.xlu0 %4372  ;;  %v3437_v43 = vadd.f32 %v8116_v63, %v8174_v7 }
0x22c2   :  { %v8382_v41 = vadd.f32 %v4373_v33, %v4344_v31 }
0x22c3   :  { %6769 = vtanh.f32 %v8380_v38 }
0x22c4   :  { %6771 = vtanh.f32 %v8382_v41  ;;  %v4379_v1 = vpop.permute.xlu1 %4378 }
0x22c5   :  { %v8388_v16 = vadd.f32 %v4379_v1, %v4347_v0  ;;  %v4377_v28 = vpop.permute.xlu0 %4376 }
0x22c6   :  { %v8390_v58 = vadd.f32 %v4377_v28, %v4346_v5 }
0x22c7   :  { %6773 = vtanh.f32 %v8388_v16 }
0x22c8   :  { %6775 = vtanh.f32 %v8390_v58 }
0x22cd   :  { %v6770_v30 = vpop.eup %6769 }
0x22ce   :  { %v6772_v29 = vpop.eup %6771  ;;  %4398 = vrot.lane.b32.xlu1 %v6770_v30, %s7213_s24 }
0x22cf   :  { %4396 = vrot.lane.b32.xlu0 %v6772_v29, %s7213_s24 }
0x22d1   :  { %v6774_v53 = vpop.eup %6773 }
0x22d2   :  { %v6776_v9 = vpop.eup %6775  ;;  %4402 = vrot.lane.b32.xlu1 %v6774_v53, %s7213_s24 }
0x22d3   :  { %4400 = vrot.lane.b32.xlu0 %v6776_v9, %s7213_s24 }
0x2340   :  { %v4399_v32 = vpop.permute.xlu1 %4398 }
0x2341   :  { %v4409_v4 = vmul.f32 %v4399_v32, %v4341_v49  ;;  %v4397_v3 = vpop.permute.xlu0 %4396 }
0x2342   :  { %v4408_v47 = vmul.f32 %v4397_v3, %v4340_v45 }
0x2343   :  { %4422 = vrot.lane.b32.xlu1 %v4409_v4, %s7214_s26 }
0x2344   :  { %v4403_v20 = vpop.permute.xlu1 %4402  ;;  %4420 = vrot.lane.b32.xlu0 %v4408_v47, %s7214_s26 }
0x2345   :  { %v4411_v54 = vmul.f32 %v4403_v20, %v4343_v23  ;;  %v4401_v57 = vpop.permute.xlu0 %4400  ;;  %v3432_v23 = vadd.f32 %v8152_v55, %v8116_v63 }
0x2346   :  { %v4410_v59 = vmul.f32 %v4401_v57, %v4342_v56  ;;  %v3427_v56 = vadd.f32 %v8116_v63, %v8158_v17 }
0x2347   :  { %4426 = vrot.lane.b32.xlu1 %v4411_v54, %s7214_s26 }
0x2348   :  { %4424 = vrot.lane.b32.xlu0 %v4410_v59, %s7214_s26 }
0x23b5   :  { %v4423_v18 = vpop.permute.xlu1 %4422 }
0x23b6   :  { %v4421_v46 = vpop.permute.xlu0 %4420 }
0x23b7   :  { %6091 = vmatprep.mubr.msk.f32.mxu0 %vm160_vm0, %v4421_v46 }
0x23b8   :  { %6092 = vmatmul.mubr.msk.f32.vlgmr.msra.gmra.mrb[40].mxu0 %vm160_vm0, %v4423_v18 }
0x23b9   :  { %6284 = vmatpush3.bf16.msra.mxu0 %v8032_v24  ;;  %v4427_v45 = vpop.permute.xlu1 %4426 }
0x23ba   :  { %v4425_v49 = vpop.permute.xlu0 %4424  ;;  %6286 = vmatprep.subr.bf16.mxu0 %v8036_v25 }
0x23bb   :  { %6094 = vmatprep.mubr.msk.f32.mxu0 %vm160_vm0, %v4425_v49 }
0x23bc   :  { %6095 = vmatmul.mubr.msk.f32.gmra.mrb[42].mxu0 %vm160_vm0, %v4427_v45 }
0x23bd   :  { %6288 = vmatpush3.bf16.msra.mxu0 %v8036_v25 }
0x23be   :  { %6290 = vmatprep.subr.bf16.mxu0 %v8032_v24 }
0x248b   :  { %v6093_v21 = vpop.f32.mrb[40].mxu0 }
0x248c   :  { %v4522_v8 = vadd.f32 %v6093_v21, %v3432_v23  ;;  %v4502_v13 = vpop.f32.mrb[41].mxu0 }
0x248d   :  { %v4521_v27 = vadd.f32 %v4502_v13, %v3427_v56 }
0x248e   :  { %v5533_v51 = vmul.f32 -1.442695, %v4522_v8 }
0x248f   :  { %v5532_v37 = vmul.f32 -1.442695, %v4521_v27  ;;  %v6096_v31 = vpop.f32.mrb[42].mxu0 }
0x2490   :  { %6777 = vpow2.f32 %v5533_v51  ;;  %v4524_v33 = vadd.f32 %v6096_v31, %v3442_v52  ;;  %v4512_v0 = vpop.f32.mrb[43].mxu0 }
0x2491   :  { %6779 = vpow2.f32 %v5532_v37  ;;  %v4523_v55 = vadd.f32 %v4512_v0, %v3437_v43 }
0x2492   :  { %v5535_v1 = vmul.f32 -1.442695, %v4524_v33 }
0x2493   :  { %v5534_v17 = vmul.f32 -1.442695, %v4523_v55 }
0x2494   :  { %6781 = vpow2.f32 %v5535_v1 }
0x2495   :  { %6783 = vpow2.f32 %v5534_v17 }
0x2496   :  { %6785 = vtanh.f32 %v4522_v8 }
0x2497   :  { %6787 = vtanh.f32 %v4521_v27 }
0x249a   :  { %v6778_v5 = vpop.eup %6777 }
0x249b   :  { %v6780_v28 = vpop.eup %6779  ;;  %v4538_v30 = vadd.f32 1.0, %v6778_v5 }
0x249c   :  { %v4537_v6 = vadd.f32 1.0, %v6780_v28 }
0x249d   :  { %6789 = vrcp.f32 %v4538_v30 }
0x249e   :  { %v6782_v29 = vpop.eup %6781  ;;  %6791 = vrcp.f32 %v4537_v6 }
0x249f   :  { %v6784_v63 = vpop.eup %6783  ;;  %v4540_v7 = vadd.f32 1.0, %v6782_v29  ;;  %6793 = vtanh.f32 %v4524_v33 }
0x24a0   :  { %v4539_v53 = vadd.f32 1.0, %v6784_v63  ;;  %6795 = vtanh.f32 %v4523_v55  ;;  %v6786_v9 = vpop.eup %6785 }
0x24a1   :  { %6797 = vrcp.f32 %v4540_v7  ;;  %v6788_v32 = vpop.eup %6787 }
0x24a2   :  { %6799 = vrcp.f32 %v4539_v53 }
0x24a7   :  { %v6790_v4 = vpop.eup %6789 }
0x24a8   :  { %v6792_v3 = vpop.eup %6791  ;;  %v4554_v47 = vsel %vm7560_vm5, %v6786_v9, %v6790_v4 }
0x24a9   :  { %v6794_v20 = vpop.eup %6793  ;;  %4567 = vrot.lane.b32.xlu1 %v4554_v47, %s7213_s24  ;;  %v4553_v54 = vsel %vm7560_vm5, %v6788_v32, %v6792_v3  ;;  %v4558_v51 = vmul.f32 %v4554_v47, %v8380_v38 }
0x24aa   :  { %v6796_v57 = vpop.eup %6795  ;;  %4565 = vrot.lane.b32.xlu0 %v4553_v54, %s7213_s24  ;;  %v4557_v37 = vmul.f32 %v4553_v54, %v8382_v41 }
0x24ab   :  { %v6798_v59 = vpop.eup %6797 }
0x24ac   :  { %v6800_v18 = vpop.eup %6799  ;;  %v4556_v46 = vsel %vm7560_vm5, %v6794_v20, %v6798_v59 }
0x24ad   :  { %4571 = vrot.lane.b32.xlu1 %v4556_v46, %s7213_s24  ;;  %v4555_v49 = vsel %vm7560_vm5, %v6796_v57, %v6800_v18  ;;  %v4560_v55 = vmul.f32 %v4556_v46, %v8388_v16  ;;  %v8469_v57 = vld [vmem:[%s8815_s12 + $0x1] ss:$0 sm:$0xff] }
0x24ae   :  { %4569 = vrot.lane.b32.xlu0 %v4555_v49, %s7213_s24  ;;  %v4559_v17 = vmul.f32 %v4555_v49, %v8390_v58  ;;  %v3452_v59 = vadd.f32 %v8469_v57, %v8179_v10  ;;  %v3447_v18 = vadd.f32 %v8469_v57, %v8181_v12 }
0x251b   :  { %v4568_v45 = vpop.permute.xlu1 %4567 }
0x251c   :  { %v4578_v23 = vmul.f32 %v4568_v45, %v4554_v47  ;;  %v4566_v56 = vpop.permute.xlu0 %4565 }
0x251d   :  { %v4577_v21 = vmul.f32 %v4566_v56, %v4553_v54  ;;  %v3462_v56 = vadd.f32 %v8469_v57, %v8185_v14 }
0x251e   :  { %4587 = vrot.lane.b32.xlu1 %v4578_v23, %s7214_s26 }
0x251f   :  { %v4572_v8 = vpop.permute.xlu1 %4571  ;;  %4585 = vrot.lane.b32.xlu0 %v4577_v21, %s7214_s26 }
0x2520   :  { %v4580_v13 = vmul.f32 %v4572_v8, %v4556_v46  ;;  %v4570_v27 = vpop.permute.xlu0 %4569  ;;  %v3457_v8 = vadd.f32 %v8469_v57, %v8187_v15 }
0x2521   :  { %v4579_v52 = vmul.f32 %v4570_v27, %v4555_v49 }
0x2522   :  { %4591 = vrot.lane.b32.xlu1 %v4580_v13, %s7214_s26 }
0x2523   :  { %4589 = vrot.lane.b32.xlu0 %v4579_v52, %s7214_s26 }
0x2590   :  { %v4588_v43 = vpop.permute.xlu1 %4587 }
0x2591   :  { %v8436_v31 = vadd.f32 %v4588_v43, %v4558_v51  ;;  %v4586_v33 = vpop.permute.xlu0 %4585 }
0x2592   :  { %v8438_v0 = vadd.f32 %v4586_v33, %v4557_v37 }
0x2593   :  { %6801 = vtanh.f32 %v8436_v31 }
0x2594   :  { %6803 = vtanh.f32 %v8438_v0  ;;  %v4592_v1 = vpop.permute.xlu1 %4591 }
0x2595   :  { %v8444_v5 = vadd.f32 %v4592_v1, %v4560_v55  ;;  %v4590_v38 = vpop.permute.xlu0 %4589 }
0x2596   :  { %v8446_v28 = vadd.f32 %v4590_v38, %v4559_v17 }
0x2597   :  { %6805 = vtanh.f32 %v8444_v5 }
0x2598   :  { %6807 = vtanh.f32 %v8446_v28 }
0x259d   :  { %v6802_v41 = vpop.eup %6801 }
0x259e   :  { %v6804_v30 = vpop.eup %6803  ;;  %4611 = vrot.lane.b32.xlu1 %v6802_v41, %s7213_s24 }
0x259f   :  { %4609 = vrot.lane.b32.xlu0 %v6804_v30, %s7213_s24 }
0x25a1   :  { %v6806_v16 = vpop.eup %6805 }
0x25a2   :  { %v6808_v6 = vpop.eup %6807  ;;  %4615 = vrot.lane.b32.xlu1 %v6806_v16, %s7213_s24 }
0x25a3   :  { %4613 = vrot.lane.b32.xlu0 %v6808_v6, %s7213_s24 }
0x2610   :  { %v4612_v58 = vpop.permute.xlu1 %4611 }
0x2611   :  { %v4622_v29 = vmul.f32 %v4612_v58, %v4554_v47  ;;  %v4610_v63 = vpop.permute.xlu0 %4609 }
0x2612   :  { %v4621_v7 = vmul.f32 %v4610_v63, %v4553_v54 }
0x2613   :  { %4635 = vrot.lane.b32.xlu1 %v4622_v29, %s7214_s26 }
0x2614   :  { %v4616_v53 = vpop.permute.xlu1 %4615  ;;  %4633 = vrot.lane.b32.xlu0 %v4621_v7, %s7214_s26 }
0x2615   :  { %v4624_v9 = vmul.f32 %v4616_v53, %v4556_v46  ;;  %v4614_v32 = vpop.permute.xlu0 %4613 }
0x2616   :  { %v4623_v4 = vmul.f32 %v4614_v32, %v4555_v49 }
0x2617   :  { %4639 = vrot.lane.b32.xlu1 %v4624_v9, %s7214_s26 }
0x2618   :  { %4637 = vrot.lane.b32.xlu0 %v4623_v4, %s7214_s26 }
0x2685   :  { %v4636_v3 = vpop.permute.xlu1 %4635 }
0x2686   :  { %v4634_v20 = vpop.permute.xlu0 %4633 }
0x2687   :  { %6105 = vmatprep.mubr.msk.f32.mxu0 %vm160_vm0, %v4634_v20 }
0x2688   :  { %6106 = vmatmul.mubr.msk.f32.vlgmr.msra.gmra.mrb[44].mxu0 %vm160_vm0, %v4636_v3 }
0x2689   :  { %6292 = vmatpush3.bf16.msra.mxu0 %v8032_v24  ;;  %v4640_v54 = vpop.permute.xlu1 %4639 }
0x268a   :  { %v4638_v47 = vpop.permute.xlu0 %4637  ;;  %6294 = vmatprep.subr.bf16.mxu0 %v8036_v25 }
0x268b   :  { %6108 = vmatprep.mubr.msk.f32.mxu0 %vm160_vm0, %v4638_v47 }
0x268c   :  { %6109 = vmatmul.mubr.msk.f32.gmra.mrb[46].mxu0 %vm160_vm0, %v4640_v54 }
0x268d   :  { %6296 = vmatpush3.bf16.msra.mxu0 %v8036_v25 }
0x268e   :  { %6298 = vmatprep.subr.bf16.mxu0 %v8032_v24 }
0x275b   :  { %v6107_v46 = vpop.f32.mrb[44].mxu0 }
0x275c   :  { %v4735_v49 = vadd.f32 %v6107_v46, %v3452_v59  ;;  %v4715_v45 = vpop.f32.mrb[45].mxu0 }
0x275d   :  { %v4734_v23 = vadd.f32 %v4715_v45, %v3447_v18 }
0x275e   :  { %v5541_v21 = vmul.f32 -1.442695, %v4735_v49 }
0x275f   :  { %v5540_v13 = vmul.f32 -1.442695, %v4734_v23  ;;  %v6110_v27 = vpop.f32.mrb[46].mxu0 }
0x2760   :  { %6809 = vpow2.f32 %v5541_v21  ;;  %v4737_v52 = vadd.f32 %v6110_v27, %v3462_v56  ;;  %v4725_v51 = vpop.f32.mrb[47].mxu0 }
0x2761   :  { %6811 = vpow2.f32 %v5540_v13  ;;  %v4736_v10 = vadd.f32 %v4725_v51, %v3457_v8 }
0x2762   :  { %v5543_v43 = vmul.f32 -1.442695, %v4737_v52 }
0x2763   :  { %v5542_v12 = vmul.f32 -1.442695, %v4736_v10 }
0x2764   :  { %6813 = vpow2.f32 %v5543_v43 }
0x2765   :  { %6815 = vpow2.f32 %v5542_v12 }
0x2766   :  { %6817 = vtanh.f32 %v4735_v49 }
0x2767   :  { %6819 = vtanh.f32 %v4734_v23 }
0x276a   :  { %v6810_v37 = vpop.eup %6809 }
0x276b   :  { %v6812_v33 = vpop.eup %6811  ;;  %v4751_v55 = vadd.f32 1.0, %v6810_v37 }
0x276c   :  { %v4750_v14 = vadd.f32 1.0, %v6812_v33 }
0x276d   :  { %6821 = vrcp.f32 %v4751_v55 }
0x276e   :  { %v6814_v1 = vpop.eup %6813  ;;  %6823 = vrcp.f32 %v4750_v14 }
0x276f   :  { %v6816_v15 = vpop.eup %6815  ;;  %v4753_v17 = vadd.f32 1.0, %v6814_v1  ;;  %6825 = vtanh.f32 %v4737_v52 }
0x2770   :  { %v4752_v38 = vadd.f32 1.0, %v6816_v15  ;;  %6827 = vtanh.f32 %v4736_v10  ;;  %v6818_v41 = vpop.eup %6817 }
0x2771   :  { %6829 = vrcp.f32 %v4753_v17  ;;  %v6820_v30 = vpop.eup %6819 }
0x2772   :  { %6831 = vrcp.f32 %v4752_v38 }
0x2777   :  { %v6822_v16 = vpop.eup %6821 }
0x2778   :  { %v6824_v6 = vpop.eup %6823  ;;  %v4767_v58 = vsel %vm7560_vm5, %v6818_v41, %v6822_v16 }
0x2779   :  { %v6826_v29 = vpop.eup %6825  ;;  %4780 = vrot.lane.b32.xlu1 %v4767_v58, %s7213_s24  ;;  %v4766_v63 = vsel %vm7560_vm5, %v6820_v30, %v6824_v6  ;;  %v4771_v45 = vmul.f32 %v4767_v58, %v8436_v31 }
0x277a   :  { %v6828_v7 = vpop.eup %6827  ;;  %4778 = vrot.lane.b32.xlu0 %v4766_v63, %s7213_s24  ;;  %v4770_v56 = vmul.f32 %v4766_v63, %v8438_v0  ;;  %v7221_v0 = vmov 7  }
0x277b   :  { %v6830_v53 = vpop.eup %6829  ;;  %6420 = vset.pattern.permute.xlu1 %v7221_v0  ;;  %6419 = vset.pattern.permute.xlu0 %v7221_v0 }
0x277c   :  { %v6832_v9 = vpop.eup %6831  ;;  %v4769_v32 = vsel %vm7560_vm5, %v6826_v29, %v6830_v53 }
0x277d   :  { %4784 = vrot.lane.b32.xlu1 %v4769_v32, %s7213_s24  ;;  %v4768_v4 = vsel %vm7560_vm5, %v6828_v7, %v6832_v9  ;;  %v4773_v27 = vmul.f32 %v4769_v32, %v8444_v5 }
0x277e   :  { %4782 = vrot.lane.b32.xlu0 %v4768_v4, %s7213_s24  ;;  %v4772_v51 = vmul.f32 %v4768_v4, %v8446_v28 }
0x27eb   :  { %v4781_v3 = vpop.permute.xlu1 %4780 }
0x27ec   :  { %v4791_v20 = vmul.f32 %v4781_v3, %v4767_v58  ;;  %v4779_v47 = vpop.permute.xlu0 %4778 }
0x27ed   :  { %v4790_v54 = vmul.f32 %v4779_v47, %v4766_v63 }
0x27ee   :  { %4800 = vrot.lane.b32.xlu1 %v4791_v20, %s7214_s26 }
0x27ef   :  { %v4785_v59 = vpop.permute.xlu1 %4784  ;;  %4798 = vrot.lane.b32.xlu0 %v4790_v54, %s7214_s26 }
0x27f0   :  { %v4793_v18 = vmul.f32 %v4785_v59, %v4769_v32  ;;  %v4783_v46 = vpop.permute.xlu0 %4782 }
0x27f1   :  { %v4792_v49 = vmul.f32 %v4783_v46, %v4768_v4 }
0x27f2   :  { %4804 = vrot.lane.b32.xlu1 %v4793_v18, %s7214_s26 }
0x27f3   :  { %4802 = vrot.lane.b32.xlu0 %v4792_v49, %s7214_s26 }
0x2860   :  { %v4801_v23 = vpop.permute.xlu1 %4800 }
0x2861   :  { %v8497_v21 = vadd.f32 %v4801_v23, %v4771_v45  ;;  %v4799_v8 = vpop.permute.xlu0 %4798 }
0x2862   :  { %v8499_v13 = vadd.f32 %v4799_v8, %v4770_v56 }
0x2863   :  { %6833 = vtanh.f32 %v8497_v21 }
0x2864   :  { %6835 = vtanh.f32 %v8499_v13  ;;  %v4805_v52 = vpop.permute.xlu1 %4804 }
0x2865   :  { %v8505_v10 = vadd.f32 %v4805_v52, %v4773_v27  ;;  %v4803_v31 = vpop.permute.xlu0 %4802 }
0x2866   :  { %v8507_v43 = vadd.f32 %v4803_v31, %v4772_v51 }
0x2867   :  { %6837 = vtanh.f32 %v8505_v10 }
0x2868   :  { %6839 = vtanh.f32 %v8507_v43 }
0x286d   :  { %v6834_v12 = vpop.eup %6833 }
0x286e   :  { %v6836_v37 = vpop.eup %6835  ;;  %4824 = vrot.lane.b32.xlu1 %v6834_v12, %s7213_s24 }
0x286f   :  { %4822 = vrot.lane.b32.xlu0 %v6836_v37, %s7213_s24 }
0x2871   :  { %v6838_v5 = vpop.eup %6837 }
0x2872   :  { %v6840_v28 = vpop.eup %6839  ;;  %4828 = vrot.lane.b32.xlu1 %v6838_v5, %s7213_s24 }
0x2873   :  { %4826 = vrot.lane.b32.xlu0 %v6840_v28, %s7213_s24 }
0x28e0   :  { %v4825_v33 = vpop.permute.xlu1 %4824 }
0x28e1   :  { %v4835_v55 = vmul.f32 %v4825_v33, %v4767_v58  ;;  %v4823_v14 = vpop.permute.xlu0 %4822 }
0x28e2   :  { %v4834_v1 = vmul.f32 %v4823_v14, %v4766_v63 }
0x28e3   :  { %4848 = vrot.lane.b32.xlu1 %v4835_v55, %s7214_s26 }
0x28e4   :  { %v4829_v15 = vpop.permute.xlu1 %4828  ;;  %4846 = vrot.lane.b32.xlu0 %v4834_v1, %s7214_s26 }
0x28e5   :  { %v4837_v17 = vmul.f32 %v4829_v15, %v4769_v32  ;;  %v4827_v38 = vpop.permute.xlu0 %4826  ;;  %v3472_v15 = vadd.f32 %v8469_v57, %v8190_v19 }
0x28e6   :  { %v4836_v41 = vmul.f32 %v4827_v38, %v4768_v4 }
0x28e7   :  { %4852 = vrot.lane.b32.xlu1 %v4837_v17, %s7214_s26  ;;  %v3467_v17 = vadd.f32 %v8469_v57, %v8192_v22 }
0x28e8   :  { %4850 = vrot.lane.b32.xlu0 %v4836_v41, %s7214_s26 }
0x28eb   :  { %1279 = vperm.xlu1 %6420, %v7534_v36  }
0x28ec   :  { %1275 = vperm.xlu0 %6419, %v7527_v34  }
0x28ef   :  { %1283 = vperm.xlu1 %6420, %v7530_v35   ;;  %v6940_v35 = vld [vmem:[%s8812_s9] ss:$0 sm:$0xff]  ;;  %s7222_s9 = smov 96  }
0x28f0   :  { %1287 = vperm.xlu0 %6419, %v7538_v39  }
0x2955   :  { %v4849_v30 = vpop.permute.xlu1 %4848 }
0x2956   :  { %v4847_v16 = vpop.permute.xlu0 %4846 }
0x2957   :  { %6119 = vmatprep.mubr.msk.f32.mxu0 %vm160_vm0, %v4847_v16 }
0x2958   :  { %6120 = vmatmul.mubr.msk.f32.vlgmr.msra.gmra.mrb[48].mxu0 %vm160_vm0, %v4849_v30 }
0x2959   :  { %6300 = vmatpush3.bf16.msra.mxu0 %v8032_v24  ;;  %v4853_v58 = vpop.permute.xlu1 %4852  ;;  %v6941_v24 = vld [vmem:[%s8815_s12] ss:$0 sm:$0xff]  ;;  %s7223_s12 = smov [#allocation19]  }
0x295a   :  { %v4851_v6 = vpop.permute.xlu0 %4850  ;;  %6302 = vmatprep.subr.bf16.mxu0 %v8036_v25  ;;  %s5327_s25 = sshll.u32 %s7223_s12, 4  ;;  %s5328_s25 = int_to_ptr.vmem [resolvable:$true] %s5327_s25 }
0x295b   :  { %6122 = vmatprep.mubr.msk.f32.mxu0 %vm160_vm0, %v4851_v6  ;;  %v3482_v6 = vadd.f32 %v8469_v57, %v8194_v50  ;;  %s7118_s17 = scalar_lea.vmem %s5328_s25, 1024  ;;  %p7123_p9 = scmp.lt.s32.totalorder %s5328_s25, %s5328_s25 }
0x295c   :  { %6123 = vmatmul.mubr.msk.f32.gmra.mrb[50].mxu0 %vm160_vm0, %v4853_v58  ;;  %p7119_p8 = scmp.ne.s32.totalorder %s5328_s25, %s7118_s17  ;;  %p7124_p10 = scmp.lt.s32.totalorder %s7118_s17, %s7118_s17 }
0x295d   :  { %6304 = vmatpush3.bf16.msra.mxu0 %v8036_v25 }
0x295e   :  { %p7125_p11 = por %p7124_p10, %p7123_p9 }
0x2960   :  { %p7126_p12 = pnand %p7125_p11, %p7119_p8 }
0x296a   :  { %v1280_v34 = vpop.permute.xlu1 %1279 }
0x296b   :  { %v1291_v36 = vmul.f32 %v6940_v35, %v1280_v34  ;;  %v1276_v39 = vpop.permute.xlu0 %1275  ;;  %v3477_v34 = vadd.f32 %v8469_v57, %v8196_v48 }
0x296c   :  { %v1290_v29 = vmul.f32 %v6940_v35, %v1276_v39 }
0x296d   :  { %v1295_v63 = vadd.f32 %v6941_v24, %v1291_v36 }
0x296e   :  { %v1294_v7 = vadd.f32 %v6941_v24, %v1290_v29  ;;  %v1284_v53 = vpop.permute.xlu1 %1283 }
0x296f   :  { %v2991_v9 = vadd.f32 %v8105_v44, %v1295_v63  ;;  %v1292_v32 = vmul.f32 %v6940_v35, %v1284_v53  ;;  %v1288_v4 = vpop.permute.xlu0 %1287 }
0x2970   :  { %v2990_v25 = vadd.f32 %v8107_v26, %v1294_v7  ;;  %v1293_v3 = vmul.f32 %v6940_v35, %v1288_v4 }
0x2971   :  { %v5455_v20 = vmul.f32 -1.442695, %v2991_v9  ;;  %v1296_v47 = vadd.f32 %v6941_v24, %v1292_v32 }
0x2972   :  { %v5454_v54 = vmul.f32 -1.442695, %v2990_v25  ;;  %v1297_v59 = vadd.f32 %v6941_v24, %v1293_v3 }
0x2973   :  { %6841 = vpow2.f32 %v5455_v20  ;;  %v2992_v18 = vadd.f32 %v8111_v62, %v1296_v47 }
0x2974   :  { %6843 = vpow2.f32 %v5454_v54  ;;  %v2993_v46 = vadd.f32 %v8109_v60, %v1297_v59 }
0x2975   :  { %v5456_v49 = vmul.f32 -1.442695, %v2992_v18 }
0x2976   :  { %v5457_v45 = vmul.f32 -1.442695, %v2993_v46 }
0x2977   :  { %6845 = vpow2.f32 %v5456_v49 }
0x2978   :  { %6847 = vpow2.f32 %v5457_v45 }
0x2979   :  { %6849 = vtanh.f32 %v2991_v9 }
0x297a   :  { %6851 = vtanh.f32 %v2990_v25 }
0x297d   :  { %v6842_v44 = vpop.eup %6841 }
0x297e   :  { %v6844_v23 = vpop.eup %6843  ;;  %v3007_v56 = vadd.f32 1.0, %v6842_v44 }
0x297f   :  { %v3006_v26 = vadd.f32 1.0, %v6844_v23 }
0x2980   :  { %6853 = vrcp.f32 %v3007_v56 }
0x2981   :  { %v6846_v8 = vpop.eup %6845  ;;  %6855 = vrcp.f32 %v3006_v26 }
0x2982   :  { %v6848_v27 = vpop.eup %6847  ;;  %v3008_v52 = vadd.f32 1.0, %v6846_v8  ;;  %6857 = vtanh.f32 %v2992_v18 }
0x2983   :  { %v3009_v62 = vadd.f32 1.0, %v6848_v27  ;;  %6859 = vtanh.f32 %v2993_v46  ;;  %v6850_v60 = vpop.eup %6849 }
0x2984   :  { %6861 = vrcp.f32 %v3008_v52  ;;  %v6852_v51 = vpop.eup %6851 }
0x2985   :  { %6863 = vrcp.f32 %v3009_v62 }
0x298a   :  { %v6854_v31 = vpop.eup %6853 }
0x298b   :  { %v6856_v0 = vpop.eup %6855  ;;  %v8542_v12 = vsel %vm7560_vm5, %v6850_v60, %v6854_v31 }
0x298c   :  { %v6858_v37 = vpop.eup %6857  ;;  %3036 = vrot.lane.b32.xlu0 %v8542_v12, %s7213_s24  ;;  %v8548_v5 = vsel %vm7560_vm5, %v6852_v51, %v6856_v0 }
0x298d   :  { %v6860_v28 = vpop.eup %6859  ;;  %3034 = vrot.lane.b32.xlu1 %v8548_v5, %s7213_s24 }
0x298e   :  { %v6862_v33 = vpop.eup %6861 }
0x298f   :  { %v6864_v55 = vpop.eup %6863  ;;  %v8554_v14 = vsel %vm7560_vm5, %v6858_v37, %v6862_v33 }
0x2990   :  { %v8558_v1 = vsel %vm7560_vm5, %v6860_v28, %v6864_v55 }
0x2991   :  { %3038 = vrot.lane.b32.xlu1 %v8554_v14, %s7213_s24  ;;  %3040 = vrot.lane.b32.xlu0 %v8558_v1, %s7213_s24 }
0x29fe   :  { %v3037_v49 = vpop.permute.xlu0 %3036 }
0x29ff   :  { %v3035_v44 = vpop.permute.xlu1 %3034  ;;  %v3047_v8 = vmul.f32 %v3037_v49, %v8542_v12 }
0x2a00   :  { %v3046_v27 = vmul.f32 %v3035_v44, %v8548_v5 }
0x2a03   :  { %v3041_v52 = vpop.permute.xlu0 %3040  ;;  %v3039_v62 = vpop.permute.xlu1 %3038 }
0x2a04   :  { %v3049_v60 = vmul.f32 %v3041_v52, %v8558_v1  ;;  %v3048_v51 = vmul.f32 %v3039_v62, %v8554_v14 }
0x2a2b   :  { %v6121_v38 = vpop.f32.mrb[48].mxu0 }
0x2a2c   :  { %v4948_v41 = vadd.f32 %v6121_v38, %v3472_v15  ;;  %v4928_v30 = vpop.f32.mrb[49].mxu0  ;;  %v3027_v38 = vmul.f32 %v8542_v12, %v8012_v40  ;;  %v3028_v40 = vmul.f32 %v8554_v14, %v8024_v61 }
0x2a2d   :  { %v4947_v16 = vadd.f32 %v4928_v30, %v3467_v17  ;;  %v3026_v30 = vmul.f32 %v8548_v5, %v8014_v2 }
0x2a2e   :  { %v5549_v58 = vmul.f32 -1.442695, %v4948_v41 }
0x2a2f   :  { %v5548_v35 = vmul.f32 -1.442695, %v4947_v16  ;;  %v6124_v36 = vpop.f32.mrb[50].mxu0 }
0x2a30   :  { %6865 = vpow2.f32 %v5549_v58  ;;  %v4950_v39 = vadd.f32 %v6124_v36, %v3482_v6  ;;  %v4938_v29 = vpop.f32.mrb[51].mxu0 }
0x2a31   :  { %6867 = vpow2.f32 %v5548_v35  ;;  %v4949_v19 = vadd.f32 %v4938_v29, %v3477_v34  ;;  %v3029_v34 = vmul.f32 %v8558_v1, %v8022_v42 }
0x2a32   :  { %v5551_v24 = vmul.f32 -1.442695, %v4950_v39 }
0x2a33   :  { %v5550_v22 = vmul.f32 -1.442695, %v4949_v19 }
0x2a34   :  { %6869 = vpow2.f32 %v5551_v24 }
0x2a35   :  { %6871 = vpow2.f32 %v5550_v22 }
0x2a36   :  { %6873 = vtanh.f32 %v4948_v41 }
0x2a37   :  { %6875 = vtanh.f32 %v4947_v16 }
0x2a3a   :  { %v6866_v63 = vpop.eup %6865 }
0x2a3b   :  { %v6868_v7 = vpop.eup %6867  ;;  %v4964_v53 = vadd.f32 1.0, %v6866_v63 }
0x2a3c   :  { %v4963_v50 = vadd.f32 1.0, %v6868_v7 }
0x2a3d   :  { %6877 = vrcp.f32 %v4964_v53 }
0x2a3e   :  { %v6870_v9 = vpop.eup %6869  ;;  %6879 = vrcp.f32 %v4963_v50 }
0x2a3f   :  { %v6872_v48 = vpop.eup %6871  ;;  %v4966_v32 = vadd.f32 1.0, %v6870_v9  ;;  %6881 = vtanh.f32 %v4950_v39 }
0x2a40   :  { %v4965_v4 = vadd.f32 1.0, %v6872_v48  ;;  %6883 = vtanh.f32 %v4949_v19  ;;  %v6874_v25 = vpop.eup %6873 }
0x2a41   :  { %6885 = vrcp.f32 %v4966_v32  ;;  %v6876_v3 = vpop.eup %6875 }
0x2a42   :  { %6887 = vrcp.f32 %v4965_v4 }
0x2a47   :  { %v6878_v20 = vpop.eup %6877 }
0x2a48   :  { %v6880_v47 = vpop.eup %6879  ;;  %v8574_v54 = vsel %vm7560_vm5, %v6874_v25, %v6878_v20 }
0x2a49   :  { %v6882_v59 = vpop.eup %6881  ;;  %4993 = vrot.lane.b32.xlu0 %v8574_v54, %s7213_s24  ;;  %v8580_v18 = vsel %vm7560_vm5, %v6876_v3, %v6880_v47  ;;  %v4984_v61 = vmul.f32 %v8574_v54, %v8497_v21 }
0x2a4a   :  { %v6884_v46 = vpop.eup %6883  ;;  %4991 = vrot.lane.b32.xlu1 %v8580_v18, %s7213_s24  ;;  %v4983_v63 = vmul.f32 %v8580_v18, %v8499_v13 }
0x2a4b   :  { %v6886_v45 = vpop.eup %6885 }
0x2a4c   :  { %v6888_v23 = vpop.eup %6887  ;;  %v8586_v56 = vsel %vm7560_vm5, %v6882_v59, %v6886_v45 }
0x2a4d   :  { %4997 = vrot.lane.b32.xlu0 %v8586_v56, %s7213_s24  ;;  %v8592_v26 = vsel %vm7560_vm5, %v6884_v46, %v6888_v23  ;;  %v4986_v9 = vmul.f32 %v8586_v56, %v8505_v10 }
0x2a4e   :  { %4995 = vrot.lane.b32.xlu1 %v8592_v26, %s7213_s24  ;;  %v4985_v21 = vmul.f32 %v8592_v26, %v8507_v43 }
0x2a51   :  { %3056 = vrot.lane.b32.xlu0 %v3047_v8, %s7214_s26 }
0x2a52   :  { %3054 = vrot.lane.b32.xlu1 %v3046_v27, %s7214_s26 }
0x2a55   :  { %3060 = vrot.lane.b32.xlu0 %v3049_v60, %s7214_s26 }
0x2a56   :  { %3058 = vrot.lane.b32.xlu1 %v3048_v51, %s7214_s26 }
0x2abb   :  { %v4994_v31 = vpop.permute.xlu0 %4993 }
0x2abc   :  { %v5004_v0 = vmul.f32 %v4994_v31, %v8574_v54  ;;  %v4992_v37 = vpop.permute.xlu1 %4991 }
0x2abd   :  { %v5003_v28 = vmul.f32 %v4992_v37, %v8580_v18 }
0x2abe   :  { %5013 = vrot.lane.b32.xlu0 %v5004_v0, %s7214_s26 }
0x2abf   :  { %v4998_v33 = vpop.permute.xlu0 %4997  ;;  %5011 = vrot.lane.b32.xlu1 %v5003_v28, %s7214_s26 }
0x2ac0   :  { %v5006_v55 = vmul.f32 %v4998_v33, %v8586_v56  ;;  %v4996_v15 = vpop.permute.xlu1 %4995 }
0x2ac1   :  { %v5005_v17 = vmul.f32 %v4996_v15, %v8592_v26 }
0x2ac2   :  { %5017 = vrot.lane.b32.xlu0 %v5006_v55, %s7214_s26 }
0x2ac3   :  { %v3057_v41 = vpop.permute.xlu0 %3056  ;;  %5015 = vrot.lane.b32.xlu1 %v5005_v17, %s7214_s26 }
0x2ac4   :  { %v8616_v16 = vadd.f32 %v3057_v41, %v3027_v38  ;;  %v3055_v6 = vpop.permute.xlu1 %3054 }
0x2ac5   :  { %v8618_v58 = vadd.f32 %v3055_v6, %v3026_v30 }
0x2ac6   :  { %6889 = vtanh.f32 %v8616_v16 }
0x2ac7   :  { %6891 = vtanh.f32 %v8618_v58  ;;  %v3061_v35 = vpop.permute.xlu0 %3060 }
0x2ac8   :  { %v8626_v36 = vadd.f32 %v3061_v35, %v3029_v34  ;;  %v3059_v39 = vpop.permute.xlu1 %3058 }
0x2ac9   :  { %v8628_v2 = vadd.f32 %v3059_v39, %v3028_v40 }
0x2aca   :  { %6893 = vtanh.f32 %v8626_v36 }
0x2acb   :  { %6895 = vtanh.f32 %v8628_v2 }
0x2ad0   :  { %v6890_v29 = vpop.eup %6889 }
0x2ad1   :  { %v6892_v19 = vpop.eup %6891  ;;  %3080 = vrot.lane.b32.xlu0 %v6890_v29, %s7213_s24 }
0x2ad2   :  { %3078 = vrot.lane.b32.xlu1 %v6892_v19, %s7213_s24 }
0x2ad4   :  { %v6894_v42 = vpop.eup %6893 }
0x2ad5   :  { %v6896_v24 = vpop.eup %6895  ;;  %3084 = vrot.lane.b32.xlu0 %v6894_v42, %s7213_s24 }
0x2ad6   :  { %3082 = vrot.lane.b32.xlu1 %v6896_v24, %s7213_s24 }
0x2b30   :  { %v5014_v22 = vpop.permute.xlu0 %5013 }
0x2b31   :  { %v8640_v7 = vadd.f32 %v5014_v22, %v4984_v61  ;;  %v5012_v53 = vpop.permute.xlu1 %5011 }
0x2b32   :  { %v8642_v50 = vadd.f32 %v5012_v53, %v4983_v63 }
0x2b33   :  { %6897 = vtanh.f32 %v8640_v7 }
0x2b34   :  { %6899 = vtanh.f32 %v8642_v50  ;;  %v5018_v48 = vpop.permute.xlu0 %5017 }
0x2b35   :  { %v8650_v32 = vadd.f32 %v5018_v48, %v4986_v9  ;;  %v5016_v4 = vpop.permute.xlu1 %5015 }
0x2b36   :  { %v8652_v13 = vadd.f32 %v5016_v4, %v4985_v21 }
0x2b37   :  { %6901 = vtanh.f32 %v8650_v32 }
0x2b38   :  { %6903 = vtanh.f32 %v8652_v13 }
0x2b3d   :  { %v6898_v25 = vpop.eup %6897 }
0x2b3e   :  { %v6900_v3 = vpop.eup %6899  ;;  %5037 = vrot.lane.b32.xlu0 %v6898_v25, %s7213_s24 }
0x2b3f   :  { %5035 = vrot.lane.b32.xlu1 %v6900_v3, %s7213_s24 }
0x2b41   :  { %v6902_v10 = vpop.eup %6901 }
0x2b42   :  { %v6904_v20 = vpop.eup %6903  ;;  %5041 = vrot.lane.b32.xlu0 %v6902_v10, %s7213_s24 }
0x2b43   :  { %v3081_v43 = vpop.permute.xlu0 %3080  ;;  %5039 = vrot.lane.b32.xlu1 %v6904_v20, %s7213_s24 }
0x2b44   :  { %v3091_v47 = vmul.f32 %v3081_v43, %v8542_v12  ;;  %v3079_v59 = vpop.permute.xlu1 %3078 }
0x2b45   :  { %v3090_v46 = vmul.f32 %v3079_v59, %v8548_v5 }
0x2b46   :  { %3100 = vrot.lane.b32.xlu0 %v3091_v47, %s7214_s26 }
0x2b47   :  { %v3085_v49 = vpop.permute.xlu0 %3084  ;;  %3098 = vrot.lane.b32.xlu1 %v3090_v46, %s7214_s26 }
0x2b48   :  { %v3093_v45 = vmul.f32 %v3085_v49, %v8558_v1  ;;  %v3083_v44 = vpop.permute.xlu1 %3082 }
0x2b49   :  { %v3092_v23 = vmul.f32 %v3083_v44, %v8554_v14 }
0x2b4a   :  { %3104 = vrot.lane.b32.xlu0 %v3093_v45, %s7214_s26 }
0x2b4b   :  { %3102 = vrot.lane.b32.xlu1 %v3092_v23, %s7214_s26 }
0x2bb0   :  { %v5038_v8 = vpop.permute.xlu0 %5037 }
0x2bb1   :  { %v5048_v12 = vmul.f32 %v5038_v8, %v8574_v54  ;;  %v5036_v27 = vpop.permute.xlu1 %5035 }
0x2bb2   :  { %v5047_v5 = vmul.f32 %v5036_v27, %v8580_v18 }
0x2bb3   :  { %5061 = vrot.lane.b32.xlu0 %v5048_v12, %s7214_s26 }
0x2bb4   :  { %v5042_v52 = vpop.permute.xlu0 %5041  ;;  %5059 = vrot.lane.b32.xlu1 %v5047_v5, %s7214_s26 }
0x2bb5   :  { %v5050_v1 = vmul.f32 %v5042_v52, %v8586_v56  ;;  %v5040_v62 = vpop.permute.xlu1 %5039 }
0x2bb6   :  { %v5049_v14 = vmul.f32 %v5040_v62, %v8592_v26 }
0x2bb7   :  { %5065 = vrot.lane.b32.xlu0 %v5050_v1, %s7214_s26 }
0x2bb8   :  { %v3101_v60 = vpop.permute.xlu0 %3100  ;;  %5063 = vrot.lane.b32.xlu1 %v5049_v14, %s7214_s26 }
0x2bb9   :  { %3112 = vst.msk [vmem:[#allocation2 + $0xe8] sm:$0xff] %vm160_vm0, %v3101_v60  ;;  %3116 = vst.msk [vmem:[#allocation19 + $0x8] sm:$0xff] %vm160_vm0, %v3101_v60  ;;  %v3099_v54 = vpop.permute.xlu1 %3098 }
0x2bba   :  { %3111 = vst.msk [vmem:[#allocation2 + $0xe0] sm:$0xff] %vm160_vm0, %v3099_v54  ;;  %3115 = vst.msk [vmem:[#allocation19] sm:$0xff] %vm160_vm0, %v3099_v54 }
0x2bbc   :  { %v3105_v18 = vpop.permute.xlu0 %3104 }
0x2bbd   :  { %3114 = vst.msk [vmem:[#allocation2 + $0xf8] sm:$0xff] %vm160_vm0, %v3105_v18  ;;  %3118 = vst.msk [vmem:[#allocation19 + $0x18] sm:$0xff] %vm160_vm0, %v3105_v18  ;;  %v3103_v56 = vpop.permute.xlu1 %3102 }
0x2bbe   :  { %3113 = vst.msk [vmem:[#allocation2 + $0xf0] sm:$0xff] %vm160_vm0, %v3103_v56  ;;  %3117 = vst.msk [vmem:[#allocation19 + $0x10] sm:$0xff] %vm160_vm0, %v3103_v56 }
0x2bc0   :  { %v3168_v51 = vld [vmem:[#allocation2 + $0xe8] sm:$0xff] }
0x2bc1   :  { %v3167_v26 = vld [vmem:[#allocation2 + $0xe0] sm:$0xff] }
0x2bc2   :  { %6021 = vmatprep.mubr.msk.f32.mxu1 %vm160_vm0, %v3167_v26 }
0x2bc3   :  { %6022 = vmatmul.mubr.msk.f32.gmra.mrb[58].mxu1 %vm160_vm0, %v3168_v51 }
0x2bc4   :  { %v3170_v0 = vld [vmem:[#allocation2 + $0xf8] sm:$0xff] }
0x2bc5   :  { %v3169_v31 = vld [vmem:[#allocation2 + $0xf0] sm:$0xff] }
0x2bc6   :  { %6024 = vmatprep.mubr.msk.f32.mxu1 %vm160_vm0, %v3169_v31 }
0x2bc7   :  { %6025 = vmatmul.mubr.msk.f32.gmra.mrb[60].mxu1 %vm160_vm0, %v3170_v0 }
0x2c25   :  { %v5062_v37 = vpop.permute.xlu0 %5061 }
0x2c26   :  { %v5060_v28 = vpop.permute.xlu1 %5059 }
0x2c27   :  { %6133 = vmatprep.mubr.msk.f32.mxu0 %vm160_vm0, %v5060_v28 }
0x2c28   :  { %6134 = vmatmul.mubr.msk.f32.vlgmr.msra.gmra.mrb[52].mxu0 %vm160_vm0, %v5062_v37 }
0x2c29   :  { %v5066_v55 = vpop.permute.xlu0 %5065 }
0x2c2a   :  { %v5064_v33 = vpop.permute.xlu1 %5063 }
0x2c2b   :  { %6136 = vmatprep.mubr.msk.f32.mxu0 %vm160_vm0, %v5064_v33 }
0x2c2c   :  { %6137 = vmatmul.mubr.msk.f32.gmra.mrb[54].mxu0 %vm160_vm0, %v5066_v55 }
0x2c96   :  { %v6023_v15 = vpop.f32.mrb[58].mxu1 }
0x2c97   :  { %v3486_v17 = vpop.f32.mrb[59].mxu1  ;;  %v3492_v30 = vadd.f32 %v8469_v57, %v6023_v15 }
0x2c98   :  { %v3487_v6 = vadd.f32 %v8469_v57, %v3486_v17 }
0x2c9a   :  { %v6026_v38 = vpop.f32.mrb[60].mxu1 }
0x2c9b   :  { %v3496_v41 = vpop.f32.mrb[61].mxu1  ;;  %v3502_v29 = vadd.f32 %v8469_v57, %v6026_v38 }
0x2c9c   :  { %v3497_v42 = vadd.f32 %v8469_v57, %v3496_v41 }
0x2cfb   :  { %v6135_v34 = vpop.f32.mrb[52].mxu0 }
0x2cfc   :  { %v5161_v35 = vadd.f32 %v6135_v34, %v3492_v30  ;;  %v5141_v40 = vpop.f32.mrb[53].mxu0 }
0x2cfd   :  { %v5160_v39 = vadd.f32 %v5141_v40, %v3487_v6 }
0x2cfe   :  { %v5557_v19 = vmul.f32 -1.442695, %v5161_v35 }
0x2cff   :  { %v5556_v24 = vmul.f32 -1.442695, %v5160_v39  ;;  %v6138_v61 = vpop.f32.mrb[54].mxu0 }
0x2d00   :  { %6905 = vpow2.f32 %v5557_v19  ;;  %v5163_v22 = vadd.f32 %v6138_v61, %v3502_v29  ;;  %v5151_v63 = vpop.f32.mrb[55].mxu0 }
0x2d01   :  { %6907 = vpow2.f32 %v5556_v24  ;;  %v5162_v53 = vadd.f32 %v5151_v63, %v3497_v42 }
0x2d02   :  { %v5559_v9 = vmul.f32 -1.442695, %v5163_v22 }
0x2d03   :  { %v5558_v48 = vmul.f32 -1.442695, %v5162_v53 }
0x2d04   :  { %6909 = vpow2.f32 %v5559_v9 }
0x2d05   :  { %6911 = vpow2.f32 %v5558_v48 }
0x2d06   :  { %6913 = vtanh.f32 %v5161_v35 }
0x2d07   :  { %6915 = vtanh.f32 %v5160_v39 }
0x2d0a   :  { %v6906_v21 = vpop.eup %6905 }
0x2d0b   :  { %v6908_v4 = vpop.eup %6907  ;;  %v5177_v25 = vadd.f32 1.0, %v6906_v21 }
0x2d0c   :  { %v5176_v3 = vadd.f32 1.0, %v6908_v4 }
0x2d0d   :  { %6917 = vrcp.f32 %v5177_v25 }
0x2d0e   :  { %v6910_v10 = vpop.eup %6909  ;;  %6919 = vrcp.f32 %v5176_v3 }
0x2d0f   :  { %v6912_v57 = vpop.eup %6911  ;;  %v5179_v20 = vadd.f32 1.0, %v6910_v10  ;;  %6921 = vtanh.f32 %v5163_v22 }
0x2d10   :  { %v5178_v43 = vadd.f32 1.0, %v6912_v57  ;;  %6923 = vtanh.f32 %v5162_v53  ;;  %v6914_v47 = vpop.eup %6913 }
0x2d11   :  { %6925 = vrcp.f32 %v5179_v20  ;;  %v6916_v59 = vpop.eup %6915 }
0x2d12   :  { %6927 = vrcp.f32 %v5178_v43 }
0x2d17   :  { %v6918_v46 = vpop.eup %6917 }
0x2d18   :  { %v6920_v49 = vpop.eup %6919  ;;  %v5193_v45 = vsel %vm7560_vm5, %v6914_v47, %v6918_v46 }
0x2d19   :  { %v6922_v44 = vpop.eup %6921  ;;  %5206 = vrot.lane.b32.xlu0 %v5193_v45, %s7213_s24  ;;  %v5192_v23 = vsel %vm7560_vm5, %v6916_v59, %v6920_v49  ;;  %v5197_v11 = vmul.f32 %v5193_v45, %v8640_v7 }
0x2d1a   :  { %v6924_v8 = vpop.eup %6923  ;;  %5204 = vrot.lane.b32.xlu1 %v5192_v23, %s7213_s24  ;;  %v5196_v31 = vmul.f32 %v5192_v23, %v8642_v50 }
0x2d1b   :  { %v6926_v12 = vpop.eup %6925 }
0x2d1c   :  { %v6928_v27 = vpop.eup %6927  ;;  %v5195_v5 = vsel %vm7560_vm5, %v6922_v44, %v6926_v12 }
0x2d1d   :  { %5210 = vrot.lane.b32.xlu0 %v5195_v5, %s7213_s24  ;;  %v5194_v52 = vsel %vm7560_vm5, %v6924_v8, %v6928_v27  ;;  %v5199_v33 = vmul.f32 %v5195_v5, %v8650_v32 }
0x2d1e   :  { %5208 = vrot.lane.b32.xlu1 %v5194_v52, %s7213_s24  ;;  %v5198_v15 = vmul.f32 %v5194_v52, %v8652_v13 }
0x2d8b   :  { %v5207_v1 = vpop.permute.xlu0 %5206 }
0x2d8c   :  { %v5217_v62 = vmul.f32 %v5207_v1, %v5193_v45  ;;  %v5205_v14 = vpop.permute.xlu1 %5204 }
0x2d8d   :  { %v5216_v60 = vmul.f32 %v5205_v14, %v5192_v23 }
0x2d8e   :  { %5226 = vrot.lane.b32.xlu0 %v5217_v62, %s7214_s26 }
0x2d8f   :  { %v5211_v54 = vpop.permute.xlu0 %5210  ;;  %5224 = vrot.lane.b32.xlu1 %v5216_v60, %s7214_s26 }
0x2d90   :  { %v5219_v18 = vmul.f32 %v5211_v54, %v5195_v5  ;;  %v5209_v56 = vpop.permute.xlu1 %5208 }
0x2d91   :  { %v5218_v26 = vmul.f32 %v5209_v56, %v5194_v52 }
0x2d92   :  { %5230 = vrot.lane.b32.xlu0 %v5219_v18, %s7214_s26 }
0x2d93   :  { %5228 = vrot.lane.b32.xlu1 %v5218_v26, %s7214_s26 }
0x2e00   :  { %v5227_v51 = vpop.permute.xlu0 %5226 }
0x2e01   :  { %v5237_v0 = vadd.f32 %v5227_v51, %v5197_v11  ;;  %v5225_v37 = vpop.permute.xlu1 %5224 }
0x2e02   :  { %v5236_v28 = vadd.f32 %v5225_v37, %v5196_v31 }
0x2e03   :  { %6929 = vtanh.f32 %v5237_v0 }
0x2e04   :  { %6931 = vtanh.f32 %v5236_v28  ;;  %v5231_v55 = vpop.permute.xlu0 %5230 }
0x2e05   :  { %v5239_v17 = vadd.f32 %v5231_v55, %v5199_v33  ;;  %v5229_v38 = vpop.permute.xlu1 %5228 }
0x2e06   :  { %v5238_v41 = vadd.f32 %v5229_v38, %v5198_v15 }
0x2e07   :  { %6933 = vtanh.f32 %v5239_v17 }
0x2e08   :  { %6935 = vtanh.f32 %v5238_v41 }
0x2e0d   :  { %v6930_v30 = vpop.eup %6929 }
0x2e0e   :  { %v6932_v7 = vpop.eup %6931  ;;  %5250 = vrot.lane.b32.xlu0 %v6930_v30, %s7213_s24 }
0x2e0f   :  { %5248 = vrot.lane.b32.xlu1 %v6932_v7, %s7213_s24 }
0x2e11   :  { %v6934_v50 = vpop.eup %6933 }
0x2e12   :  { %v6936_v6 = vpop.eup %6935  ;;  %5254 = vrot.lane.b32.xlu0 %v6934_v50, %s7213_s24 }
0x2e13   :  { %5252 = vrot.lane.b32.xlu1 %v6936_v6, %s7213_s24  ;;  %s5315_s24 = sshll.u32 %s7224_s10, 4  ;;  %s8740_s24 = int_to_ptr.vmem [resolvable:$true] %s5315_s24 }
0x2e16   :  { %3125 = vrot.lane.b32.xlu0 %v8616_v16, %s7222_s9 }
0x2e17   :  { %3123 = vrot.lane.b32.xlu1 %v8618_v58, %s7222_s9 }
0x2e1a   :  { %3129 = vrot.lane.b32.xlu0 %v8626_v36, %s7222_s9 }
0x2e1b   :  { %3127 = vrot.lane.b32.xlu1 %v8628_v2, %s7222_s9 }
0x2e1e   :  { %5291 = vrot.lane.b32.xlu0 %v5237_v0, %s7222_s9 }
0x2e1f   :  { %5289 = vrot.lane.b32.xlu1 %v5236_v28, %s7222_s9 }
0x2e80   :  { %v5251_v32 = vpop.permute.xlu0 %5250 }
0x2e81   :  { %v5261_v13 = vmul.f32 %v5251_v32, %v5193_v45  ;;  %v5249_v34 = vpop.permute.xlu1 %5248 }
0x2e82   :  { %v5260_v35 = vmul.f32 %v5249_v34, %v5192_v23 }
0x2e83   :  { %5270 = vrot.lane.b32.xlu0 %v5261_v13, %s7214_s26 }
0x2e84   :  { %v5255_v40 = vpop.permute.xlu0 %5254  ;;  %5268 = vrot.lane.b32.xlu1 %v5260_v35, %s7214_s26 }
0x2e85   :  { %v5263_v39 = vmul.f32 %v5255_v40, %v5195_v5  ;;  %v5253_v29 = vpop.permute.xlu1 %5252 }
0x2e86   :  { %v5262_v16 = vmul.f32 %v5253_v29, %v5194_v52 }
0x2e87   :  { %5274 = vrot.lane.b32.xlu0 %v5263_v39, %s7214_s26 }
0x2e88   :  { %v3126_v58 = vpop.permute.xlu0 %3125  ;;  %5272 = vrot.lane.b32.xlu1 %v5262_v16, %s7214_s26  ;;  %s7225_s26 = smov [#allocation21]  }
0x2e89   :  { %3136 = vst.msk [vmem:[#allocation21 + $0x8] sm:$0xff] %vm160_vm0, %v3126_v58  ;;  %v3124_v36 = vpop.permute.xlu1 %3123  ;;  %s5339_s8 = sshll.u32 %s7225_s26, 4  ;;  %s8744_s8 = int_to_ptr.vmem [resolvable:$true] %s5339_s8 }
0x2e8a   :  { %3135 = vst.msk [vmem:[#allocation21] sm:$0xff] %vm160_vm0, %v3124_v36 }
0x2e8b   :  { %5295 = vrot.lane.b32.xlu0 %v5239_v17, %s7222_s9 }
0x2e8c   :  { %v3130_v2 = vpop.permute.xlu0 %3129  ;;  %5293 = vrot.lane.b32.xlu1 %v5238_v41, %s7222_s9 }
0x2e8d   :  { %3138 = vst.msk [vmem:[#allocation21 + $0x18] sm:$0xff] %vm160_vm0, %v3130_v2  ;;  %v3128_v19 = vpop.permute.xlu1 %3127 }
0x2e8e   :  { %3137 = vst.msk [vmem:[#allocation21 + $0x10] sm:$0xff] %vm160_vm0, %v3128_v19 }
0x2e90   :  { %v5292_v42 = vpop.permute.xlu0 %5291 }
0x2e91   :  { %5303 = vst.msk [vmem:[#allocation21 + $0x28] sm:$0xff] %vm160_vm0, %v5292_v42  ;;  %v5290_v24 = vpop.permute.xlu1 %5289 }
0x2e92   :  { %5302 = vst.msk [vmem:[#allocation21 + $0x20] sm:$0xff] %vm160_vm0, %v5290_v24 }
0x2ef5   :  { %v5271_v61 = vpop.permute.xlu0 %5270 }
0x2ef6   :  { %5282 = vst.msk [vmem:[#allocation19 + $0x28] sm:$0xff] %vm160_vm0, %v5271_v61  ;;  %5307 = vst.msk [vmem:[#allocation18 + $0x8] sm:$0xff] %vm160_vm0, %v5271_v61  ;;  %v5269_v22 = vpop.permute.xlu1 %5268 }
0x2ef7   :  { %5281 = vst.msk [vmem:[#allocation19 + $0x20] sm:$0xff] %vm160_vm0, %v5269_v22  ;;  %5306 = vst.msk [vmem:[#allocation18] sm:$0xff] %vm160_vm0, %v5269_v22 }
0x2ef9   :  { %v5275_v63 = vpop.permute.xlu0 %5274 }
0x2efa   :  { %5284 = vst.msk [vmem:[#allocation19 + $0x38] sm:$0xff] %vm160_vm0, %v5275_v63  ;;  %5309 = vst.msk [vmem:[#allocation18 + $0x18] sm:$0xff] %vm160_vm0, %v5275_v63  ;;  %v5273_v53 = vpop.permute.xlu1 %5272 }
0x2efb   :  { %5283 = vst.msk [vmem:[#allocation19 + $0x30] sm:$0xff] %vm160_vm0, %v5273_v53  ;;  %5308 = vst.msk [vmem:[#allocation18 + $0x10] sm:$0xff] %vm160_vm0, %v5273_v53 }
0x2efc   :  { %7129 = shalt.err (!%p7126_p12)
}
0x2efd   :  { %s7130_s20 = scalar_lea.hbm %s8817_s14, 1024 }
0x2efe   :  { %p7131_p13 = scmp.ne.s32.totalorder %s8817_s14, %s7130_s20  ;;  %p7134_p0 = scmp.lt.u32.totalorder %s7130_s20, %s8817_s14 }
0x2f00   :  { %p7136_p1 = pnand %p7134_p0, %p7131_p13 }
0x2f02   :  { %7139 = shalt.err (!%p7136_p1)
}
0x2f03   :  { %5333 = dma.vmem_to_hbm [thread:$0]  %s5328_s25, 1024, %s8817_s14, [#allocation20], %s7200_s30, %s7200_s30, %s7201_s16   ;;  %v5296_v9 = vpop.permute.xlu0 %5295 }
0x2f04   :  { %s7140_s19 = scalar_lea.vmem %s8740_s24, 512  ;;  %p7145_p3 = scmp.lt.s32.totalorder %s8740_s24, %s8740_s24 }
0x2f05   :  { %p7141_p2 = scmp.ne.s32.totalorder %s8740_s24, %s7140_s19  ;;  %p7146_p4 = scmp.lt.s32.totalorder %s7140_s19, %s7140_s19 }
0x2f07   :  { %p7147_p5 = por %p7146_p4, %p7145_p3 }
0x2f09   :  { %p7148_p6 = pnand %p7147_p5, %p7141_p2 }
0x2f0b   :  { %7151 = shalt.err (!%p7148_p6)
}
0x2f0c   :  { %s7152_s18 = scalar_lea.hbm %s8816_s13, 512 }
0x2f0d   :  { %p7153_p7 = scmp.ne.s32.totalorder %s8816_s13, %s7152_s18  ;;  %p7156_p8 = scmp.lt.u32.totalorder %s7152_s18, %s8816_s13 }
0x2f0f   :  { %p7158_p9 = pnand %p7156_p8, %p7153_p7 }
0x2f11   :  { %7161 = shalt.err (!%p7158_p9)
}
0x2f12   :  { %5321 = dma.vmem_to_hbm [thread:$0]  %s8740_s24, 512, %s8816_s13, [#allocation6], %s7200_s30, %s7200_s30, %s7201_s16   ;;  %5305 = vst.msk [vmem:[#allocation21 + $0x38] sm:$0xff] %vm160_vm0, %v5296_v9  ;;  %v5294_v48 = vpop.permute.xlu1 %5293 }
0x2f13   :  { %5304 = vst.msk [vmem:[#allocation21 + $0x30] sm:$0xff] %vm160_vm0, %v5294_v48  ;;  %s7162_s9 = scalar_lea.vmem %s8744_s8, 1024  ;;  %p7167_p11 = scmp.lt.s32.totalorder %s8744_s8, %s8744_s8 }
0x2f14   :  { %p7163_p10 = scmp.ne.s32.totalorder %s8744_s8, %s7162_s9  ;;  %p7168_p12 = scmp.lt.s32.totalorder %s7162_s9, %s7162_s9 }
0x2f16   :  { %p7169_p13 = por %p7168_p12, %p7167_p11 }
0x2f18   :  { %p7170_p0 = pnand %p7169_p13, %p7163_p10 }
0x2f1a   :  { %7173 = shalt.err (!%p7170_p0)
}
0x2f1b   :  { %s7174_s10 = scalar_lea.hbm %s8818_s15, 1024 }
0x2f1c   :  { %p7175_p1 = scmp.ne.s32.totalorder %s8818_s15, %s7174_s10  ;;  %p7178_p2 = scmp.lt.u32.totalorder %s7174_s10, %s8818_s15 }
0x2f1e   :  { %p7180_p3 = pnand %p7178_p2, %p7175_p1 }
0x2f20   :  { %7183 = shalt.err (!%p7180_p3)
}
0x2f21   :  { %5345 = dma.vmem_to_hbm [thread:$0]  %s8744_s8, 1024, %s8818_s15, [#allocation20], %s7200_s30, %s7200_s30, %s7201_s16  }
0x2f22   :  { %7194 = dma.done.wait [#allocation6], 512  }
0x2f23   :  { %7195 = vsyncadd [#allocation6], 4294966784 }
0x2f24   :  { %7196 = dma.done.wait [#allocation20], 2048  }
0x2f25   :  { %7197 = vsyncadd [#allocation20], 4294965248 }
0x2f26   :  { %5355 = vsyncpa [#allocation5], 1 }
0x2f27   :  { %5356 = vsyncpa [#allocation8], 1 }
0x2f28   :  { %5357 = vsyncpa [#allocation11], 1 }
0x2f29   :  { %5358 = vsyncpa [#allocation14], 1 }
0x2f2a   :  { %5359 = vsyncpa [#allocation17], 1 }
0x2f2b   :  { %5360 = vsyncpa [#allocation6], 1 }
0x2f2c   :  { %5361 = vsyncpa [#allocation20], 1 }

</bundles_post_ra>
